<compile_context>
chip_gen: v5e
topology: v5e:2x2
jax: 0.10.0
libtpu: 0.0.40
codegen_flags: <defaults>
</compile_context>

<pallas_src>
import functools

import jax
import jax.numpy as jnp
from jax import lax
from jax.experimental import pallas as pl
from jax.experimental.pallas import tpu as pltpu

LN_EPS_BERT = 1e-12   # HF BertModel LayerNorm eps
LN_EPS_HEAD = 1e-5    # torch.nn.LayerNorm default eps (classifier head)


# ---------------------------------------------------------------- helpers ----
def _ln(x, g, b, eps):
    mean = jnp.mean(x, axis=-1, keepdims=True)
    var = jnp.mean((x - mean) ** 2, axis=-1, keepdims=True)
    return (x - mean) * lax.rsqrt(var + eps) * g + b


def _gelu(x):
    # TODO(synk): HF 'gelu' is the exact erf GELU; tanh approximation differs by ~1e-3.
    c = jnp.float32(0.7978845608028654)  # sqrt(2/pi)
    return 0.5 * x * (1.0 + jnp.tanh(c * (x + 0.044715 * x * x * x)))


# ------------------------------------------------------------ fused kernel ----
def _bert_kernel(x_emb_ref, emb_g_ref, emb_b_ref, mask_ref,
                 wqkv_ref, wo_ref, wi_ref, wo2_ref, vec_ref,
                 wfuse_ref, cls_g_ref, cls_b_ref, fc_w_ref, fc_b_ref,
                 o_ref, x_scr, *, B, S, nH, dH, L, I):
    H = nH * dH
    M = B * S
    scale = 1.0 / (dH ** 0.5)

    # Embedding LayerNorm -> activation lives in VMEM scratch for the whole encoder.
    x_scr[...] = _ln(x_emb_ref[...], emb_g_ref[...], emb_b_ref[...], LN_EPS_BERT)

    # Additive attention-mask bias, hoisted out of the layer loop.
    mask = mask_ref[...].reshape(B, 1, S)          # broadcasts over query positions

    vecs = vec_ref[...]                            # (L, 8, Wmax) packed per-layer vectors
    fused = jnp.zeros((B, H), jnp.float32)         # fusion-weighted CLS accumulator

    for li in range(L):                            # static, unrolled layer loop (toy L)
        x = x_scr[...]                             # (M, H) f32, VMEM-resident

        bqkv  = vecs[li, 0, :3 * H]
        bo    = vecs[li, 1, :H]
        ln1_g = vecs[li, 2, :H]
        ln1_b = vecs[li, 3, :H]
        bi    = vecs[li, 4, :I]
        bo2   = vecs[li, 5, :H]
        ln2_g = vecs[li, 6, :H]
        ln2_b = vecs[li, 7, :H]

        # Fused QKV projection: one (M, H) @ (H, 3H) matmul, bf16 operands, f32 accum.
        qkv = jnp.dot(x.astype(jnp.bfloat16), wqkv_ref[li],
                      preferred_element_type=jnp.float32) + bqkv

        # Multi-head attention.  Each head's context is folded directly into the
        # output projection (ctx_h @ Wo[h*dH:(h+1)*dH, :]) and accumulated, so no
        # dH-wide concat / relayout is needed.  At real sizes, move heads/batch to
        # a 'parallel' grid axis (v7x second TensorCore) instead of this loop.
        wo_l = wo_ref[li]                          # (H, H) bf16
        acc = jnp.zeros((M, H), jnp.float32)
        for h in range(nH):
            q = qkv[:, h * dH:(h + 1) * dH].reshape(B, S, dH).astype(jnp.bfloat16)
            k = qkv[:, H + h * dH:H + (h + 1) * dH].reshape(B, S, dH).astype(jnp.bfloat16)
            v = qkv[:, 2 * H + h * dH:2 * H + (h + 1) * dH].reshape(B, S, dH).astype(jnp.bfloat16)
            s = jnp.einsum('bqd,bkd->bqk', q, k,
                           preferred_element_type=jnp.float32) * scale + mask
            s = s - jnp.max(s, axis=-1, keepdims=True)
            p = jnp.exp(s)
            p = p / jnp.sum(p, axis=-1, keepdims=True)         # exact softmax (f32)
            ctx = jnp.einsum('bqk,bkd->bqd', p.astype(jnp.bfloat16), v,
                             preferred_element_type=jnp.float32).reshape(M, dH)
            acc = acc + jnp.dot(ctx.astype(jnp.bfloat16), wo_l[h * dH:(h + 1) * dH, :],
                                preferred_element_type=jnp.float32)

        # Attention output bias + residual + LayerNorm (fused epilogue).
        x = _ln(acc + bo + x, ln1_g, ln1_b, LN_EPS_BERT)

        # FFN with GELU + residual + LayerNorm (all vector math in f32).
        inter = _gelu(jnp.dot(x.astype(jnp.bfloat16), wi_ref[li],
                              preferred_element_type=jnp.float32) + bi)
        ffn = jnp.dot(inter.astype(jnp.bfloat16), wo2_ref[li],
                      preferred_element_type=jnp.float32) + bo2
        x = _ln(ffn + x, ln2_g, ln2_b, LN_EPS_BERT)

        x_scr[...] = x
        # CLS rows (token 0 of every batch element) via strided scratch read.
        # Fusion weight is 0 for layers outside the last `fusion_layers`.
        cls = x_scr[pl.ds(0, B, stride=S), :]                  # (B, H)
        fused = fused + wfuse_ref[li] * cls

    # ---- Classifier head, fused into the same kernel ----
    # TODO(synk): nn.Dropout is identity at inference time; no stochastic dropout applied.
    fused = _ln(fused, cls_g_ref[...], cls_b_ref[...], LN_EPS_HEAD)
    logits = jnp.dot(fused, fc_w_ref[...],
                     preferred_element_type=jnp.float32) + fc_b_ref[...]
    logits = logits - jnp.max(logits, axis=-1, keepdims=True)
    e = jnp.exp(logits)
    o_ref[...] = e / jnp.sum(e, axis=-1, keepdims=True)        # exact output softmax


# ---------------------------------------------------------------- parameters ----
def init_params(key, *, vocab, max_pos, type_vocab, H, nH, L, I, C, F):
    del nH

    def nrm(k, shape):
        return 0.02 * jax.random.normal(k, shape, jnp.float32)

    keys = jax.random.split(key, 3 + L + 1)
    p = {
        "word_emb": nrm(keys[0], (vocab, H)),
        "pos_emb": nrm(keys[1], (max_pos, H)),
        "type_emb": nrm(keys[2], (type_vocab, H)),
        "emb_ln_g": jnp.ones((H,), jnp.float32),
        "emb_ln_b": jnp.zeros((H,), jnp.float32),
        "fusion_w": jnp.ones((F,), jnp.float32) / F,      # nn.Parameter(ones(F)/F)
        "cls_ln_g": jnp.ones((H,), jnp.float32),
        "cls_ln_b": jnp.zeros((H,), jnp.float32),
        "fc_w": nrm(keys[3 + L], (H, C)),
        "fc_b": jnp.zeros((C,), jnp.float32),
    }
    layers = []
    for li in range(L):
        lk = jax.random.split(keys[3 + li], 6)
        layers.append(dict(
            wq=nrm(lk[0], (H, H)), bq=jnp.zeros((H,), jnp.float32),
            wk=nrm(lk[1], (H, H)), bk=jnp.zeros((H,), jnp.float32),
            wv=nrm(lk[2], (H, H)), bv=jnp.zeros((H,), jnp.float32),
            wo=nrm(lk[3], (H, H)), bo=jnp.zeros((H,), jnp.float32),
            ln1_g=jnp.ones((H,), jnp.float32), ln1_b=jnp.zeros((H,), jnp.float32),
            wi=nrm(lk[4], (H, I)), bi=jnp.zeros((I,), jnp.float32),
            wo2=nrm(lk[5], (I, H)), bo2=jnp.zeros((H,), jnp.float32),
            ln2_g=jnp.ones((H,), jnp.float32), ln2_b=jnp.zeros((H,), jnp.float32),
        ))
    p["layers"] = layers
    return p


# -------------------------------------------------------------------- forward ----
def bert_classifier_forward(params, input_ids, attention_mask, *, nH, fusion_layers):
    B, S = input_ids.shape
    H = params["word_emb"].shape[1]
    L = len(params["layers"])
    I = params["layers"][0]["wi"].shape[1]
    C = params["fc_w"].shape[1]
    F = fusion_layers
    dH = H // nH
    M = B * S
    # TODO(synk): fusion over the embedding output (fusion_layers == L+1) not supported.
    assert F <= L

    # Embeddings (gathers are glue).  token_type_ids default to all-zeros, as in HF
    # BertModel when they are not passed -> type_emb[0] for every position.
    emb = (params["word_emb"][input_ids]
           + params["pos_emb"][None, :S, :]
           + params["type_emb"][0][None, None, :])
    x_emb = emb.reshape(M, H).astype(jnp.float32)

    # Additive attention mask bias, HF convention: (1 - mask) * -10000, keys only.
    mask_bias = (1.0 - attention_mask.astype(jnp.float32)) * -10000.0   # (B, S)

    lp = params["layers"]
    # Weight matrices stacked over layers; bf16 operands for the MXU (f32 accum in-kernel).
    wqkv = jnp.stack([jnp.concatenate([l["wq"], l["wk"], l["wv"]], axis=1)
                      for l in lp]).astype(jnp.bfloat16)                 # (L, H, 3H)
    wo = jnp.stack([l["wo"] for l in lp]).astype(jnp.bfloat16)           # (L, H, H)
    wi = jnp.stack([l["wi"] for l in lp]).astype(jnp.bfloat16)           # (L, H, I)
    wo2 = jnp.stack([l["wo2"] for l in lp]).astype(jnp.bfloat16)         # (L, I, H)

    # Pack all per-layer bias / LayerNorm vectors into a single (L, 8, Wmax) slab
    # so they arrive in one DMA (kept f32: they feed VPU math, not the MXU).
    Wmax = max(3 * H, I, H)

    def pad(v):
        return jnp.pad(v.astype(jnp.float32), (0, Wmax - v.shape[0]))

    vecs = jnp.stack([
        jnp.stack([pad(jnp.concatenate([l["bq"], l["bk"], l["bv"]])),
                   pad(l["bo"]), pad(l["ln1_g"]), pad(l["ln1_b"]),
                   pad(l["bi"]), pad(l["bo2"]), pad(l["ln2_g"]), pad(l["ln2_b"])])
        for l in lp])                                                    # (L, 8, Wmax)

    # Softmax over the fusion-weight *parameter*, zero-padded for non-fused layers.
    attn_w = jax.nn.softmax(params["fusion_w"].astype(jnp.float32))
    w_fuse = jnp.concatenate([jnp.zeros((L - F,), jnp.float32), attn_w])  # (L,)

    kernel = functools.partial(_bert_kernel, B=B, S=S, nH=nH, dH=dH, L=L, I=I)

    def full(shape):
        n = len(shape)
        return pl.BlockSpec(shape, lambda i, n=n: (0,) * n)

    # NOTE: at real BERT sizes (H=768, I=3072) switch back to per-layer streaming
    # (grid=(L,), 'arbitrary'), tile the matmuls with (tm,tn,tk) grids + f32 VMEM
    # accumulators (~half-size tiles on v7x, 64 MiB VMEM) and set an explicit
    # pltpu.CompilerParams(vmem_limit_bytes=...).  At these toy shapes everything
    # fits in VMEM, so a single grid step with an in-kernel layer loop is fastest.
    return pl.pallas_call(
        kernel,
        grid=(1,),
        in_specs=[
            full((M, H)),                                   # x_emb (pre-LN embeddings)
            full((1, H)),                                   # emb_ln_g
            full((1, H)),                                   # emb_ln_b
            full((B, S)),                                   # additive mask bias
            full((L, H, 3 * H)),                            # wqkv (bf16)
            full((L, H, H)),                                # wo   (bf16)
            full((L, H, I)),                                # wi   (bf16)
            full((L, I, H)),                                # wo2  (bf16)
            full((L, 8, Wmax)),                             # packed per-layer vectors
            pl.BlockSpec(memory_space=pltpu.MemorySpace.SMEM),  # fusion weights (L,)
            full((1, H)),                                   # cls_ln_g
            full((1, H)),                                   # cls_ln_b
            full((H, C)),                                   # fc_w
            full((1, C)),                                   # fc_b
        ],
        out_specs=pl.BlockSpec((B, C), lambda i: (0, 0)),
        out_shape=jax.ShapeDtypeStruct((B, C), jnp.float32),
        scratch_shapes=[pltpu.VMEM((M, H), jnp.float32)],
        compiler_params=pltpu.CompilerParams(dimension_semantics=("arbitrary",)),
    )(x_emb,
      params["emb_ln_g"].reshape(1, H), params["emb_ln_b"].reshape(1, H),
      mask_bias, wqkv, wo, wi, wo2, vecs, w_fuse,
      params["cls_ln_g"].reshape(1, H), params["cls_ln_b"].reshape(1, H),
      params["fc_w"], params["fc_b"].reshape(1, C))


# ----------------------------------------------------------------------- main ----
if __name__ == "__main__":
    B, S = 2, 8
    VOCAB, MAX_POS, TYPE_VOCAB = 50, 16, 2
    H, NH, L, I, C, F = 32, 4, 4, 64, 3, 4

    key = jax.random.PRNGKey(0)
    pkey, ikey = jax.random.split(key)
    params = init_params(pkey, vocab=VOCAB, max_pos=MAX_POS, type_vocab=TYPE_VOCAB,
                         H=H, nH=NH, L=L, I=I, C=C, F=F)

    input_ids = jax.random.randint(ikey, (B, S), 0, VOCAB, dtype=jnp.int32)
    attention_mask = jnp.array([[1] * S, [1] * (S - 2) + [0, 0]], dtype=jnp.int32)

    fwd = jax.jit(functools.partial(bert_classifier_forward, nH=NH, fusion_layers=F))
    probs = jax.block_until_ready(fwd(params, input_ids, attention_mask))

    assert probs.shape == (B, C)
    assert bool(jnp.all(jnp.isfinite(probs)))
    assert bool(jnp.allclose(jnp.sum(probs, axis=1), 1.0, atol=1e-5))
    print("KERNEL_OK")
</pallas_src>

<mosaic_0001>
module attributes {stable_mosaic.version = 11 : i64} {
  func.func @_bert_kernel(%arg0: i32, %arg1: memref<16x32xf32, #tpu.memory_space<vmem>>, %arg2: memref<1x32xf32, #tpu.memory_space<vmem>>, %arg3: memref<1x32xf32, #tpu.memory_space<vmem>>, %arg4: memref<2x8xf32, #tpu.memory_space<vmem>>, %arg5: memref<4x32x96xbf16, #tpu.memory_space<vmem>>, %arg6: memref<4x32x32xbf16, #tpu.memory_space<vmem>>, %arg7: memref<4x32x64xbf16, #tpu.memory_space<vmem>>, %arg8: memref<4x64x32xbf16, #tpu.memory_space<vmem>>, %arg9: memref<4x8x96xf32, #tpu.memory_space<vmem>>, %arg10: memref<4xf32, #tpu.memory_space<smem>>, %arg11: memref<1x32xf32, #tpu.memory_space<vmem>>, %arg12: memref<1x32xf32, #tpu.memory_space<vmem>>, %arg13: memref<32x3xf32, #tpu.memory_space<vmem>>, %arg14: memref<1x3xf32, #tpu.memory_space<vmem>>, %arg15: memref<2x3xf32, #tpu.memory_space<vmem>>, %arg16: memref<16x32xf32, #tpu.memory_space<vmem>>) attributes {dimension_semantics = [#tpu.dimension_semantics<arbitrary>], iteration_bounds = array<i64: 1>, scalar_prefetch = 0 : i64, scratch_operands = 1 : i64, tpu.core_type = #tpu.core_type<tc>, window_params = [{pipeline_mode = #tpu.pipeline_mode<synchronous>, transform_indices = @transform_0, window_bounds = array<i64: 16, 32>}, {pipeline_mode = #tpu.pipeline_mode<synchronous>, transform_indices = @transform_1, window_bounds = array<i64: 1, 32>}, {pipeline_mode = #tpu.pipeline_mode<synchronous>, transform_indices = @transform_2, window_bounds = array<i64: 1, 32>}, {pipeline_mode = #tpu.pipeline_mode<synchronous>, transform_indices = @transform_3, window_bounds = array<i64: 2, 8>}, {pipeline_mode = #tpu.pipeline_mode<synchronous>, transform_indices = @transform_4, window_bounds = array<i64: 4, 32, 96>}, {pipeline_mode = #tpu.pipeline_mode<synchronous>, transform_indices = @transform_5, window_bounds = array<i64: 4, 32, 32>}, {pipeline_mode = #tpu.pipeline_mode<synchronous>, transform_indices = @transform_6, window_bounds = array<i64: 4, 32, 64>}, {pipeline_mode = #tpu.pipeline_mode<synchronous>, transform_indices = @transform_7, window_bounds = array<i64: 4, 64, 32>}, {pipeline_mode = #tpu.pipeline_mode<synchronous>, transform_indices = @transform_8, window_bounds = array<i64: 4, 8, 96>}, {transform_indices = @transform_9, window_bounds = array<i64: 4>}, {pipeline_mode = #tpu.pipeline_mode<synchronous>, transform_indices = @transform_10, window_bounds = array<i64: 1, 32>}, {pipeline_mode = #tpu.pipeline_mode<synchronous>, transform_indices = @transform_11, window_bounds = array<i64: 1, 32>}, {pipeline_mode = #tpu.pipeline_mode<synchronous>, transform_indices = @transform_12, window_bounds = array<i64: 32, 3>}, {pipeline_mode = #tpu.pipeline_mode<synchronous>, transform_indices = @transform_13, window_bounds = array<i64: 1, 3>}, {pipeline_mode = #tpu.pipeline_mode<synchronous>, transform_indices = @transform_14, window_bounds = array<i64: 2, 3>}]} {
    %c0 = arith.constant 0 : index
    %c0_0 = arith.constant 0 : index
    %0 = vector.load %arg1[%c0, %c0_0] : memref<16x32xf32, #tpu.memory_space<vmem>>, vector<16x32xf32>
    %c0_1 = arith.constant 0 : index
    %c0_2 = arith.constant 0 : index
    %1 = vector.load %arg2[%c0_1, %c0_2] : memref<1x32xf32, #tpu.memory_space<vmem>>, vector<1x32xf32>
    %c0_3 = arith.constant 0 : index
    %c0_4 = arith.constant 0 : index
    %2 = vector.load %arg3[%c0_3, %c0_4] : memref<1x32xf32, #tpu.memory_space<vmem>>, vector<1x32xf32>
    %cst = arith.constant dense<0.000000e+00> : vector<16xf32>
    %3 = vector.multi_reduction <add>, %0, %cst [1] : vector<16x32xf32> to vector<16xf32>
    %4 = vector.shape_cast %3 : vector<16xf32> to vector<16x1xf32>
    %cst_5 = arith.constant 3.200000e+01 : f32
    %5 = vector.broadcast %cst_5 : f32 to vector<16x1xf32>
    %6 = arith.divf %4, %5 : vector<16x1xf32>
    %7 = vector.broadcast %6 : vector<16x1xf32> to vector<16x32xf32>
    %8 = arith.subf %0, %7 : vector<16x32xf32>
    %9 = arith.mulf %8, %8 : vector<16x32xf32>
    %cst_6 = arith.constant dense<0.000000e+00> : vector<16xf32>
    %10 = vector.multi_reduction <add>, %9, %cst_6 [1] : vector<16x32xf32> to vector<16xf32>
    %11 = vector.shape_cast %10 : vector<16xf32> to vector<16x1xf32>
    %cst_7 = arith.constant 3.200000e+01 : f32
    %12 = vector.broadcast %cst_7 : f32 to vector<16x1xf32>
    %13 = arith.divf %11, %12 : vector<16x1xf32>
    %14 = vector.broadcast %6 : vector<16x1xf32> to vector<16x32xf32>
    %15 = arith.subf %0, %14 : vector<16x32xf32>
    %cst_8 = arith.constant 9.99999996E-13 : f32
    %16 = vector.broadcast %cst_8 : f32 to vector<16x1xf32>
    %17 = arith.addf %13, %16 : vector<16x1xf32>
    %18 = math.rsqrt %17 : vector<16x1xf32>
    %19 = vector.broadcast %18 : vector<16x1xf32> to vector<16x32xf32>
    %20 = arith.mulf %15, %19 : vector<16x32xf32>
    %21 = vector.broadcast %1 : vector<1x32xf32> to vector<16x32xf32>
    %22 = arith.mulf %20, %21 : vector<16x32xf32>
    %23 = vector.broadcast %2 : vector<1x32xf32> to vector<16x32xf32>
    %24 = arith.addf %22, %23 : vector<16x32xf32>
    %c0_9 = arith.constant 0 : index
    %c0_10 = arith.constant 0 : index
    %25 = vector.load %arg16[%c0_9, %c0_10] : memref<16x32xf32, #tpu.memory_space<vmem>>, vector<16x32xf32>
    tpu.vector_store %arg16[%c0_9, %c0_10], %24 {strides = array<i32>} : memref<16x32xf32, #tpu.memory_space<vmem>>, vector<16x32xf32>,
    %c0_11 = arith.constant 0 : index
    %c0_12 = arith.constant 0 : index
    %26 = vector.load %arg4[%c0_11, %c0_12] : memref<2x8xf32, #tpu.memory_space<vmem>>, vector<2x8xf32>
    %27 = vector.shape_cast %26 : vector<2x8xf32> to vector<2x1x8xf32>
    %c0_13 = arith.constant 0 : index
    %c0_14 = arith.constant 0 : index
    %c0_15 = arith.constant 0 : index
    %28 = vector.load %arg9[%c0_13, %c0_14, %c0_15] : memref<4x8x96xf32, #tpu.memory_space<vmem>>, vector<4x8x96xf32>
    %cst_16 = arith.constant 0.000000e+00 : f32
    %29 = vector.broadcast %cst_16 : f32 to vector<2x32xf32>
    %c0_17 = arith.constant 0 : index
    %c0_18 = arith.constant 0 : index
    %30 = vector.load %arg16[%c0_17, %c0_18] : memref<16x32xf32, #tpu.memory_space<vmem>>, vector<16x32xf32>
    %31 = vector.extract_strided_slice %28 {offsets = [0, 0, 0], sizes = [1, 1, 96], strides = [1, 1, 1]} : vector<4x8x96xf32> to vector<1x1x96xf32>
    %32 = vector.shape_cast %31 : vector<1x1x96xf32> to vector<96xf32>
    %33 = vector.extract_strided_slice %28 {offsets = [0, 1, 0], sizes = [1, 1, 32], strides = [1, 1, 1]} : vector<4x8x96xf32> to vector<1x1x32xf32>
    %34 = vector.shape_cast %33 : vector<1x1x32xf32> to vector<32xf32>
    %35 = vector.extract_strided_slice %28 {offsets = [0, 2, 0], sizes = [1, 1, 32], strides = [1, 1, 1]} : vector<4x8x96xf32> to vector<1x1x32xf32>
    %36 = vector.shape_cast %35 : vector<1x1x32xf32> to vector<32xf32>
    %37 = vector.extract_strided_slice %28 {offsets = [0, 3, 0], sizes = [1, 1, 32], strides = [1, 1, 1]} : vector<4x8x96xf32> to vector<1x1x32xf32>
    %38 = vector.shape_cast %37 : vector<1x1x32xf32> to vector<32xf32>
    %39 = vector.extract_strided_slice %28 {offsets = [0, 4, 0], sizes = [1, 1, 64], strides = [1, 1, 1]} : vector<4x8x96xf32> to vector<1x1x64xf32>
    %40 = vector.shape_cast %39 : vector<1x1x64xf32> to vector<64xf32>
    %41 = vector.extract_strided_slice %28 {offsets = [0, 5, 0], sizes = [1, 1, 32], strides = [1, 1, 1]} : vector<4x8x96xf32> to vector<1x1x32xf32>
    %42 = vector.shape_cast %41 : vector<1x1x32xf32> to vector<32xf32>
    %43 = vector.extract_strided_slice %28 {offsets = [0, 6, 0], sizes = [1, 1, 32], strides = [1, 1, 1]} : vector<4x8x96xf32> to vector<1x1x32xf32>
    %44 = vector.shape_cast %43 : vector<1x1x32xf32> to vector<32xf32>
    %45 = vector.extract_strided_slice %28 {offsets = [0, 7, 0], sizes = [1, 1, 32], strides = [1, 1, 1]} : vector<4x8x96xf32> to vector<1x1x32xf32>
    %46 = vector.shape_cast %45 : vector<1x1x32xf32> to vector<32xf32>
    %47 = arith.truncf %30 : vector<16x32xf32> to vector<16x32xbf16>
    %c0_19 = arith.constant 0 : index
    %c0_20 = arith.constant 0 : index
    %c0_21 = arith.constant 0 : index
    %48 = vector.load %arg5[%c0_19, %c0_20, %c0_21] : memref<4x32x96xbf16, #tpu.memory_space<vmem>>, vector<1x32x96xbf16>
    %49 = vector.shape_cast %48 : vector<1x32x96xbf16> to vector<32x96xbf16>
    %cst_22 = arith.constant dense<0.000000e+00> : vector<16x96xf32>
    %50 = tpu.matmul %47, %49, %cst_22 {dimension_numbers = #tpu.dot_dimension_numbers<[1], [0], [0], [1], [0, 0, 1, 1], [], []>} : vector<16x32xbf16>, vector<32x96xbf16>, vector<16x96xf32> -> vector<16x96xf32>
    %51 = vector.shape_cast %32 : vector<96xf32> to vector<1x96xf32>
    %52 = vector.broadcast %51 : vector<1x96xf32> to vector<16x96xf32>
    %53 = arith.addf %50, %52 : vector<16x96xf32>
    %c0_23 = arith.constant 0 : index
    %c0_24 = arith.constant 0 : index
    %c0_25 = arith.constant 0 : index
    %54 = vector.load %arg6[%c0_23, %c0_24, %c0_25] : memref<4x32x32xbf16, #tpu.memory_space<vmem>>, vector<1x32x32xbf16>
    %55 = vector.shape_cast %54 : vector<1x32x32xbf16> to vector<32x32xbf16>
    %cst_26 = arith.constant 0.000000e+00 : f32
    %56 = vector.broadcast %cst_26 : f32 to vector<16x32xf32>
    %57 = vector.extract_strided_slice %53 {offsets = [0, 0], sizes = [16, 8], strides = [1, 1]} : vector<16x96xf32> to vector<16x8xf32>
    %58 = vector.shape_cast %57 : vector<16x8xf32> to vector<2x8x8xf32>
    %59 = arith.truncf %58 : vector<2x8x8xf32> to vector<2x8x8xbf16>
    %60 = vector.extract_strided_slice %53 {offsets = [0, 32], sizes = [16, 8], strides = [1, 1]} : vector<16x96xf32> to vector<16x8xf32>
    %61 = vector.shape_cast %60 : vector<16x8xf32> to vector<2x8x8xf32>
    %62 = arith.truncf %61 : vector<2x8x8xf32> to vector<2x8x8xbf16>
    %63 = vector.extract_strided_slice %53 {offsets = [0, 64], sizes = [16, 8], strides = [1, 1]} : vector<16x96xf32> to vector<16x8xf32>
    %64 = vector.shape_cast %63 : vector<16x8xf32> to vector<2x8x8xf32>
    %65 = arith.truncf %64 : vector<2x8x8xf32> to vector<2x8x8xbf16>
    "tpu.trace_start"() <{level = 10 : i32, message = "bqd,bkd->bqk"}> : () -> ()
    %cst_27 = arith.constant dense<0.000000e+00> : vector<2x8x8xf32>
    %66 = tpu.matmul %59, %62, %cst_27 {dimension_numbers = #tpu.dot_dimension_numbers<[2], [2], [1], [1], [0, 0, 0, 1, 1, 1], [0], [0]>} : vector<2x8x8xbf16>, vector<2x8x8xbf16>, vector<2x8x8xf32> -> vector<2x8x8xf32>
    "tpu.trace_stop"() : () -> ()
    %cst_28 = arith.constant 0.353553385 : f32
    %67 = vector.broadcast %cst_28 : f32 to vector<2x8x8xf32>
    %68 = arith.mulf %66, %67 : vector<2x8x8xf32>
    %69 = vector.broadcast %27 : vector<2x1x8xf32> to vector<2x8x8xf32>
    %70 = arith.addf %68, %69 : vector<2x8x8xf32>
    %cst_29 = arith.constant dense<0xFF800000> : vector<2x8xf32>
    %71 = vector.multi_reduction <maximumf>, %70, %cst_29 [2] : vector<2x8x8xf32> to vector<2x8xf32>
    %72 = vector.shape_cast %71 : vector<2x8xf32> to vector<2x8x1xf32>
    %73 = vector.broadcast %72 : vector<2x8x1xf32> to vector<2x8x8xf32>
    %74 = arith.subf %70, %73 : vector<2x8x8xf32>
    %75 = math.exp %74 : vector<2x8x8xf32>
    %cst_30 = arith.constant dense<0.000000e+00> : vector<2x8xf32>
    %76 = vector.multi_reduction <add>, %75, %cst_30 [2] : vector<2x8x8xf32> to vector<2x8xf32>
    %77 = vector.shape_cast %76 : vector<2x8xf32> to vector<2x8x1xf32>
    %78 = vector.broadcast %77 : vector<2x8x1xf32> to vector<2x8x8xf32>
    %79 = arith.divf %75, %78 : vector<2x8x8xf32>
    %80 = arith.truncf %79 : vector<2x8x8xf32> to vector<2x8x8xbf16>
    "tpu.trace_start"() <{level = 10 : i32, message = "bqk,bkd->bqd"}> : () -> ()
    %cst_31 = arith.constant dense<0.000000e+00> : vector<2x8x8xf32>
    %81 = tpu.matmul %80, %65, %cst_31 {dimension_numbers = #tpu.dot_dimension_numbers<[2], [1], [1], [2], [0, 0, 0, 1, 1, 2], [0], [0]>} : vector<2x8x8xbf16>, vector<2x8x8xbf16>, vector<2x8x8xf32> -> vector<2x8x8xf32>
    "tpu.trace_stop"() : () -> ()
    %82 = vector.shape_cast %81 : vector<2x8x8xf32> to vector<16x8xf32>
    %83 = arith.truncf %82 : vector<16x8xf32> to vector<16x8xbf16>
    %84 = vector.extract_strided_slice %55 {offsets = [0, 0], sizes = [8, 32], strides = [1, 1]} : vector<32x32xbf16> to vector<8x32xbf16>
    %cst_32 = arith.constant dense<0.000000e+00> : vector<16x32xf32>
    %85 = tpu.matmul %83, %84, %cst_32 {dimension_numbers = #tpu.dot_dimension_numbers<[1], [0], [0], [1], [0, 0, 1, 1], [], []>} : vector<16x8xbf16>, vector<8x32xbf16>, vector<16x32xf32> -> vector<16x32xf32>
    %86 = arith.addf %56, %85 : vector<16x32xf32>
    %87 = vector.extract_strided_slice %53 {offsets = [0, 8], sizes = [16, 8], strides = [1, 1]} : vector<16x96xf32> to vector<16x8xf32>
    %88 = vector.shape_cast %87 : vector<16x8xf32> to vector<2x8x8xf32>
    %89 = arith.truncf %88 : vector<2x8x8xf32> to vector<2x8x8xbf16>
    %90 = vector.extract_strided_slice %53 {offsets = [0, 40], sizes = [16, 8], strides = [1, 1]} : vector<16x96xf32> to vector<16x8xf32>
    %91 = vector.shape_cast %90 : vector<16x8xf32> to vector<2x8x8xf32>
    %92 = arith.truncf %91 : vector<2x8x8xf32> to vector<2x8x8xbf16>
    %93 = vector.extract_strided_slice %53 {offsets = [0, 72], sizes = [16, 8], strides = [1, 1]} : vector<16x96xf32> to vector<16x8xf32>
    %94 = vector.shape_cast %93 : vector<16x8xf32> to vector<2x8x8xf32>
    %95 = arith.truncf %94 : vector<2x8x8xf32> to vector<2x8x8xbf16>
    "tpu.trace_start"() <{level = 10 : i32, message = "bqd,bkd->bqk"}> : () -> ()
    %cst_33 = arith.constant dense<0.000000e+00> : vector<2x8x8xf32>
    %96 = tpu.matmul %89, %92, %cst_33 {dimension_numbers = #tpu.dot_dimension_numbers<[2], [2], [1], [1], [0, 0, 0, 1, 1, 1], [0], [0]>} : vector<2x8x8xbf16>, vector<2x8x8xbf16>, vector<2x8x8xf32> -> vector<2x8x8xf32>
    "tpu.trace_stop"() : () -> ()
    %cst_34 = arith.constant 0.353553385 : f32
    %97 = vector.broadcast %cst_34 : f32 to vector<2x8x8xf32>
    %98 = arith.mulf %96, %97 : vector<2x8x8xf32>
    %99 = vector.broadcast %27 : vector<2x1x8xf32> to vector<2x8x8xf32>
    %100 = arith.addf %98, %99 : vector<2x8x8xf32>
    %cst_35 = arith.constant dense<0xFF800000> : vector<2x8xf32>
    %101 = vector.multi_reduction <maximumf>, %100, %cst_35 [2] : vector<2x8x8xf32> to vector<2x8xf32>
    %102 = vector.shape_cast %101 : vector<2x8xf32> to vector<2x8x1xf32>
    %103 = vector.broadcast %102 : vector<2x8x1xf32> to vector<2x8x8xf32>
    %104 = arith.subf %100, %103 : vector<2x8x8xf32>
    %105 = math.exp %104 : vector<2x8x8xf32>
    %cst_36 = arith.constant dense<0.000000e+00> : vector<2x8xf32>
    %106 = vector.multi_reduction <add>, %105, %cst_36 [2] : vector<2x8x8xf32> to vector<2x8xf32>
    %107 = vector.shape_cast %106 : vector<2x8xf32> to vector<2x8x1xf32>
    %108 = vector.broadcast %107 : vector<2x8x1xf32> to vector<2x8x8xf32>
    %109 = arith.divf %105, %108 : vector<2x8x8xf32>
    %110 = arith.truncf %109 : vector<2x8x8xf32> to vector<2x8x8xbf16>
    "tpu.trace_start"() <{level = 10 : i32, message = "bqk,bkd->bqd"}> : () -> ()
    %cst_37 = arith.constant dense<0.000000e+00> : vector<2x8x8xf32>
    %111 = tpu.matmul %110, %95, %cst_37 {dimension_numbers = #tpu.dot_dimension_numbers<[2], [1], [1], [2], [0, 0, 0, 1, 1, 2], [0], [0]>} : vector<2x8x8xbf16>, vector<2x8x8xbf16>, vector<2x8x8xf32> -> vector<2x8x8xf32>
    "tpu.trace_stop"() : () -> ()
    %112 = vector.shape_cast %111 : vector<2x8x8xf32> to vector<16x8xf32>
    %113 = arith.truncf %112 : vector<16x8xf32> to vector<16x8xbf16>
    %114 = vector.extract_strided_slice %55 {offsets = [8, 0], sizes = [8, 32], strides = [1, 1]} : vector<32x32xbf16> to vector<8x32xbf16>
    %cst_38 = arith.constant dense<0.000000e+00> : vector<16x32xf32>
    %115 = tpu.matmul %113, %114, %cst_38 {dimension_numbers = #tpu.dot_dimension_numbers<[1], [0], [0], [1], [0, 0, 1, 1], [], []>} : vector<16x8xbf16>, vector<8x32xbf16>, vector<16x32xf32> -> vector<16x32xf32>
    %116 = arith.addf %86, %115 : vector<16x32xf32>
    %117 = vector.extract_strided_slice %53 {offsets = [0, 16], sizes = [16, 8], strides = [1, 1]} : vector<16x96xf32> to vector<16x8xf32>
    %118 = vector.shape_cast %117 : vector<16x8xf32> to vector<2x8x8xf32>
    %119 = arith.truncf %118 : vector<2x8x8xf32> to vector<2x8x8xbf16>
    %120 = vector.extract_strided_slice %53 {offsets = [0, 48], sizes = [16, 8], strides = [1, 1]} : vector<16x96xf32> to vector<16x8xf32>
    %121 = vector.shape_cast %120 : vector<16x8xf32> to vector<2x8x8xf32>
    %122 = arith.truncf %121 : vector<2x8x8xf32> to vector<2x8x8xbf16>
    %123 = vector.extract_strided_slice %53 {offsets = [0, 80], sizes = [16, 8], strides = [1, 1]} : vector<16x96xf32> to vector<16x8xf32>
    %124 = vector.shape_cast %123 : vector<16x8xf32> to vector<2x8x8xf32>
    %125 = arith.truncf %124 : vector<2x8x8xf32> to vector<2x8x8xbf16>
    "tpu.trace_start"() <{level = 10 : i32, message = "bqd,bkd->bqk"}> : () -> ()
    %cst_39 = arith.constant dense<0.000000e+00> : vector<2x8x8xf32>
    %126 = tpu.matmul %119, %122, %cst_39 {dimension_numbers = #tpu.dot_dimension_numbers<[2], [2], [1], [1], [0, 0, 0, 1, 1, 1], [0], [0]>} : vector<2x8x8xbf16>, vector<2x8x8xbf16>, vector<2x8x8xf32> -> vector<2x8x8xf32>
    "tpu.trace_stop"() : () -> ()
    %cst_40 = arith.constant 0.353553385 : f32
    %127 = vector.broadcast %cst_40 : f32 to vector<2x8x8xf32>
    %128 = arith.mulf %126, %127 : vector<2x8x8xf32>
    %129 = vector.broadcast %27 : vector<2x1x8xf32> to vector<2x8x8xf32>
    %130 = arith.addf %128, %129 : vector<2x8x8xf32>
    %cst_41 = arith.constant dense<0xFF800000> : vector<2x8xf32>
    %131 = vector.multi_reduction <maximumf>, %130, %cst_41 [2] : vector<2x8x8xf32> to vector<2x8xf32>
    %132 = vector.shape_cast %131 : vector<2x8xf32> to vector<2x8x1xf32>
    %133 = vector.broadcast %132 : vector<2x8x1xf32> to vector<2x8x8xf32>
    %134 = arith.subf %130, %133 : vector<2x8x8xf32>
    %135 = math.exp %134 : vector<2x8x8xf32>
    %cst_42 = arith.constant dense<0.000000e+00> : vector<2x8xf32>
    %136 = vector.multi_reduction <add>, %135, %cst_42 [2] : vector<2x8x8xf32> to vector<2x8xf32>
    %137 = vector.shape_cast %136 : vector<2x8xf32> to vector<2x8x1xf32>
    %138 = vector.broadcast %137 : vector<2x8x1xf32> to vector<2x8x8xf32>
    %139 = arith.divf %135, %138 : vector<2x8x8xf32>
    %140 = arith.truncf %139 : vector<2x8x8xf32> to vector<2x8x8xbf16>
    "tpu.trace_start"() <{level = 10 : i32, message = "bqk,bkd->bqd"}> : () -> ()
    %cst_43 = arith.constant dense<0.000000e+00> : vector<2x8x8xf32>
    %141 = tpu.matmul %140, %125, %cst_43 {dimension_numbers = #tpu.dot_dimension_numbers<[2], [1], [1], [2], [0, 0, 0, 1, 1, 2], [0], [0]>} : vector<2x8x8xbf16>, vector<2x8x8xbf16>, vector<2x8x8xf32> -> vector<2x8x8xf32>
    "tpu.trace_stop"() : () -> ()
    %142 = vector.shape_cast %141 : vector<2x8x8xf32> to vector<16x8xf32>
    %143 = arith.truncf %142 : vector<16x8xf32> to vector<16x8xbf16>
    %144 = vector.extract_strided_slice %55 {offsets = [16, 0], sizes = [8, 32], strides = [1, 1]} : vector<32x32xbf16> to vector<8x32xbf16>
    %cst_44 = arith.constant dense<0.000000e+00> : vector<16x32xf32>
    %145 = tpu.matmul %143, %144, %cst_44 {dimension_numbers = #tpu.dot_dimension_numbers<[1], [0], [0], [1], [0, 0, 1, 1], [], []>} : vector<16x8xbf16>, vector<8x32xbf16>, vector<16x32xf32> -> vector<16x32xf32>
    %146 = arith.addf %116, %145 : vector<16x32xf32>
    %147 = vector.extract_strided_slice %53 {offsets = [0, 24], sizes = [16, 8], strides = [1, 1]} : vector<16x96xf32> to vector<16x8xf32>
    %148 = vector.shape_cast %147 : vector<16x8xf32> to vector<2x8x8xf32>
    %149 = arith.truncf %148 : vector<2x8x8xf32> to vector<2x8x8xbf16>
    %150 = vector.extract_strided_slice %53 {offsets = [0, 56], sizes = [16, 8], strides = [1, 1]} : vector<16x96xf32> to vector<16x8xf32>
    %151 = vector.shape_cast %150 : vector<16x8xf32> to vector<2x8x8xf32>
    %152 = arith.truncf %151 : vector<2x8x8xf32> to vector<2x8x8xbf16>
    %153 = vector.extract_strided_slice %53 {offsets = [0, 88], sizes = [16, 8], strides = [1, 1]} : vector<16x96xf32> to vector<16x8xf32>
    %154 = vector.shape_cast %153 : vector<16x8xf32> to vector<2x8x8xf32>
    %155 = arith.truncf %154 : vector<2x8x8xf32> to vector<2x8x8xbf16>
    "tpu.trace_start"() <{level = 10 : i32, message = "bqd,bkd->bqk"}> : () -> ()
    %cst_45 = arith.constant dense<0.000000e+00> : vector<2x8x8xf32>
    %156 = tpu.matmul %149, %152, %cst_45 {dimension_numbers = #tpu.dot_dimension_numbers<[2], [2], [1], [1], [0, 0, 0, 1, 1, 1], [0], [0]>} : vector<2x8x8xbf16>, vector<2x8x8xbf16>, vector<2x8x8xf32> -> vector<2x8x8xf32>
    "tpu.trace_stop"() : () -> ()
    %cst_46 = arith.constant 0.353553385 : f32
    %157 = vector.broadcast %cst_46 : f32 to vector<2x8x8xf32>
    %158 = arith.mulf %156, %157 : vector<2x8x8xf32>
    %159 = vector.broadcast %27 : vector<2x1x8xf32> to vector<2x8x8xf32>
    %160 = arith.addf %158, %159 : vector<2x8x8xf32>
    %cst_47 = arith.constant dense<0xFF800000> : vector<2x8xf32>
    %161 = vector.multi_reduction <maximumf>, %160, %cst_47 [2] : vector<2x8x8xf32> to vector<2x8xf32>
    %162 = vector.shape_cast %161 : vector<2x8xf32> to vector<2x8x1xf32>
    %163 = vector.broadcast %162 : vector<2x8x1xf32> to vector<2x8x8xf32>
    %164 = arith.subf %160, %163 : vector<2x8x8xf32>
    %165 = math.exp %164 : vector<2x8x8xf32>
    %cst_48 = arith.constant dense<0.000000e+00> : vector<2x8xf32>
    %166 = vector.multi_reduction <add>, %165, %cst_48 [2] : vector<2x8x8xf32> to vector<2x8xf32>
    %167 = vector.shape_cast %166 : vector<2x8xf32> to vector<2x8x1xf32>
    %168 = vector.broadcast %167 : vector<2x8x1xf32> to vector<2x8x8xf32>
    %169 = arith.divf %165, %168 : vector<2x8x8xf32>
    %170 = arith.truncf %169 : vector<2x8x8xf32> to vector<2x8x8xbf16>
    "tpu.trace_start"() <{level = 10 : i32, message = "bqk,bkd->bqd"}> : () -> ()
    %cst_49 = arith.constant dense<0.000000e+00> : vector<2x8x8xf32>
    %171 = tpu.matmul %170, %155, %cst_49 {dimension_numbers = #tpu.dot_dimension_numbers<[2], [1], [1], [2], [0, 0, 0, 1, 1, 2], [0], [0]>} : vector<2x8x8xbf16>, vector<2x8x8xbf16>, vector<2x8x8xf32> -> vector<2x8x8xf32>
    "tpu.trace_stop"() : () -> ()
    %172 = vector.shape_cast %171 : vector<2x8x8xf32> to vector<16x8xf32>
    %173 = arith.truncf %172 : vector<16x8xf32> to vector<16x8xbf16>
    %174 = vector.extract_strided_slice %55 {offsets = [24, 0], sizes = [8, 32], strides = [1, 1]} : vector<32x32xbf16> to vector<8x32xbf16>
    %cst_50 = arith.constant dense<0.000000e+00> : vector<16x32xf32>
    %175 = tpu.matmul %173, %174, %cst_50 {dimension_numbers = #tpu.dot_dimension_numbers<[1], [0], [0], [1], [0, 0, 1, 1], [], []>} : vector<16x8xbf16>, vector<8x32xbf16>, vector<16x32xf32> -> vector<16x32xf32>
    %176 = arith.addf %146, %175 : vector<16x32xf32>
    %177 = vector.shape_cast %34 : vector<32xf32> to vector<1x32xf32>
    %178 = vector.broadcast %177 : vector<1x32xf32> to vector<16x32xf32>
    %179 = arith.addf %176, %178 : vector<16x32xf32>
    %180 = arith.addf %179, %30 : vector<16x32xf32>
    %cst_51 = arith.constant dense<0.000000e+00> : vector<16xf32>
    %181 = vector.multi_reduction <add>, %180, %cst_51 [1] : vector<16x32xf32> to vector<16xf32>
    %182 = vector.shape_cast %181 : vector<16xf32> to vector<16x1xf32>
    %cst_52 = arith.constant 3.200000e+01 : f32
    %183 = vector.broadcast %cst_52 : f32 to vector<16x1xf32>
    %184 = arith.divf %182, %183 : vector<16x1xf32>
    %185 = vector.broadcast %184 : vector<16x1xf32> to vector<16x32xf32>
    %186 = arith.subf %180, %185 : vector<16x32xf32>
    %187 = arith.mulf %186, %186 : vector<16x32xf32>
    %cst_53 = arith.constant dense<0.000000e+00> : vector<16xf32>
    %188 = vector.multi_reduction <add>, %187, %cst_53 [1] : vector<16x32xf32> to vector<16xf32>
    %189 = vector.shape_cast %188 : vector<16xf32> to vector<16x1xf32>
    %cst_54 = arith.constant 3.200000e+01 : f32
    %190 = vector.broadcast %cst_54 : f32 to vector<16x1xf32>
    %191 = arith.divf %189, %190 : vector<16x1xf32>
    %192 = vector.broadcast %184 : vector<16x1xf32> to vector<16x32xf32>
    %193 = arith.subf %180, %192 : vector<16x32xf32>
    %cst_55 = arith.constant 9.99999996E-13 : f32
    %194 = vector.broadcast %cst_55 : f32 to vector<16x1xf32>
    %195 = arith.addf %191, %194 : vector<16x1xf32>
    %196 = math.rsqrt %195 : vector<16x1xf32>
    %197 = vector.broadcast %196 : vector<16x1xf32> to vector<16x32xf32>
    %198 = arith.mulf %193, %197 : vector<16x32xf32>
    %199 = vector.shape_cast %36 : vector<32xf32> to vector<1x32xf32>
    %200 = vector.broadcast %199 : vector<1x32xf32> to vector<16x32xf32>
    %201 = arith.mulf %198, %200 : vector<16x32xf32>
    %202 = vector.shape_cast %38 : vector<32xf32> to vector<1x32xf32>
    %203 = vector.broadcast %202 : vector<1x32xf32> to vector<16x32xf32>
    %204 = arith.addf %201, %203 : vector<16x32xf32>
    %205 = arith.truncf %204 : vector<16x32xf32> to vector<16x32xbf16>
    %c0_56 = arith.constant 0 : index
    %c0_57 = arith.constant 0 : index
    %c0_58 = arith.constant 0 : index
    %206 = vector.load %arg7[%c0_56, %c0_57, %c0_58] : memref<4x32x64xbf16, #tpu.memory_space<vmem>>, vector<1x32x64xbf16>
    %207 = vector.shape_cast %206 : vector<1x32x64xbf16> to vector<32x64xbf16>
    %cst_59 = arith.constant dense<0.000000e+00> : vector<16x64xf32>
    %208 = tpu.matmul %205, %207, %cst_59 {dimension_numbers = #tpu.dot_dimension_numbers<[1], [0], [0], [1], [0, 0, 1, 1], [], []>} : vector<16x32xbf16>, vector<32x64xbf16>, vector<16x64xf32> -> vector<16x64xf32>
    %209 = vector.shape_cast %40 : vector<64xf32> to vector<1x64xf32>
    %210 = vector.broadcast %209 : vector<1x64xf32> to vector<16x64xf32>
    %211 = arith.addf %208, %210 : vector<16x64xf32>
    %cst_60 = arith.constant 5.000000e-01 : f32
    %212 = vector.broadcast %cst_60 : f32 to vector<16x64xf32>
    %213 = arith.mulf %212, %211 : vector<16x64xf32>
    %cst_61 = arith.constant 4.471500e-02 : f32
    %214 = vector.broadcast %cst_61 : f32 to vector<16x64xf32>
    %215 = arith.mulf %214, %211 : vector<16x64xf32>
    %216 = arith.mulf %215, %211 : vector<16x64xf32>
    %217 = arith.mulf %216, %211 : vector<16x64xf32>
    %218 = arith.addf %211, %217 : vector<16x64xf32>
    %cst_62 = arith.constant 0.797884583 : f32
    %219 = vector.broadcast %cst_62 : f32 to vector<16x64xf32>
    %220 = arith.mulf %219, %218 : vector<16x64xf32>
    %221 = math.tanh %220 : vector<16x64xf32>
    %cst_63 = arith.constant 1.000000e+00 : f32
    %222 = vector.broadcast %cst_63 : f32 to vector<16x64xf32>
    %223 = arith.addf %222, %221 : vector<16x64xf32>
    %224 = arith.mulf %213, %223 : vector<16x64xf32>
    %225 = arith.truncf %224 : vector<16x64xf32> to vector<16x64xbf16>
    %c0_64 = arith.constant 0 : index
    %c0_65 = arith.constant 0 : index
    %c0_66 = arith.constant 0 : index
    %226 = vector.load %arg8[%c0_64, %c0_65, %c0_66] : memref<4x64x32xbf16, #tpu.memory_space<vmem>>, vector<1x64x32xbf16>
    %227 = vector.shape_cast %226 : vector<1x64x32xbf16> to vector<64x32xbf16>
    %cst_67 = arith.constant dense<0.000000e+00> : vector<16x32xf32>
    %228 = tpu.matmul %225, %227, %cst_67 {dimension_numbers = #tpu.dot_dimension_numbers<[1], [0], [0], [1], [0, 0, 1, 1], [], []>} : vector<16x64xbf16>, vector<64x32xbf16>, vector<16x32xf32> -> vector<16x32xf32>
    %229 = vector.shape_cast %42 : vector<32xf32> to vector<1x32xf32>
    %230 = vector.broadcast %229 : vector<1x32xf32> to vector<16x32xf32>
    %231 = arith.addf %228, %230 : vector<16x32xf32>
    %232 = arith.addf %231, %204 : vector<16x32xf32>
    %cst_68 = arith.constant dense<0.000000e+00> : vector<16xf32>
    %233 = vector.multi_reduction <add>, %232, %cst_68 [1] : vector<16x32xf32> to vector<16xf32>
    %234 = vector.shape_cast %233 : vector<16xf32> to vector<16x1xf32>
    %cst_69 = arith.constant 3.200000e+01 : f32
    %235 = vector.broadcast %cst_69 : f32 to vector<16x1xf32>
    %236 = arith.divf %234, %235 : vector<16x1xf32>
    %237 = vector.broadcast %236 : vector<16x1xf32> to vector<16x32xf32>
    %238 = arith.subf %232, %237 : vector<16x32xf32>
    %239 = arith.mulf %238, %238 : vector<16x32xf32>
    %cst_70 = arith.constant dense<0.000000e+00> : vector<16xf32>
    %240 = vector.multi_reduction <add>, %239, %cst_70 [1] : vector<16x32xf32> to vector<16xf32>
    %241 = vector.shape_cast %240 : vector<16xf32> to vector<16x1xf32>
    %cst_71 = arith.constant 3.200000e+01 : f32
    %242 = vector.broadcast %cst_71 : f32 to vector<16x1xf32>
    %243 = arith.divf %241, %242 : vector<16x1xf32>
    %244 = vector.broadcast %236 : vector<16x1xf32> to vector<16x32xf32>
    %245 = arith.subf %232, %244 : vector<16x32xf32>
    %cst_72 = arith.constant 9.99999996E-13 : f32
    %246 = vector.broadcast %cst_72 : f32 to vector<16x1xf32>
    %247 = arith.addf %243, %246 : vector<16x1xf32>
    %248 = math.rsqrt %247 : vector<16x1xf32>
    %249 = vector.broadcast %248 : vector<16x1xf32> to vector<16x32xf32>
    %250 = arith.mulf %245, %249 : vector<16x32xf32>
    %251 = vector.shape_cast %44 : vector<32xf32> to vector<1x32xf32>
    %252 = vector.broadcast %251 : vector<1x32xf32> to vector<16x32xf32>
    %253 = arith.mulf %250, %252 : vector<16x32xf32>
    %254 = vector.shape_cast %46 : vector<32xf32> to vector<1x32xf32>
    %255 = vector.broadcast %254 : vector<1x32xf32> to vector<16x32xf32>
    %256 = arith.addf %253, %255 : vector<16x32xf32>
    %c0_73 = arith.constant 0 : index
    %c0_74 = arith.constant 0 : index
    %257 = vector.load %arg16[%c0_73, %c0_74] : memref<16x32xf32, #tpu.memory_space<vmem>>, vector<16x32xf32>
    tpu.vector_store %arg16[%c0_73, %c0_74], %256 {strides = array<i32>} : memref<16x32xf32, #tpu.memory_space<vmem>>, vector<16x32xf32>,
    %c0_75 = arith.constant 0 : index
    %c0_76 = arith.constant 0 : index
    %258 = tpu.strided_load %arg16[%c0_75, %c0_76] {strides = array<i32: 8, 1>} : memref<16x32xf32, #tpu.memory_space<vmem>>, vector<2x32xf32>
    %c0_77 = arith.constant 0 : index
    %259 = memref.load %arg10[%c0_77] : memref<4xf32, #tpu.memory_space<smem>>
    %260 = vector.broadcast %259 : f32 to vector<2x32xf32>
    %261 = arith.mulf %260, %258 : vector<2x32xf32>
    %262 = arith.addf %29, %261 : vector<2x32xf32>
    %c0_78 = arith.constant 0 : index
    %c0_79 = arith.constant 0 : index
    %263 = vector.load %arg16[%c0_78, %c0_79] : memref<16x32xf32, #tpu.memory_space<vmem>>, vector<16x32xf32>
    %264 = vector.extract_strided_slice %28 {offsets = [1, 0, 0], sizes = [1, 1, 96], strides = [1, 1, 1]} : vector<4x8x96xf32> to vector<1x1x96xf32>
    %265 = vector.shape_cast %264 : vector<1x1x96xf32> to vector<96xf32>
    %266 = vector.extract_strided_slice %28 {offsets = [1, 1, 0], sizes = [1, 1, 32], strides = [1, 1, 1]} : vector<4x8x96xf32> to vector<1x1x32xf32>
    %267 = vector.shape_cast %266 : vector<1x1x32xf32> to vector<32xf32>
    %268 = vector.extract_strided_slice %28 {offsets = [1, 2, 0], sizes = [1, 1, 32], strides = [1, 1, 1]} : vector<4x8x96xf32> to vector<1x1x32xf32>
    %269 = vector.shape_cast %268 : vector<1x1x32xf32> to vector<32xf32>
    %270 = vector.extract_strided_slice %28 {offsets = [1, 3, 0], sizes = [1, 1, 32], strides = [1, 1, 1]} : vector<4x8x96xf32> to vector<1x1x32xf32>
    %271 = vector.shape_cast %270 : vector<1x1x32xf32> to vector<32xf32>
    %272 = vector.extract_strided_slice %28 {offsets = [1, 4, 0], sizes = [1, 1, 64], strides = [1, 1, 1]} : vector<4x8x96xf32> to vector<1x1x64xf32>
    %273 = vector.shape_cast %272 : vector<1x1x64xf32> to vector<64xf32>
    %274 = vector.extract_strided_slice %28 {offsets = [1, 5, 0], sizes = [1, 1, 32], strides = [1, 1, 1]} : vector<4x8x96xf32> to vector<1x1x32xf32>
    %275 = vector.shape_cast %274 : vector<1x1x32xf32> to vector<32xf32>
    %276 = vector.extract_strided_slice %28 {offsets = [1, 6, 0], sizes = [1, 1, 32], strides = [1, 1, 1]} : vector<4x8x96xf32> to vector<1x1x32xf32>
    %277 = vector.shape_cast %276 : vector<1x1x32xf32> to vector<32xf32>
    %278 = vector.extract_strided_slice %28 {offsets = [1, 7, 0], sizes = [1, 1, 32], strides = [1, 1, 1]} : vector<4x8x96xf32> to vector<1x1x32xf32>
    %279 = vector.shape_cast %278 : vector<1x1x32xf32> to vector<32xf32>
    %280 = arith.truncf %263 : vector<16x32xf32> to vector<16x32xbf16>
    %c1 = arith.constant 1 : index
    %c0_80 = arith.constant 0 : index
    %c0_81 = arith.constant 0 : index
    %281 = vector.load %arg5[%c1, %c0_80, %c0_81] : memref<4x32x96xbf16, #tpu.memory_space<vmem>>, vector<1x32x96xbf16>
    %282 = vector.shape_cast %281 : vector<1x32x96xbf16> to vector<32x96xbf16>
    %cst_82 = arith.constant dense<0.000000e+00> : vector<16x96xf32>
    %283 = tpu.matmul %280, %282, %cst_82 {dimension_numbers = #tpu.dot_dimension_numbers<[1], [0], [0], [1], [0, 0, 1, 1], [], []>} : vector<16x32xbf16>, vector<32x96xbf16>, vector<16x96xf32> -> vector<16x96xf32>
    %284 = vector.shape_cast %265 : vector<96xf32> to vector<1x96xf32>
    %285 = vector.broadcast %284 : vector<1x96xf32> to vector<16x96xf32>
    %286 = arith.addf %283, %285 : vector<16x96xf32>
    %c1_83 = arith.constant 1 : index
    %c0_84 = arith.constant 0 : index
    %c0_85 = arith.constant 0 : index
    %287 = vector.load %arg6[%c1_83, %c0_84, %c0_85] : memref<4x32x32xbf16, #tpu.memory_space<vmem>>, vector<1x32x32xbf16>
    %288 = vector.shape_cast %287 : vector<1x32x32xbf16> to vector<32x32xbf16>
    %cst_86 = arith.constant 0.000000e+00 : f32
    %289 = vector.broadcast %cst_86 : f32 to vector<16x32xf32>
    %290 = vector.extract_strided_slice %286 {offsets = [0, 0], sizes = [16, 8], strides = [1, 1]} : vector<16x96xf32> to vector<16x8xf32>
    %291 = vector.shape_cast %290 : vector<16x8xf32> to vector<2x8x8xf32>
    %292 = arith.truncf %291 : vector<2x8x8xf32> to vector<2x8x8xbf16>
    %293 = vector.extract_strided_slice %286 {offsets = [0, 32], sizes = [16, 8], strides = [1, 1]} : vector<16x96xf32> to vector<16x8xf32>
    %294 = vector.shape_cast %293 : vector<16x8xf32> to vector<2x8x8xf32>
    %295 = arith.truncf %294 : vector<2x8x8xf32> to vector<2x8x8xbf16>
    %296 = vector.extract_strided_slice %286 {offsets = [0, 64], sizes = [16, 8], strides = [1, 1]} : vector<16x96xf32> to vector<16x8xf32>
    %297 = vector.shape_cast %296 : vector<16x8xf32> to vector<2x8x8xf32>
    %298 = arith.truncf %297 : vector<2x8x8xf32> to vector<2x8x8xbf16>
    "tpu.trace_start"() <{level = 10 : i32, message = "bqd,bkd->bqk"}> : () -> ()
    %cst_87 = arith.constant dense<0.000000e+00> : vector<2x8x8xf32>
    %299 = tpu.matmul %292, %295, %cst_87 {dimension_numbers = #tpu.dot_dimension_numbers<[2], [2], [1], [1], [0, 0, 0, 1, 1, 1], [0], [0]>} : vector<2x8x8xbf16>, vector<2x8x8xbf16>, vector<2x8x8xf32> -> vector<2x8x8xf32>
    "tpu.trace_stop"() : () -> ()
    %cst_88 = arith.constant 0.353553385 : f32
    %300 = vector.broadcast %cst_88 : f32 to vector<2x8x8xf32>
    %301 = arith.mulf %299, %300 : vector<2x8x8xf32>
    %302 = vector.broadcast %27 : vector<2x1x8xf32> to vector<2x8x8xf32>
    %303 = arith.addf %301, %302 : vector<2x8x8xf32>
    %cst_89 = arith.constant dense<0xFF800000> : vector<2x8xf32>
    %304 = vector.multi_reduction <maximumf>, %303, %cst_89 [2] : vector<2x8x8xf32> to vector<2x8xf32>
    %305 = vector.shape_cast %304 : vector<2x8xf32> to vector<2x8x1xf32>
    %306 = vector.broadcast %305 : vector<2x8x1xf32> to vector<2x8x8xf32>
    %307 = arith.subf %303, %306 : vector<2x8x8xf32>
    %308 = math.exp %307 : vector<2x8x8xf32>
    %cst_90 = arith.constant dense<0.000000e+00> : vector<2x8xf32>
    %309 = vector.multi_reduction <add>, %308, %cst_90 [2] : vector<2x8x8xf32> to vector<2x8xf32>
    %310 = vector.shape_cast %309 : vector<2x8xf32> to vector<2x8x1xf32>
    %311 = vector.broadcast %310 : vector<2x8x1xf32> to vector<2x8x8xf32>
    %312 = arith.divf %308, %311 : vector<2x8x8xf32>
    %313 = arith.truncf %312 : vector<2x8x8xf32> to vector<2x8x8xbf16>
    "tpu.trace_start"() <{level = 10 : i32, message = "bqk,bkd->bqd"}> : () -> ()
    %cst_91 = arith.constant dense<0.000000e+00> : vector<2x8x8xf32>
    %314 = tpu.matmul %313, %298, %cst_91 {dimension_numbers = #tpu.dot_dimension_numbers<[2], [1], [1], [2], [0, 0, 0, 1, 1, 2], [0], [0]>} : vector<2x8x8xbf16>, vector<2x8x8xbf16>, vector<2x8x8xf32> -> vector<2x8x8xf32>
    "tpu.trace_stop"() : () -> ()
    %315 = vector.shape_cast %314 : vector<2x8x8xf32> to vector<16x8xf32>
    %316 = arith.truncf %315 : vector<16x8xf32> to vector<16x8xbf16>
    %317 = vector.extract_strided_slice %288 {offsets = [0, 0], sizes = [8, 32], strides = [1, 1]} : vector<32x32xbf16> to vector<8x32xbf16>
    %cst_92 = arith.constant dense<0.000000e+00> : vector<16x32xf32>
    %318 = tpu.matmul %316, %317, %cst_92 {dimension_numbers = #tpu.dot_dimension_numbers<[1], [0], [0], [1], [0, 0, 1, 1], [], []>} : vector<16x8xbf16>, vector<8x32xbf16>, vector<16x32xf32> -> vector<16x32xf32>
    %319 = arith.addf %289, %318 : vector<16x32xf32>
    %320 = vector.extract_strided_slice %286 {offsets = [0, 8], sizes = [16, 8], strides = [1, 1]} : vector<16x96xf32> to vector<16x8xf32>
    %321 = vector.shape_cast %320 : vector<16x8xf32> to vector<2x8x8xf32>
    %322 = arith.truncf %321 : vector<2x8x8xf32> to vector<2x8x8xbf16>
    %323 = vector.extract_strided_slice %286 {offsets = [0, 40], sizes = [16, 8], strides = [1, 1]} : vector<16x96xf32> to vector<16x8xf32>
    %324 = vector.shape_cast %323 : vector<16x8xf32> to vector<2x8x8xf32>
    %325 = arith.truncf %324 : vector<2x8x8xf32> to vector<2x8x8xbf16>
    %326 = vector.extract_strided_slice %286 {offsets = [0, 72], sizes = [16, 8], strides = [1, 1]} : vector<16x96xf32> to vector<16x8xf32>
    %327 = vector.shape_cast %326 : vector<16x8xf32> to vector<2x8x8xf32>
    %328 = arith.truncf %327 : vector<2x8x8xf32> to vector<2x8x8xbf16>
    "tpu.trace_start"() <{level = 10 : i32, message = "bqd,bkd->bqk"}> : () -> ()
    %cst_93 = arith.constant dense<0.000000e+00> : vector<2x8x8xf32>
    %329 = tpu.matmul %322, %325, %cst_93 {dimension_numbers = #tpu.dot_dimension_numbers<[2], [2], [1], [1], [0, 0, 0, 1, 1, 1], [0], [0]>} : vector<2x8x8xbf16>, vector<2x8x8xbf16>, vector<2x8x8xf32> -> vector<2x8x8xf32>
    "tpu.trace_stop"() : () -> ()
    %cst_94 = arith.constant 0.353553385 : f32
    %330 = vector.broadcast %cst_94 : f32 to vector<2x8x8xf32>
    %331 = arith.mulf %329, %330 : vector<2x8x8xf32>
    %332 = vector.broadcast %27 : vector<2x1x8xf32> to vector<2x8x8xf32>
    %333 = arith.addf %331, %332 : vector<2x8x8xf32>
    %cst_95 = arith.constant dense<0xFF800000> : vector<2x8xf32>
    %334 = vector.multi_reduction <maximumf>, %333, %cst_95 [2] : vector<2x8x8xf32> to vector<2x8xf32>
    %335 = vector.shape_cast %334 : vector<2x8xf32> to vector<2x8x1xf32>
    %336 = vector.broadcast %335 : vector<2x8x1xf32> to vector<2x8x8xf32>
    %337 = arith.subf %333, %336 : vector<2x8x8xf32>
    %338 = math.exp %337 : vector<2x8x8xf32>
    %cst_96 = arith.constant dense<0.000000e+00> : vector<2x8xf32>
    %339 = vector.multi_reduction <add>, %338, %cst_96 [2] : vector<2x8x8xf32> to vector<2x8xf32>
    %340 = vector.shape_cast %339 : vector<2x8xf32> to vector<2x8x1xf32>
    %341 = vector.broadcast %340 : vector<2x8x1xf32> to vector<2x8x8xf32>
    %342 = arith.divf %338, %341 : vector<2x8x8xf32>
    %343 = arith.truncf %342 : vector<2x8x8xf32> to vector<2x8x8xbf16>
    "tpu.trace_start"() <{level = 10 : i32, message = "bqk,bkd->bqd"}> : () -> ()
    %cst_97 = arith.constant dense<0.000000e+00> : vector<2x8x8xf32>
    %344 = tpu.matmul %343, %328, %cst_97 {dimension_numbers = #tpu.dot_dimension_numbers<[2], [1], [1], [2], [0, 0, 0, 1, 1, 2], [0], [0]>} : vector<2x8x8xbf16>, vector<2x8x8xbf16>, vector<2x8x8xf32> -> vector<2x8x8xf32>
    "tpu.trace_stop"() : () -> ()
    %345 = vector.shape_cast %344 : vector<2x8x8xf32> to vector<16x8xf32>
    %346 = arith.truncf %345 : vector<16x8xf32> to vector<16x8xbf16>
    %347 = vector.extract_strided_slice %288 {offsets = [8, 0], sizes = [8, 32], strides = [1, 1]} : vector<32x32xbf16> to vector<8x32xbf16>
    %cst_98 = arith.constant dense<0.000000e+00> : vector<16x32xf32>
    %348 = tpu.matmul %346, %347, %cst_98 {dimension_numbers = #tpu.dot_dimension_numbers<[1], [0], [0], [1], [0, 0, 1, 1], [], []>} : vector<16x8xbf16>, vector<8x32xbf16>, vector<16x32xf32> -> vector<16x32xf32>
    %349 = arith.addf %319, %348 : vector<16x32xf32>
    %350 = vector.extract_strided_slice %286 {offsets = [0, 16], sizes = [16, 8], strides = [1, 1]} : vector<16x96xf32> to vector<16x8xf32>
    %351 = vector.shape_cast %350 : vector<16x8xf32> to vector<2x8x8xf32>
    %352 = arith.truncf %351 : vector<2x8x8xf32> to vector<2x8x8xbf16>
    %353 = vector.extract_strided_slice %286 {offsets = [0, 48], sizes = [16, 8], strides = [1, 1]} : vector<16x96xf32> to vector<16x8xf32>
    %354 = vector.shape_cast %353 : vector<16x8xf32> to vector<2x8x8xf32>
    %355 = arith.truncf %354 : vector<2x8x8xf32> to vector<2x8x8xbf16>
    %356 = vector.extract_strided_slice %286 {offsets = [0, 80], sizes = [16, 8], strides = [1, 1]} : vector<16x96xf32> to vector<16x8xf32>
    %357 = vector.shape_cast %356 : vector<16x8xf32> to vector<2x8x8xf32>
    %358 = arith.truncf %357 : vector<2x8x8xf32> to vector<2x8x8xbf16>
    "tpu.trace_start"() <{level = 10 : i32, message = "bqd,bkd->bqk"}> : () -> ()
    %cst_99 = arith.constant dense<0.000000e+00> : vector<2x8x8xf32>
    %359 = tpu.matmul %352, %355, %cst_99 {dimension_numbers = #tpu.dot_dimension_numbers<[2], [2], [1], [1], [0, 0, 0, 1, 1, 1], [0], [0]>} : vector<2x8x8xbf16>, vector<2x8x8xbf16>, vector<2x8x8xf32> -> vector<2x8x8xf32>
    "tpu.trace_stop"() : () -> ()
    %cst_100 = arith.constant 0.353553385 : f32
    %360 = vector.broadcast %cst_100 : f32 to vector<2x8x8xf32>
    %361 = arith.mulf %359, %360 : vector<2x8x8xf32>
    %362 = vector.broadcast %27 : vector<2x1x8xf32> to vector<2x8x8xf32>
    %363 = arith.addf %361, %362 : vector<2x8x8xf32>
    %cst_101 = arith.constant dense<0xFF800000> : vector<2x8xf32>
    %364 = vector.multi_reduction <maximumf>, %363, %cst_101 [2] : vector<2x8x8xf32> to vector<2x8xf32>
    %365 = vector.shape_cast %364 : vector<2x8xf32> to vector<2x8x1xf32>
    %366 = vector.broadcast %365 : vector<2x8x1xf32> to vector<2x8x8xf32>
    %367 = arith.subf %363, %366 : vector<2x8x8xf32>
    %368 = math.exp %367 : vector<2x8x8xf32>
    %cst_102 = arith.constant dense<0.000000e+00> : vector<2x8xf32>
    %369 = vector.multi_reduction <add>, %368, %cst_102 [2] : vector<2x8x8xf32> to vector<2x8xf32>
    %370 = vector.shape_cast %369 : vector<2x8xf32> to vector<2x8x1xf32>
    %371 = vector.broadcast %370 : vector<2x8x1xf32> to vector<2x8x8xf32>
    %372 = arith.divf %368, %371 : vector<2x8x8xf32>
    %373 = arith.truncf %372 : vector<2x8x8xf32> to vector<2x8x8xbf16>
    "tpu.trace_start"() <{level = 10 : i32, message = "bqk,bkd->bqd"}> : () -> ()
    %cst_103 = arith.constant dense<0.000000e+00> : vector<2x8x8xf32>
    %374 = tpu.matmul %373, %358, %cst_103 {dimension_numbers = #tpu.dot_dimension_numbers<[2], [1], [1], [2], [0, 0, 0, 1, 1, 2], [0], [0]>} : vector<2x8x8xbf16>, vector<2x8x8xbf16>, vector<2x8x8xf32> -> vector<2x8x8xf32>
    "tpu.trace_stop"() : () -> ()
    %375 = vector.shape_cast %374 : vector<2x8x8xf32> to vector<16x8xf32>
    %376 = arith.truncf %375 : vector<16x8xf32> to vector<16x8xbf16>
    %377 = vector.extract_strided_slice %288 {offsets = [16, 0], sizes = [8, 32], strides = [1, 1]} : vector<32x32xbf16> to vector<8x32xbf16>
    %cst_104 = arith.constant dense<0.000000e+00> : vector<16x32xf32>
    %378 = tpu.matmul %376, %377, %cst_104 {dimension_numbers = #tpu.dot_dimension_numbers<[1], [0], [0], [1], [0, 0, 1, 1], [], []>} : vector<16x8xbf16>, vector<8x32xbf16>, vector<16x32xf32> -> vector<16x32xf32>
    %379 = arith.addf %349, %378 : vector<16x32xf32>
    %380 = vector.extract_strided_slice %286 {offsets = [0, 24], sizes = [16, 8], strides = [1, 1]} : vector<16x96xf32> to vector<16x8xf32>
    %381 = vector.shape_cast %380 : vector<16x8xf32> to vector<2x8x8xf32>
    %382 = arith.truncf %381 : vector<2x8x8xf32> to vector<2x8x8xbf16>
    %383 = vector.extract_strided_slice %286 {offsets = [0, 56], sizes = [16, 8], strides = [1, 1]} : vector<16x96xf32> to vector<16x8xf32>
    %384 = vector.shape_cast %383 : vector<16x8xf32> to vector<2x8x8xf32>
    %385 = arith.truncf %384 : vector<2x8x8xf32> to vector<2x8x8xbf16>
    %386 = vector.extract_strided_slice %286 {offsets = [0, 88], sizes = [16, 8], strides = [1, 1]} : vector<16x96xf32> to vector<16x8xf32>
    %387 = vector.shape_cast %386 : vector<16x8xf32> to vector<2x8x8xf32>
    %388 = arith.truncf %387 : vector<2x8x8xf32> to vector<2x8x8xbf16>
    "tpu.trace_start"() <{level = 10 : i32, message = "bqd,bkd->bqk"}> : () -> ()
    %cst_105 = arith.constant dense<0.000000e+00> : vector<2x8x8xf32>
    %389 = tpu.matmul %382, %385, %cst_105 {dimension_numbers = #tpu.dot_dimension_numbers<[2], [2], [1], [1], [0, 0, 0, 1, 1, 1], [0], [0]>} : vector<2x8x8xbf16>, vector<2x8x8xbf16>, vector<2x8x8xf32> -> vector<2x8x8xf32>
    "tpu.trace_stop"() : () -> ()
    %cst_106 = arith.constant 0.353553385 : f32
    %390 = vector.broadcast %cst_106 : f32 to vector<2x8x8xf32>
    %391 = arith.mulf %389, %390 : vector<2x8x8xf32>
    %392 = vector.broadcast %27 : vector<2x1x8xf32> to vector<2x8x8xf32>
    %393 = arith.addf %391, %392 : vector<2x8x8xf32>
    %cst_107 = arith.constant dense<0xFF800000> : vector<2x8xf32>
    %394 = vector.multi_reduction <maximumf>, %393, %cst_107 [2] : vector<2x8x8xf32> to vector<2x8xf32>
    %395 = vector.shape_cast %394 : vector<2x8xf32> to vector<2x8x1xf32>
    %396 = vector.broadcast %395 : vector<2x8x1xf32> to vector<2x8x8xf32>
    %397 = arith.subf %393, %396 : vector<2x8x8xf32>
    %398 = math.exp %397 : vector<2x8x8xf32>
    %cst_108 = arith.constant dense<0.000000e+00> : vector<2x8xf32>
    %399 = vector.multi_reduction <add>, %398, %cst_108 [2] : vector<2x8x8xf32> to vector<2x8xf32>
    %400 = vector.shape_cast %399 : vector<2x8xf32> to vector<2x8x1xf32>
    %401 = vector.broadcast %400 : vector<2x8x1xf32> to vector<2x8x8xf32>
    %402 = arith.divf %398, %401 : vector<2x8x8xf32>
    %403 = arith.truncf %402 : vector<2x8x8xf32> to vector<2x8x8xbf16>
    "tpu.trace_start"() <{level = 10 : i32, message = "bqk,bkd->bqd"}> : () -> ()
    %cst_109 = arith.constant dense<0.000000e+00> : vector<2x8x8xf32>
    %404 = tpu.matmul %403, %388, %cst_109 {dimension_numbers = #tpu.dot_dimension_numbers<[2], [1], [1], [2], [0, 0, 0, 1, 1, 2], [0], [0]>} : vector<2x8x8xbf16>, vector<2x8x8xbf16>, vector<2x8x8xf32> -> vector<2x8x8xf32>
    "tpu.trace_stop"() : () -> ()
    %405 = vector.shape_cast %404 : vector<2x8x8xf32> to vector<16x8xf32>
    %406 = arith.truncf %405 : vector<16x8xf32> to vector<16x8xbf16>
    %407 = vector.extract_strided_slice %288 {offsets = [24, 0], sizes = [8, 32], strides = [1, 1]} : vector<32x32xbf16> to vector<8x32xbf16>
    %cst_110 = arith.constant dense<0.000000e+00> : vector<16x32xf32>
    %408 = tpu.matmul %406, %407, %cst_110 {dimension_numbers = #tpu.dot_dimension_numbers<[1], [0], [0], [1], [0, 0, 1, 1], [], []>} : vector<16x8xbf16>, vector<8x32xbf16>, vector<16x32xf32> -> vector<16x32xf32>
    %409 = arith.addf %379, %408 : vector<16x32xf32>
    %410 = vector.shape_cast %267 : vector<32xf32> to vector<1x32xf32>
    %411 = vector.broadcast %410 : vector<1x32xf32> to vector<16x32xf32>
    %412 = arith.addf %409, %411 : vector<16x32xf32>
    %413 = arith.addf %412, %263 : vector<16x32xf32>
    %cst_111 = arith.constant dense<0.000000e+00> : vector<16xf32>
    %414 = vector.multi_reduction <add>, %413, %cst_111 [1] : vector<16x32xf32> to vector<16xf32>
    %415 = vector.shape_cast %414 : vector<16xf32> to vector<16x1xf32>
    %cst_112 = arith.constant 3.200000e+01 : f32
    %416 = vector.broadcast %cst_112 : f32 to vector<16x1xf32>
    %417 = arith.divf %415, %416 : vector<16x1xf32>
    %418 = vector.broadcast %417 : vector<16x1xf32> to vector<16x32xf32>
    %419 = arith.subf %413, %418 : vector<16x32xf32>
    %420 = arith.mulf %419, %419 : vector<16x32xf32>
    %cst_113 = arith.constant dense<0.000000e+00> : vector<16xf32>
    %421 = vector.multi_reduction <add>, %420, %cst_113 [1] : vector<16x32xf32> to vector<16xf32>
    %422 = vector.shape_cast %421 : vector<16xf32> to vector<16x1xf32>
    %cst_114 = arith.constant 3.200000e+01 : f32
    %423 = vector.broadcast %cst_114 : f32 to vector<16x1xf32>
    %424 = arith.divf %422, %423 : vector<16x1xf32>
    %425 = vector.broadcast %417 : vector<16x1xf32> to vector<16x32xf32>
    %426 = arith.subf %413, %425 : vector<16x32xf32>
    %cst_115 = arith.constant 9.99999996E-13 : f32
    %427 = vector.broadcast %cst_115 : f32 to vector<16x1xf32>
    %428 = arith.addf %424, %427 : vector<16x1xf32>
    %429 = math.rsqrt %428 : vector<16x1xf32>
    %430 = vector.broadcast %429 : vector<16x1xf32> to vector<16x32xf32>
    %431 = arith.mulf %426, %430 : vector<16x32xf32>
    %432 = vector.shape_cast %269 : vector<32xf32> to vector<1x32xf32>
    %433 = vector.broadcast %432 : vector<1x32xf32> to vector<16x32xf32>
    %434 = arith.mulf %431, %433 : vector<16x32xf32>
    %435 = vector.shape_cast %271 : vector<32xf32> to vector<1x32xf32>
    %436 = vector.broadcast %435 : vector<1x32xf32> to vector<16x32xf32>
    %437 = arith.addf %434, %436 : vector<16x32xf32>
    %438 = arith.truncf %437 : vector<16x32xf32> to vector<16x32xbf16>
    %c1_116 = arith.constant 1 : index
    %c0_117 = arith.constant 0 : index
    %c0_118 = arith.constant 0 : index
    %439 = vector.load %arg7[%c1_116, %c0_117, %c0_118] : memref<4x32x64xbf16, #tpu.memory_space<vmem>>, vector<1x32x64xbf16>
    %440 = vector.shape_cast %439 : vector<1x32x64xbf16> to vector<32x64xbf16>
    %cst_119 = arith.constant dense<0.000000e+00> : vector<16x64xf32>
    %441 = tpu.matmul %438, %440, %cst_119 {dimension_numbers = #tpu.dot_dimension_numbers<[1], [0], [0], [1], [0, 0, 1, 1], [], []>} : vector<16x32xbf16>, vector<32x64xbf16>, vector<16x64xf32> -> vector<16x64xf32>
    %442 = vector.shape_cast %273 : vector<64xf32> to vector<1x64xf32>
    %443 = vector.broadcast %442 : vector<1x64xf32> to vector<16x64xf32>
    %444 = arith.addf %441, %443 : vector<16x64xf32>
    %cst_120 = arith.constant 5.000000e-01 : f32
    %445 = vector.broadcast %cst_120 : f32 to vector<16x64xf32>
    %446 = arith.mulf %445, %444 : vector<16x64xf32>
    %cst_121 = arith.constant 4.471500e-02 : f32
    %447 = vector.broadcast %cst_121 : f32 to vector<16x64xf32>
    %448 = arith.mulf %447, %444 : vector<16x64xf32>
    %449 = arith.mulf %448, %444 : vector<16x64xf32>
    %450 = arith.mulf %449, %444 : vector<16x64xf32>
    %451 = arith.addf %444, %450 : vector<16x64xf32>
    %cst_122 = arith.constant 0.797884583 : f32
    %452 = vector.broadcast %cst_122 : f32 to vector<16x64xf32>
    %453 = arith.mulf %452, %451 : vector<16x64xf32>
    %454 = math.tanh %453 : vector<16x64xf32>
    %cst_123 = arith.constant 1.000000e+00 : f32
    %455 = vector.broadcast %cst_123 : f32 to vector<16x64xf32>
    %456 = arith.addf %455, %454 : vector<16x64xf32>
    %457 = arith.mulf %446, %456 : vector<16x64xf32>
    %458 = arith.truncf %457 : vector<16x64xf32> to vector<16x64xbf16>
    %c1_124 = arith.constant 1 : index
    %c0_125 = arith.constant 0 : index
    %c0_126 = arith.constant 0 : index
    %459 = vector.load %arg8[%c1_124, %c0_125, %c0_126] : memref<4x64x32xbf16, #tpu.memory_space<vmem>>, vector<1x64x32xbf16>
    %460 = vector.shape_cast %459 : vector<1x64x32xbf16> to vector<64x32xbf16>
    %cst_127 = arith.constant dense<0.000000e+00> : vector<16x32xf32>
    %461 = tpu.matmul %458, %460, %cst_127 {dimension_numbers = #tpu.dot_dimension_numbers<[1], [0], [0], [1], [0, 0, 1, 1], [], []>} : vector<16x64xbf16>, vector<64x32xbf16>, vector<16x32xf32> -> vector<16x32xf32>
    %462 = vector.shape_cast %275 : vector<32xf32> to vector<1x32xf32>
    %463 = vector.broadcast %462 : vector<1x32xf32> to vector<16x32xf32>
    %464 = arith.addf %461, %463 : vector<16x32xf32>
    %465 = arith.addf %464, %437 : vector<16x32xf32>
    %cst_128 = arith.constant dense<0.000000e+00> : vector<16xf32>
    %466 = vector.multi_reduction <add>, %465, %cst_128 [1] : vector<16x32xf32> to vector<16xf32>
    %467 = vector.shape_cast %466 : vector<16xf32> to vector<16x1xf32>
    %cst_129 = arith.constant 3.200000e+01 : f32
    %468 = vector.broadcast %cst_129 : f32 to vector<16x1xf32>
    %469 = arith.divf %467, %468 : vector<16x1xf32>
    %470 = vector.broadcast %469 : vector<16x1xf32> to vector<16x32xf32>
    %471 = arith.subf %465, %470 : vector<16x32xf32>
    %472 = arith.mulf %471, %471 : vector<16x32xf32>
    %cst_130 = arith.constant dense<0.000000e+00> : vector<16xf32>
    %473 = vector.multi_reduction <add>, %472, %cst_130 [1] : vector<16x32xf32> to vector<16xf32>
    %474 = vector.shape_cast %473 : vector<16xf32> to vector<16x1xf32>
    %cst_131 = arith.constant 3.200000e+01 : f32
    %475 = vector.broadcast %cst_131 : f32 to vector<16x1xf32>
    %476 = arith.divf %474, %475 : vector<16x1xf32>
    %477 = vector.broadcast %469 : vector<16x1xf32> to vector<16x32xf32>
    %478 = arith.subf %465, %477 : vector<16x32xf32>
    %cst_132 = arith.constant 9.99999996E-13 : f32
    %479 = vector.broadcast %cst_132 : f32 to vector<16x1xf32>
    %480 = arith.addf %476, %479 : vector<16x1xf32>
    %481 = math.rsqrt %480 : vector<16x1xf32>
    %482 = vector.broadcast %481 : vector<16x1xf32> to vector<16x32xf32>
    %483 = arith.mulf %478, %482 : vector<16x32xf32>
    %484 = vector.shape_cast %277 : vector<32xf32> to vector<1x32xf32>
    %485 = vector.broadcast %484 : vector<1x32xf32> to vector<16x32xf32>
    %486 = arith.mulf %483, %485 : vector<16x32xf32>
    %487 = vector.shape_cast %279 : vector<32xf32> to vector<1x32xf32>
    %488 = vector.broadcast %487 : vector<1x32xf32> to vector<16x32xf32>
    %489 = arith.addf %486, %488 : vector<16x32xf32>
    %c0_133 = arith.constant 0 : index
    %c0_134 = arith.constant 0 : index
    %490 = vector.load %arg16[%c0_133, %c0_134] : memref<16x32xf32, #tpu.memory_space<vmem>>, vector<16x32xf32>
    tpu.vector_store %arg16[%c0_133, %c0_134], %489 {strides = array<i32>} : memref<16x32xf32, #tpu.memory_space<vmem>>, vector<16x32xf32>,
    %c0_135 = arith.constant 0 : index
    %c0_136 = arith.constant 0 : index
    %491 = tpu.strided_load %arg16[%c0_135, %c0_136] {strides = array<i32: 8, 1>} : memref<16x32xf32, #tpu.memory_space<vmem>>, vector<2x32xf32>
    %c1_137 = arith.constant 1 : index
    %492 = memref.load %arg10[%c1_137] : memref<4xf32, #tpu.memory_space<smem>>
    %493 = vector.broadcast %492 : f32 to vector<2x32xf32>
    %494 = arith.mulf %493, %491 : vector<2x32xf32>
    %495 = arith.addf %262, %494 : vector<2x32xf32>
    %c0_138 = arith.constant 0 : index
    %c0_139 = arith.constant 0 : index
    %496 = vector.load %arg16[%c0_138, %c0_139] : memref<16x32xf32, #tpu.memory_space<vmem>>, vector<16x32xf32>
    %497 = vector.extract_strided_slice %28 {offsets = [2, 0, 0], sizes = [1, 1, 96], strides = [1, 1, 1]} : vector<4x8x96xf32> to vector<1x1x96xf32>
    %498 = vector.shape_cast %497 : vector<1x1x96xf32> to vector<96xf32>
    %499 = vector.extract_strided_slice %28 {offsets = [2, 1, 0], sizes = [1, 1, 32], strides = [1, 1, 1]} : vector<4x8x96xf32> to vector<1x1x32xf32>
    %500 = vector.shape_cast %499 : vector<1x1x32xf32> to vector<32xf32>
    %501 = vector.extract_strided_slice %28 {offsets = [2, 2, 0], sizes = [1, 1, 32], strides = [1, 1, 1]} : vector<4x8x96xf32> to vector<1x1x32xf32>
    %502 = vector.shape_cast %501 : vector<1x1x32xf32> to vector<32xf32>
    %503 = vector.extract_strided_slice %28 {offsets = [2, 3, 0], sizes = [1, 1, 32], strides = [1, 1, 1]} : vector<4x8x96xf32> to vector<1x1x32xf32>
    %504 = vector.shape_cast %503 : vector<1x1x32xf32> to vector<32xf32>
    %505 = vector.extract_strided_slice %28 {offsets = [2, 4, 0], sizes = [1, 1, 64], strides = [1, 1, 1]} : vector<4x8x96xf32> to vector<1x1x64xf32>
    %506 = vector.shape_cast %505 : vector<1x1x64xf32> to vector<64xf32>
    %507 = vector.extract_strided_slice %28 {offsets = [2, 5, 0], sizes = [1, 1, 32], strides = [1, 1, 1]} : vector<4x8x96xf32> to vector<1x1x32xf32>
    %508 = vector.shape_cast %507 : vector<1x1x32xf32> to vector<32xf32>
    %509 = vector.extract_strided_slice %28 {offsets = [2, 6, 0], sizes = [1, 1, 32], strides = [1, 1, 1]} : vector<4x8x96xf32> to vector<1x1x32xf32>
    %510 = vector.shape_cast %509 : vector<1x1x32xf32> to vector<32xf32>
    %511 = vector.extract_strided_slice %28 {offsets = [2, 7, 0], sizes = [1, 1, 32], strides = [1, 1, 1]} : vector<4x8x96xf32> to vector<1x1x32xf32>
    %512 = vector.shape_cast %511 : vector<1x1x32xf32> to vector<32xf32>
    %513 = arith.truncf %496 : vector<16x32xf32> to vector<16x32xbf16>
    %c2 = arith.constant 2 : index
    %c0_140 = arith.constant 0 : index
    %c0_141 = arith.constant 0 : index
    %514 = vector.load %arg5[%c2, %c0_140, %c0_141] : memref<4x32x96xbf16, #tpu.memory_space<vmem>>, vector<1x32x96xbf16>
    %515 = vector.shape_cast %514 : vector<1x32x96xbf16> to vector<32x96xbf16>
    %cst_142 = arith.constant dense<0.000000e+00> : vector<16x96xf32>
    %516 = tpu.matmul %513, %515, %cst_142 {dimension_numbers = #tpu.dot_dimension_numbers<[1], [0], [0], [1], [0, 0, 1, 1], [], []>} : vector<16x32xbf16>, vector<32x96xbf16>, vector<16x96xf32> -> vector<16x96xf32>
    %517 = vector.shape_cast %498 : vector<96xf32> to vector<1x96xf32>
    %518 = vector.broadcast %517 : vector<1x96xf32> to vector<16x96xf32>
    %519 = arith.addf %516, %518 : vector<16x96xf32>
    %c2_143 = arith.constant 2 : index
    %c0_144 = arith.constant 0 : index
    %c0_145 = arith.constant 0 : index
    %520 = vector.load %arg6[%c2_143, %c0_144, %c0_145] : memref<4x32x32xbf16, #tpu.memory_space<vmem>>, vector<1x32x32xbf16>
    %521 = vector.shape_cast %520 : vector<1x32x32xbf16> to vector<32x32xbf16>
    %cst_146 = arith.constant 0.000000e+00 : f32
    %522 = vector.broadcast %cst_146 : f32 to vector<16x32xf32>
    %523 = vector.extract_strided_slice %519 {offsets = [0, 0], sizes = [16, 8], strides = [1, 1]} : vector<16x96xf32> to vector<16x8xf32>
    %524 = vector.shape_cast %523 : vector<16x8xf32> to vector<2x8x8xf32>
    %525 = arith.truncf %524 : vector<2x8x8xf32> to vector<2x8x8xbf16>
    %526 = vector.extract_strided_slice %519 {offsets = [0, 32], sizes = [16, 8], strides = [1, 1]} : vector<16x96xf32> to vector<16x8xf32>
    %527 = vector.shape_cast %526 : vector<16x8xf32> to vector<2x8x8xf32>
    %528 = arith.truncf %527 : vector<2x8x8xf32> to vector<2x8x8xbf16>
    %529 = vector.extract_strided_slice %519 {offsets = [0, 64], sizes = [16, 8], strides = [1, 1]} : vector<16x96xf32> to vector<16x8xf32>
    %530 = vector.shape_cast %529 : vector<16x8xf32> to vector<2x8x8xf32>
    %531 = arith.truncf %530 : vector<2x8x8xf32> to vector<2x8x8xbf16>
    "tpu.trace_start"() <{level = 10 : i32, message = "bqd,bkd->bqk"}> : () -> ()
    %cst_147 = arith.constant dense<0.000000e+00> : vector<2x8x8xf32>
    %532 = tpu.matmul %525, %528, %cst_147 {dimension_numbers = #tpu.dot_dimension_numbers<[2], [2], [1], [1], [0, 0, 0, 1, 1, 1], [0], [0]>} : vector<2x8x8xbf16>, vector<2x8x8xbf16>, vector<2x8x8xf32> -> vector<2x8x8xf32>
    "tpu.trace_stop"() : () -> ()
    %cst_148 = arith.constant 0.353553385 : f32
    %533 = vector.broadcast %cst_148 : f32 to vector<2x8x8xf32>
    %534 = arith.mulf %532, %533 : vector<2x8x8xf32>
    %535 = vector.broadcast %27 : vector<2x1x8xf32> to vector<2x8x8xf32>
    %536 = arith.addf %534, %535 : vector<2x8x8xf32>
    %cst_149 = arith.constant dense<0xFF800000> : vector<2x8xf32>
    %537 = vector.multi_reduction <maximumf>, %536, %cst_149 [2] : vector<2x8x8xf32> to vector<2x8xf32>
    %538 = vector.shape_cast %537 : vector<2x8xf32> to vector<2x8x1xf32>
    %539 = vector.broadcast %538 : vector<2x8x1xf32> to vector<2x8x8xf32>
    %540 = arith.subf %536, %539 : vector<2x8x8xf32>
    %541 = math.exp %540 : vector<2x8x8xf32>
    %cst_150 = arith.constant dense<0.000000e+00> : vector<2x8xf32>
    %542 = vector.multi_reduction <add>, %541, %cst_150 [2] : vector<2x8x8xf32> to vector<2x8xf32>
    %543 = vector.shape_cast %542 : vector<2x8xf32> to vector<2x8x1xf32>
    %544 = vector.broadcast %543 : vector<2x8x1xf32> to vector<2x8x8xf32>
    %545 = arith.divf %541, %544 : vector<2x8x8xf32>
    %546 = arith.truncf %545 : vector<2x8x8xf32> to vector<2x8x8xbf16>
    "tpu.trace_start"() <{level = 10 : i32, message = "bqk,bkd->bqd"}> : () -> ()
    %cst_151 = arith.constant dense<0.000000e+00> : vector<2x8x8xf32>
    %547 = tpu.matmul %546, %531, %cst_151 {dimension_numbers = #tpu.dot_dimension_numbers<[2], [1], [1], [2], [0, 0, 0, 1, 1, 2], [0], [0]>} : vector<2x8x8xbf16>, vector<2x8x8xbf16>, vector<2x8x8xf32> -> vector<2x8x8xf32>
    "tpu.trace_stop"() : () -> ()
    %548 = vector.shape_cast %547 : vector<2x8x8xf32> to vector<16x8xf32>
    %549 = arith.truncf %548 : vector<16x8xf32> to vector<16x8xbf16>
    %550 = vector.extract_strided_slice %521 {offsets = [0, 0], sizes = [8, 32], strides = [1, 1]} : vector<32x32xbf16> to vector<8x32xbf16>
    %cst_152 = arith.constant dense<0.000000e+00> : vector<16x32xf32>
    %551 = tpu.matmul %549, %550, %cst_152 {dimension_numbers = #tpu.dot_dimension_numbers<[1], [0], [0], [1], [0, 0, 1, 1], [], []>} : vector<16x8xbf16>, vector<8x32xbf16>, vector<16x32xf32> -> vector<16x32xf32>
    %552 = arith.addf %522, %551 : vector<16x32xf32>
    %553 = vector.extract_strided_slice %519 {offsets = [0, 8], sizes = [16, 8], strides = [1, 1]} : vector<16x96xf32> to vector<16x8xf32>
    %554 = vector.shape_cast %553 : vector<16x8xf32> to vector<2x8x8xf32>
    %555 = arith.truncf %554 : vector<2x8x8xf32> to vector<2x8x8xbf16>
    %556 = vector.extract_strided_slice %519 {offsets = [0, 40], sizes = [16, 8], strides = [1, 1]} : vector<16x96xf32> to vector<16x8xf32>
    %557 = vector.shape_cast %556 : vector<16x8xf32> to vector<2x8x8xf32>
    %558 = arith.truncf %557 : vector<2x8x8xf32> to vector<2x8x8xbf16>
    %559 = vector.extract_strided_slice %519 {offsets = [0, 72], sizes = [16, 8], strides = [1, 1]} : vector<16x96xf32> to vector<16x8xf32>
    %560 = vector.shape_cast %559 : vector<16x8xf32> to vector<2x8x8xf32>
    %561 = arith.truncf %560 : vector<2x8x8xf32> to vector<2x8x8xbf16>
    "tpu.trace_start"() <{level = 10 : i32, message = "bqd,bkd->bqk"}> : () -> ()
    %cst_153 = arith.constant dense<0.000000e+00> : vector<2x8x8xf32>
    %562 = tpu.matmul %555, %558, %cst_153 {dimension_numbers = #tpu.dot_dimension_numbers<[2], [2], [1], [1], [0, 0, 0, 1, 1, 1], [0], [0]>} : vector<2x8x8xbf16>, vector<2x8x8xbf16>, vector<2x8x8xf32> -> vector<2x8x8xf32>
    "tpu.trace_stop"() : () -> ()
    %cst_154 = arith.constant 0.353553385 : f32
    %563 = vector.broadcast %cst_154 : f32 to vector<2x8x8xf32>
    %564 = arith.mulf %562, %563 : vector<2x8x8xf32>
    %565 = vector.broadcast %27 : vector<2x1x8xf32> to vector<2x8x8xf32>
    %566 = arith.addf %564, %565 : vector<2x8x8xf32>
    %cst_155 = arith.constant dense<0xFF800000> : vector<2x8xf32>
    %567 = vector.multi_reduction <maximumf>, %566, %cst_155 [2] : vector<2x8x8xf32> to vector<2x8xf32>
    %568 = vector.shape_cast %567 : vector<2x8xf32> to vector<2x8x1xf32>
    %569 = vector.broadcast %568 : vector<2x8x1xf32> to vector<2x8x8xf32>
    %570 = arith.subf %566, %569 : vector<2x8x8xf32>
    %571 = math.exp %570 : vector<2x8x8xf32>
    %cst_156 = arith.constant dense<0.000000e+00> : vector<2x8xf32>
    %572 = vector.multi_reduction <add>, %571, %cst_156 [2] : vector<2x8x8xf32> to vector<2x8xf32>
    %573 = vector.shape_cast %572 : vector<2x8xf32> to vector<2x8x1xf32>
    %574 = vector.broadcast %573 : vector<2x8x1xf32> to vector<2x8x8xf32>
    %575 = arith.divf %571, %574 : vector<2x8x8xf32>
    %576 = arith.truncf %575 : vector<2x8x8xf32> to vector<2x8x8xbf16>
    "tpu.trace_start"() <{level = 10 : i32, message = "bqk,bkd->bqd"}> : () -> ()
    %cst_157 = arith.constant dense<0.000000e+00> : vector<2x8x8xf32>
    %577 = tpu.matmul %576, %561, %cst_157 {dimension_numbers = #tpu.dot_dimension_numbers<[2], [1], [1], [2], [0, 0, 0, 1, 1, 2], [0], [0]>} : vector<2x8x8xbf16>, vector<2x8x8xbf16>, vector<2x8x8xf32> -> vector<2x8x8xf32>
    "tpu.trace_stop"() : () -> ()
    %578 = vector.shape_cast %577 : vector<2x8x8xf32> to vector<16x8xf32>
    %579 = arith.truncf %578 : vector<16x8xf32> to vector<16x8xbf16>
    %580 = vector.extract_strided_slice %521 {offsets = [8, 0], sizes = [8, 32], strides = [1, 1]} : vector<32x32xbf16> to vector<8x32xbf16>
    %cst_158 = arith.constant dense<0.000000e+00> : vector<16x32xf32>
    %581 = tpu.matmul %579, %580, %cst_158 {dimension_numbers = #tpu.dot_dimension_numbers<[1], [0], [0], [1], [0, 0, 1, 1], [], []>} : vector<16x8xbf16>, vector<8x32xbf16>, vector<16x32xf32> -> vector<16x32xf32>
    %582 = arith.addf %552, %581 : vector<16x32xf32>
    %583 = vector.extract_strided_slice %519 {offsets = [0, 16], sizes = [16, 8], strides = [1, 1]} : vector<16x96xf32> to vector<16x8xf32>
    %584 = vector.shape_cast %583 : vector<16x8xf32> to vector<2x8x8xf32>
    %585 = arith.truncf %584 : vector<2x8x8xf32> to vector<2x8x8xbf16>
    %586 = vector.extract_strided_slice %519 {offsets = [0, 48], sizes = [16, 8], strides = [1, 1]} : vector<16x96xf32> to vector<16x8xf32>
    %587 = vector.shape_cast %586 : vector<16x8xf32> to vector<2x8x8xf32>
    %588 = arith.truncf %587 : vector<2x8x8xf32> to vector<2x8x8xbf16>
    %589 = vector.extract_strided_slice %519 {offsets = [0, 80], sizes = [16, 8], strides = [1, 1]} : vector<16x96xf32> to vector<16x8xf32>
    %590 = vector.shape_cast %589 : vector<16x8xf32> to vector<2x8x8xf32>
    %591 = arith.truncf %590 : vector<2x8x8xf32> to vector<2x8x8xbf16>
    "tpu.trace_start"() <{level = 10 : i32, message = "bqd,bkd->bqk"}> : () -> ()
    %cst_159 = arith.constant dense<0.000000e+00> : vector<2x8x8xf32>
    %592 = tpu.matmul %585, %588, %cst_159 {dimension_numbers = #tpu.dot_dimension_numbers<[2], [2], [1], [1], [0, 0, 0, 1, 1, 1], [0], [0]>} : vector<2x8x8xbf16>, vector<2x8x8xbf16>, vector<2x8x8xf32> -> vector<2x8x8xf32>
    "tpu.trace_stop"() : () -> ()
    %cst_160 = arith.constant 0.353553385 : f32
    %593 = vector.broadcast %cst_160 : f32 to vector<2x8x8xf32>
    %594 = arith.mulf %592, %593 : vector<2x8x8xf32>
    %595 = vector.broadcast %27 : vector<2x1x8xf32> to vector<2x8x8xf32>
    %596 = arith.addf %594, %595 : vector<2x8x8xf32>
    %cst_161 = arith.constant dense<0xFF800000> : vector<2x8xf32>
    %597 = vector.multi_reduction <maximumf>, %596, %cst_161 [2] : vector<2x8x8xf32> to vector<2x8xf32>
    %598 = vector.shape_cast %597 : vector<2x8xf32> to vector<2x8x1xf32>
    %599 = vector.broadcast %598 : vector<2x8x1xf32> to vector<2x8x8xf32>
    %600 = arith.subf %596, %599 : vector<2x8x8xf32>
    %601 = math.exp %600 : vector<2x8x8xf32>
    %cst_162 = arith.constant dense<0.000000e+00> : vector<2x8xf32>
    %602 = vector.multi_reduction <add>, %601, %cst_162 [2] : vector<2x8x8xf32> to vector<2x8xf32>
    %603 = vector.shape_cast %602 : vector<2x8xf32> to vector<2x8x1xf32>
    %604 = vector.broadcast %603 : vector<2x8x1xf32> to vector<2x8x8xf32>
    %605 = arith.divf %601, %604 : vector<2x8x8xf32>
    %606 = arith.truncf %605 : vector<2x8x8xf32> to vector<2x8x8xbf16>
    "tpu.trace_start"() <{level = 10 : i32, message = "bqk,bkd->bqd"}> : () -> ()
    %cst_163 = arith.constant dense<0.000000e+00> : vector<2x8x8xf32>
    %607 = tpu.matmul %606, %591, %cst_163 {dimension_numbers = #tpu.dot_dimension_numbers<[2], [1], [1], [2], [0, 0, 0, 1, 1, 2], [0], [0]>} : vector<2x8x8xbf16>, vector<2x8x8xbf16>, vector<2x8x8xf32> -> vector<2x8x8xf32>
    "tpu.trace_stop"() : () -> ()
    %608 = vector.shape_cast %607 : vector<2x8x8xf32> to vector<16x8xf32>
    %609 = arith.truncf %608 : vector<16x8xf32> to vector<16x8xbf16>
    %610 = vector.extract_strided_slice %521 {offsets = [16, 0], sizes = [8, 32], strides = [1, 1]} : vector<32x32xbf16> to vector<8x32xbf16>
    %cst_164 = arith.constant dense<0.000000e+00> : vector<16x32xf32>
    %611 = tpu.matmul %609, %610, %cst_164 {dimension_numbers = #tpu.dot_dimension_numbers<[1], [0], [0], [1], [0, 0, 1, 1], [], []>} : vector<16x8xbf16>, vector<8x32xbf16>, vector<16x32xf32> -> vector<16x32xf32>
    %612 = arith.addf %582, %611 : vector<16x32xf32>
    %613 = vector.extract_strided_slice %519 {offsets = [0, 24], sizes = [16, 8], strides = [1, 1]} : vector<16x96xf32> to vector<16x8xf32>
    %614 = vector.shape_cast %613 : vector<16x8xf32> to vector<2x8x8xf32>
    %615 = arith.truncf %614 : vector<2x8x8xf32> to vector<2x8x8xbf16>
    %616 = vector.extract_strided_slice %519 {offsets = [0, 56], sizes = [16, 8], strides = [1, 1]} : vector<16x96xf32> to vector<16x8xf32>
    %617 = vector.shape_cast %616 : vector<16x8xf32> to vector<2x8x8xf32>
    %618 = arith.truncf %617 : vector<2x8x8xf32> to vector<2x8x8xbf16>
    %619 = vector.extract_strided_slice %519 {offsets = [0, 88], sizes = [16, 8], strides = [1, 1]} : vector<16x96xf32> to vector<16x8xf32>
    %620 = vector.shape_cast %619 : vector<16x8xf32> to vector<2x8x8xf32>
    %621 = arith.truncf %620 : vector<2x8x8xf32> to vector<2x8x8xbf16>
    "tpu.trace_start"() <{level = 10 : i32, message = "bqd,bkd->bqk"}> : () -> ()
    %cst_165 = arith.constant dense<0.000000e+00> : vector<2x8x8xf32>
    %622 = tpu.matmul %615, %618, %cst_165 {dimension_numbers = #tpu.dot_dimension_numbers<[2], [2], [1], [1], [0, 0, 0, 1, 1, 1], [0], [0]>} : vector<2x8x8xbf16>, vector<2x8x8xbf16>, vector<2x8x8xf32> -> vector<2x8x8xf32>
    "tpu.trace_stop"() : () -> ()
    %cst_166 = arith.constant 0.353553385 : f32
    %623 = vector.broadcast %cst_166 : f32 to vector<2x8x8xf32>
    %624 = arith.mulf %622, %623 : vector<2x8x8xf32>
    %625 = vector.broadcast %27 : vector<2x1x8xf32> to vector<2x8x8xf32>
    %626 = arith.addf %624, %625 : vector<2x8x8xf32>
    %cst_167 = arith.constant dense<0xFF800000> : vector<2x8xf32>
    %627 = vector.multi_reduction <maximumf>, %626, %cst_167 [2] : vector<2x8x8xf32> to vector<2x8xf32>
    %628 = vector.shape_cast %627 : vector<2x8xf32> to vector<2x8x1xf32>
    %629 = vector.broadcast %628 : vector<2x8x1xf32> to vector<2x8x8xf32>
    %630 = arith.subf %626, %629 : vector<2x8x8xf32>
    %631 = math.exp %630 : vector<2x8x8xf32>
    %cst_168 = arith.constant dense<0.000000e+00> : vector<2x8xf32>
    %632 = vector.multi_reduction <add>, %631, %cst_168 [2] : vector<2x8x8xf32> to vector<2x8xf32>
    %633 = vector.shape_cast %632 : vector<2x8xf32> to vector<2x8x1xf32>
    %634 = vector.broadcast %633 : vector<2x8x1xf32> to vector<2x8x8xf32>
    %635 = arith.divf %631, %634 : vector<2x8x8xf32>
    %636 = arith.truncf %635 : vector<2x8x8xf32> to vector<2x8x8xbf16>
    "tpu.trace_start"() <{level = 10 : i32, message = "bqk,bkd->bqd"}> : () -> ()
    %cst_169 = arith.constant dense<0.000000e+00> : vector<2x8x8xf32>
    %637 = tpu.matmul %636, %621, %cst_169 {dimension_numbers = #tpu.dot_dimension_numbers<[2], [1], [1], [2], [0, 0, 0, 1, 1, 2], [0], [0]>} : vector<2x8x8xbf16>, vector<2x8x8xbf16>, vector<2x8x8xf32> -> vector<2x8x8xf32>
    "tpu.trace_stop"() : () -> ()
    %638 = vector.shape_cast %637 : vector<2x8x8xf32> to vector<16x8xf32>
    %639 = arith.truncf %638 : vector<16x8xf32> to vector<16x8xbf16>
    %640 = vector.extract_strided_slice %521 {offsets = [24, 0], sizes = [8, 32], strides = [1, 1]} : vector<32x32xbf16> to vector<8x32xbf16>
    %cst_170 = arith.constant dense<0.000000e+00> : vector<16x32xf32>
    %641 = tpu.matmul %639, %640, %cst_170 {dimension_numbers = #tpu.dot_dimension_numbers<[1], [0], [0], [1], [0, 0, 1, 1], [], []>} : vector<16x8xbf16>, vector<8x32xbf16>, vector<16x32xf32> -> vector<16x32xf32>
    %642 = arith.addf %612, %641 : vector<16x32xf32>
    %643 = vector.shape_cast %500 : vector<32xf32> to vector<1x32xf32>
    %644 = vector.broadcast %643 : vector<1x32xf32> to vector<16x32xf32>
    %645 = arith.addf %642, %644 : vector<16x32xf32>
    %646 = arith.addf %645, %496 : vector<16x32xf32>
    %cst_171 = arith.constant dense<0.000000e+00> : vector<16xf32>
    %647 = vector.multi_reduction <add>, %646, %cst_171 [1] : vector<16x32xf32> to vector<16xf32>
    %648 = vector.shape_cast %647 : vector<16xf32> to vector<16x1xf32>
    %cst_172 = arith.constant 3.200000e+01 : f32
    %649 = vector.broadcast %cst_172 : f32 to vector<16x1xf32>
    %650 = arith.divf %648, %649 : vector<16x1xf32>
    %651 = vector.broadcast %650 : vector<16x1xf32> to vector<16x32xf32>
    %652 = arith.subf %646, %651 : vector<16x32xf32>
    %653 = arith.mulf %652, %652 : vector<16x32xf32>
    %cst_173 = arith.constant dense<0.000000e+00> : vector<16xf32>
    %654 = vector.multi_reduction <add>, %653, %cst_173 [1] : vector<16x32xf32> to vector<16xf32>
    %655 = vector.shape_cast %654 : vector<16xf32> to vector<16x1xf32>
    %cst_174 = arith.constant 3.200000e+01 : f32
    %656 = vector.broadcast %cst_174 : f32 to vector<16x1xf32>
    %657 = arith.divf %655, %656 : vector<16x1xf32>
    %658 = vector.broadcast %650 : vector<16x1xf32> to vector<16x32xf32>
    %659 = arith.subf %646, %658 : vector<16x32xf32>
    %cst_175 = arith.constant 9.99999996E-13 : f32
    %660 = vector.broadcast %cst_175 : f32 to vector<16x1xf32>
    %661 = arith.addf %657, %660 : vector<16x1xf32>
    %662 = math.rsqrt %661 : vector<16x1xf32>
    %663 = vector.broadcast %662 : vector<16x1xf32> to vector<16x32xf32>
    %664 = arith.mulf %659, %663 : vector<16x32xf32>
    %665 = vector.shape_cast %502 : vector<32xf32> to vector<1x32xf32>
    %666 = vector.broadcast %665 : vector<1x32xf32> to vector<16x32xf32>
    %667 = arith.mulf %664, %666 : vector<16x32xf32>
    %668 = vector.shape_cast %504 : vector<32xf32> to vector<1x32xf32>
    %669 = vector.broadcast %668 : vector<1x32xf32> to vector<16x32xf32>
    %670 = arith.addf %667, %669 : vector<16x32xf32>
    %671 = arith.truncf %670 : vector<16x32xf32> to vector<16x32xbf16>
    %c2_176 = arith.constant 2 : index
    %c0_177 = arith.constant 0 : index
    %c0_178 = arith.constant 0 : index
    %672 = vector.load %arg7[%c2_176, %c0_177, %c0_178] : memref<4x32x64xbf16, #tpu.memory_space<vmem>>, vector<1x32x64xbf16>
    %673 = vector.shape_cast %672 : vector<1x32x64xbf16> to vector<32x64xbf16>
    %cst_179 = arith.constant dense<0.000000e+00> : vector<16x64xf32>
    %674 = tpu.matmul %671, %673, %cst_179 {dimension_numbers = #tpu.dot_dimension_numbers<[1], [0], [0], [1], [0, 0, 1, 1], [], []>} : vector<16x32xbf16>, vector<32x64xbf16>, vector<16x64xf32> -> vector<16x64xf32>
    %675 = vector.shape_cast %506 : vector<64xf32> to vector<1x64xf32>
    %676 = vector.broadcast %675 : vector<1x64xf32> to vector<16x64xf32>
    %677 = arith.addf %674, %676 : vector<16x64xf32>
    %cst_180 = arith.constant 5.000000e-01 : f32
    %678 = vector.broadcast %cst_180 : f32 to vector<16x64xf32>
    %679 = arith.mulf %678, %677 : vector<16x64xf32>
    %cst_181 = arith.constant 4.471500e-02 : f32
    %680 = vector.broadcast %cst_181 : f32 to vector<16x64xf32>
    %681 = arith.mulf %680, %677 : vector<16x64xf32>
    %682 = arith.mulf %681, %677 : vector<16x64xf32>
    %683 = arith.mulf %682, %677 : vector<16x64xf32>
    %684 = arith.addf %677, %683 : vector<16x64xf32>
    %cst_182 = arith.constant 0.797884583 : f32
    %685 = vector.broadcast %cst_182 : f32 to vector<16x64xf32>
    %686 = arith.mulf %685, %684 : vector<16x64xf32>
    %687 = math.tanh %686 : vector<16x64xf32>
    %cst_183 = arith.constant 1.000000e+00 : f32
    %688 = vector.broadcast %cst_183 : f32 to vector<16x64xf32>
    %689 = arith.addf %688, %687 : vector<16x64xf32>
    %690 = arith.mulf %679, %689 : vector<16x64xf32>
    %691 = arith.truncf %690 : vector<16x64xf32> to vector<16x64xbf16>
    %c2_184 = arith.constant 2 : index
    %c0_185 = arith.constant 0 : index
    %c0_186 = arith.constant 0 : index
    %692 = vector.load %arg8[%c2_184, %c0_185, %c0_186] : memref<4x64x32xbf16, #tpu.memory_space<vmem>>, vector<1x64x32xbf16>
    %693 = vector.shape_cast %692 : vector<1x64x32xbf16> to vector<64x32xbf16>
    %cst_187 = arith.constant dense<0.000000e+00> : vector<16x32xf32>
    %694 = tpu.matmul %691, %693, %cst_187 {dimension_numbers = #tpu.dot_dimension_numbers<[1], [0], [0], [1], [0, 0, 1, 1], [], []>} : vector<16x64xbf16>, vector<64x32xbf16>, vector<16x32xf32> -> vector<16x32xf32>
    %695 = vector.shape_cast %508 : vector<32xf32> to vector<1x32xf32>
    %696 = vector.broadcast %695 : vector<1x32xf32> to vector<16x32xf32>
    %697 = arith.addf %694, %696 : vector<16x32xf32>
    %698 = arith.addf %697, %670 : vector<16x32xf32>
    %cst_188 = arith.constant dense<0.000000e+00> : vector<16xf32>
    %699 = vector.multi_reduction <add>, %698, %cst_188 [1] : vector<16x32xf32> to vector<16xf32>
    %700 = vector.shape_cast %699 : vector<16xf32> to vector<16x1xf32>
    %cst_189 = arith.constant 3.200000e+01 : f32
    %701 = vector.broadcast %cst_189 : f32 to vector<16x1xf32>
    %702 = arith.divf %700, %701 : vector<16x1xf32>
    %703 = vector.broadcast %702 : vector<16x1xf32> to vector<16x32xf32>
    %704 = arith.subf %698, %703 : vector<16x32xf32>
    %705 = arith.mulf %704, %704 : vector<16x32xf32>
    %cst_190 = arith.constant dense<0.000000e+00> : vector<16xf32>
    %706 = vector.multi_reduction <add>, %705, %cst_190 [1] : vector<16x32xf32> to vector<16xf32>
    %707 = vector.shape_cast %706 : vector<16xf32> to vector<16x1xf32>
    %cst_191 = arith.constant 3.200000e+01 : f32
    %708 = vector.broadcast %cst_191 : f32 to vector<16x1xf32>
    %709 = arith.divf %707, %708 : vector<16x1xf32>
    %710 = vector.broadcast %702 : vector<16x1xf32> to vector<16x32xf32>
    %711 = arith.subf %698, %710 : vector<16x32xf32>
    %cst_192 = arith.constant 9.99999996E-13 : f32
    %712 = vector.broadcast %cst_192 : f32 to vector<16x1xf32>
    %713 = arith.addf %709, %712 : vector<16x1xf32>
    %714 = math.rsqrt %713 : vector<16x1xf32>
    %715 = vector.broadcast %714 : vector<16x1xf32> to vector<16x32xf32>
    %716 = arith.mulf %711, %715 : vector<16x32xf32>
    %717 = vector.shape_cast %510 : vector<32xf32> to vector<1x32xf32>
    %718 = vector.broadcast %717 : vector<1x32xf32> to vector<16x32xf32>
    %719 = arith.mulf %716, %718 : vector<16x32xf32>
    %720 = vector.shape_cast %512 : vector<32xf32> to vector<1x32xf32>
    %721 = vector.broadcast %720 : vector<1x32xf32> to vector<16x32xf32>
    %722 = arith.addf %719, %721 : vector<16x32xf32>
    %c0_193 = arith.constant 0 : index
    %c0_194 = arith.constant 0 : index
    %723 = vector.load %arg16[%c0_193, %c0_194] : memref<16x32xf32, #tpu.memory_space<vmem>>, vector<16x32xf32>
    tpu.vector_store %arg16[%c0_193, %c0_194], %722 {strides = array<i32>} : memref<16x32xf32, #tpu.memory_space<vmem>>, vector<16x32xf32>,
    %c0_195 = arith.constant 0 : index
    %c0_196 = arith.constant 0 : index
    %724 = tpu.strided_load %arg16[%c0_195, %c0_196] {strides = array<i32: 8, 1>} : memref<16x32xf32, #tpu.memory_space<vmem>>, vector<2x32xf32>
    %c2_197 = arith.constant 2 : index
    %725 = memref.load %arg10[%c2_197] : memref<4xf32, #tpu.memory_space<smem>>
    %726 = vector.broadcast %725 : f32 to vector<2x32xf32>
    %727 = arith.mulf %726, %724 : vector<2x32xf32>
    %728 = arith.addf %495, %727 : vector<2x32xf32>
    %c0_198 = arith.constant 0 : index
    %c0_199 = arith.constant 0 : index
    %729 = vector.load %arg16[%c0_198, %c0_199] : memref<16x32xf32, #tpu.memory_space<vmem>>, vector<16x32xf32>
    %730 = vector.extract_strided_slice %28 {offsets = [3, 0, 0], sizes = [1, 1, 96], strides = [1, 1, 1]} : vector<4x8x96xf32> to vector<1x1x96xf32>
    %731 = vector.shape_cast %730 : vector<1x1x96xf32> to vector<96xf32>
    %732 = vector.extract_strided_slice %28 {offsets = [3, 1, 0], sizes = [1, 1, 32], strides = [1, 1, 1]} : vector<4x8x96xf32> to vector<1x1x32xf32>
    %733 = vector.shape_cast %732 : vector<1x1x32xf32> to vector<32xf32>
    %734 = vector.extract_strided_slice %28 {offsets = [3, 2, 0], sizes = [1, 1, 32], strides = [1, 1, 1]} : vector<4x8x96xf32> to vector<1x1x32xf32>
    %735 = vector.shape_cast %734 : vector<1x1x32xf32> to vector<32xf32>
    %736 = vector.extract_strided_slice %28 {offsets = [3, 3, 0], sizes = [1, 1, 32], strides = [1, 1, 1]} : vector<4x8x96xf32> to vector<1x1x32xf32>
    %737 = vector.shape_cast %736 : vector<1x1x32xf32> to vector<32xf32>
    %738 = vector.extract_strided_slice %28 {offsets = [3, 4, 0], sizes = [1, 1, 64], strides = [1, 1, 1]} : vector<4x8x96xf32> to vector<1x1x64xf32>
    %739 = vector.shape_cast %738 : vector<1x1x64xf32> to vector<64xf32>
    %740 = vector.extract_strided_slice %28 {offsets = [3, 5, 0], sizes = [1, 1, 32], strides = [1, 1, 1]} : vector<4x8x96xf32> to vector<1x1x32xf32>
    %741 = vector.shape_cast %740 : vector<1x1x32xf32> to vector<32xf32>
    %742 = vector.extract_strided_slice %28 {offsets = [3, 6, 0], sizes = [1, 1, 32], strides = [1, 1, 1]} : vector<4x8x96xf32> to vector<1x1x32xf32>
    %743 = vector.shape_cast %742 : vector<1x1x32xf32> to vector<32xf32>
    %744 = vector.extract_strided_slice %28 {offsets = [3, 7, 0], sizes = [1, 1, 32], strides = [1, 1, 1]} : vector<4x8x96xf32> to vector<1x1x32xf32>
    %745 = vector.shape_cast %744 : vector<1x1x32xf32> to vector<32xf32>
    %746 = arith.truncf %729 : vector<16x32xf32> to vector<16x32xbf16>
    %c3 = arith.constant 3 : index
    %c0_200 = arith.constant 0 : index
    %c0_201 = arith.constant 0 : index
    %747 = vector.load %arg5[%c3, %c0_200, %c0_201] : memref<4x32x96xbf16, #tpu.memory_space<vmem>>, vector<1x32x96xbf16>
    %748 = vector.shape_cast %747 : vector<1x32x96xbf16> to vector<32x96xbf16>
    %cst_202 = arith.constant dense<0.000000e+00> : vector<16x96xf32>
    %749 = tpu.matmul %746, %748, %cst_202 {dimension_numbers = #tpu.dot_dimension_numbers<[1], [0], [0], [1], [0, 0, 1, 1], [], []>} : vector<16x32xbf16>, vector<32x96xbf16>, vector<16x96xf32> -> vector<16x96xf32>
    %750 = vector.shape_cast %731 : vector<96xf32> to vector<1x96xf32>
    %751 = vector.broadcast %750 : vector<1x96xf32> to vector<16x96xf32>
    %752 = arith.addf %749, %751 : vector<16x96xf32>
    %c3_203 = arith.constant 3 : index
    %c0_204 = arith.constant 0 : index
    %c0_205 = arith.constant 0 : index
    %753 = vector.load %arg6[%c3_203, %c0_204, %c0_205] : memref<4x32x32xbf16, #tpu.memory_space<vmem>>, vector<1x32x32xbf16>
    %754 = vector.shape_cast %753 : vector<1x32x32xbf16> to vector<32x32xbf16>
    %cst_206 = arith.constant 0.000000e+00 : f32
    %755 = vector.broadcast %cst_206 : f32 to vector<16x32xf32>
    %756 = vector.extract_strided_slice %752 {offsets = [0, 0], sizes = [16, 8], strides = [1, 1]} : vector<16x96xf32> to vector<16x8xf32>
    %757 = vector.shape_cast %756 : vector<16x8xf32> to vector<2x8x8xf32>
    %758 = arith.truncf %757 : vector<2x8x8xf32> to vector<2x8x8xbf16>
    %759 = vector.extract_strided_slice %752 {offsets = [0, 32], sizes = [16, 8], strides = [1, 1]} : vector<16x96xf32> to vector<16x8xf32>
    %760 = vector.shape_cast %759 : vector<16x8xf32> to vector<2x8x8xf32>
    %761 = arith.truncf %760 : vector<2x8x8xf32> to vector<2x8x8xbf16>
    %762 = vector.extract_strided_slice %752 {offsets = [0, 64], sizes = [16, 8], strides = [1, 1]} : vector<16x96xf32> to vector<16x8xf32>
    %763 = vector.shape_cast %762 : vector<16x8xf32> to vector<2x8x8xf32>
    %764 = arith.truncf %763 : vector<2x8x8xf32> to vector<2x8x8xbf16>
    "tpu.trace_start"() <{level = 10 : i32, message = "bqd,bkd->bqk"}> : () -> ()
    %cst_207 = arith.constant dense<0.000000e+00> : vector<2x8x8xf32>
    %765 = tpu.matmul %758, %761, %cst_207 {dimension_numbers = #tpu.dot_dimension_numbers<[2], [2], [1], [1], [0, 0, 0, 1, 1, 1], [0], [0]>} : vector<2x8x8xbf16>, vector<2x8x8xbf16>, vector<2x8x8xf32> -> vector<2x8x8xf32>
    "tpu.trace_stop"() : () -> ()
    %cst_208 = arith.constant 0.353553385 : f32
    %766 = vector.broadcast %cst_208 : f32 to vector<2x8x8xf32>
    %767 = arith.mulf %765, %766 : vector<2x8x8xf32>
    %768 = vector.broadcast %27 : vector<2x1x8xf32> to vector<2x8x8xf32>
    %769 = arith.addf %767, %768 : vector<2x8x8xf32>
    %cst_209 = arith.constant dense<0xFF800000> : vector<2x8xf32>
    %770 = vector.multi_reduction <maximumf>, %769, %cst_209 [2] : vector<2x8x8xf32> to vector<2x8xf32>
    %771 = vector.shape_cast %770 : vector<2x8xf32> to vector<2x8x1xf32>
    %772 = vector.broadcast %771 : vector<2x8x1xf32> to vector<2x8x8xf32>
    %773 = arith.subf %769, %772 : vector<2x8x8xf32>
    %774 = math.exp %773 : vector<2x8x8xf32>
    %cst_210 = arith.constant dense<0.000000e+00> : vector<2x8xf32>
    %775 = vector.multi_reduction <add>, %774, %cst_210 [2] : vector<2x8x8xf32> to vector<2x8xf32>
    %776 = vector.shape_cast %775 : vector<2x8xf32> to vector<2x8x1xf32>
    %777 = vector.broadcast %776 : vector<2x8x1xf32> to vector<2x8x8xf32>
    %778 = arith.divf %774, %777 : vector<2x8x8xf32>
    %779 = arith.truncf %778 : vector<2x8x8xf32> to vector<2x8x8xbf16>
    "tpu.trace_start"() <{level = 10 : i32, message = "bqk,bkd->bqd"}> : () -> ()
    %cst_211 = arith.constant dense<0.000000e+00> : vector<2x8x8xf32>
    %780 = tpu.matmul %779, %764, %cst_211 {dimension_numbers = #tpu.dot_dimension_numbers<[2], [1], [1], [2], [0, 0, 0, 1, 1, 2], [0], [0]>} : vector<2x8x8xbf16>, vector<2x8x8xbf16>, vector<2x8x8xf32> -> vector<2x8x8xf32>
    "tpu.trace_stop"() : () -> ()
    %781 = vector.shape_cast %780 : vector<2x8x8xf32> to vector<16x8xf32>
    %782 = arith.truncf %781 : vector<16x8xf32> to vector<16x8xbf16>
    %783 = vector.extract_strided_slice %754 {offsets = [0, 0], sizes = [8, 32], strides = [1, 1]} : vector<32x32xbf16> to vector<8x32xbf16>
    %cst_212 = arith.constant dense<0.000000e+00> : vector<16x32xf32>
    %784 = tpu.matmul %782, %783, %cst_212 {dimension_numbers = #tpu.dot_dimension_numbers<[1], [0], [0], [1], [0, 0, 1, 1], [], []>} : vector<16x8xbf16>, vector<8x32xbf16>, vector<16x32xf32> -> vector<16x32xf32>
    %785 = arith.addf %755, %784 : vector<16x32xf32>
    %786 = vector.extract_strided_slice %752 {offsets = [0, 8], sizes = [16, 8], strides = [1, 1]} : vector<16x96xf32> to vector<16x8xf32>
    %787 = vector.shape_cast %786 : vector<16x8xf32> to vector<2x8x8xf32>
    %788 = arith.truncf %787 : vector<2x8x8xf32> to vector<2x8x8xbf16>
    %789 = vector.extract_strided_slice %752 {offsets = [0, 40], sizes = [16, 8], strides = [1, 1]} : vector<16x96xf32> to vector<16x8xf32>
    %790 = vector.shape_cast %789 : vector<16x8xf32> to vector<2x8x8xf32>
    %791 = arith.truncf %790 : vector<2x8x8xf32> to vector<2x8x8xbf16>
    %792 = vector.extract_strided_slice %752 {offsets = [0, 72], sizes = [16, 8], strides = [1, 1]} : vector<16x96xf32> to vector<16x8xf32>
    %793 = vector.shape_cast %792 : vector<16x8xf32> to vector<2x8x8xf32>
    %794 = arith.truncf %793 : vector<2x8x8xf32> to vector<2x8x8xbf16>
    "tpu.trace_start"() <{level = 10 : i32, message = "bqd,bkd->bqk"}> : () -> ()
    %cst_213 = arith.constant dense<0.000000e+00> : vector<2x8x8xf32>
    %795 = tpu.matmul %788, %791, %cst_213 {dimension_numbers = #tpu.dot_dimension_numbers<[2], [2], [1], [1], [0, 0, 0, 1, 1, 1], [0], [0]>} : vector<2x8x8xbf16>, vector<2x8x8xbf16>, vector<2x8x8xf32> -> vector<2x8x8xf32>
    "tpu.trace_stop"() : () -> ()
    %cst_214 = arith.constant 0.353553385 : f32
    %796 = vector.broadcast %cst_214 : f32 to vector<2x8x8xf32>
    %797 = arith.mulf %795, %796 : vector<2x8x8xf32>
    %798 = vector.broadcast %27 : vector<2x1x8xf32> to vector<2x8x8xf32>
    %799 = arith.addf %797, %798 : vector<2x8x8xf32>
    %cst_215 = arith.constant dense<0xFF800000> : vector<2x8xf32>
    %800 = vector.multi_reduction <maximumf>, %799, %cst_215 [2] : vector<2x8x8xf32> to vector<2x8xf32>
    %801 = vector.shape_cast %800 : vector<2x8xf32> to vector<2x8x1xf32>
    %802 = vector.broadcast %801 : vector<2x8x1xf32> to vector<2x8x8xf32>
    %803 = arith.subf %799, %802 : vector<2x8x8xf32>
    %804 = math.exp %803 : vector<2x8x8xf32>
    %cst_216 = arith.constant dense<0.000000e+00> : vector<2x8xf32>
    %805 = vector.multi_reduction <add>, %804, %cst_216 [2] : vector<2x8x8xf32> to vector<2x8xf32>
    %806 = vector.shape_cast %805 : vector<2x8xf32> to vector<2x8x1xf32>
    %807 = vector.broadcast %806 : vector<2x8x1xf32> to vector<2x8x8xf32>
    %808 = arith.divf %804, %807 : vector<2x8x8xf32>
    %809 = arith.truncf %808 : vector<2x8x8xf32> to vector<2x8x8xbf16>
    "tpu.trace_start"() <{level = 10 : i32, message = "bqk,bkd->bqd"}> : () -> ()
    %cst_217 = arith.constant dense<0.000000e+00> : vector<2x8x8xf32>
    %810 = tpu.matmul %809, %794, %cst_217 {dimension_numbers = #tpu.dot_dimension_numbers<[2], [1], [1], [2], [0, 0, 0, 1, 1, 2], [0], [0]>} : vector<2x8x8xbf16>, vector<2x8x8xbf16>, vector<2x8x8xf32> -> vector<2x8x8xf32>
    "tpu.trace_stop"() : () -> ()
    %811 = vector.shape_cast %810 : vector<2x8x8xf32> to vector<16x8xf32>
    %812 = arith.truncf %811 : vector<16x8xf32> to vector<16x8xbf16>
    %813 = vector.extract_strided_slice %754 {offsets = [8, 0], sizes = [8, 32], strides = [1, 1]} : vector<32x32xbf16> to vector<8x32xbf16>
    %cst_218 = arith.constant dense<0.000000e+00> : vector<16x32xf32>
    %814 = tpu.matmul %812, %813, %cst_218 {dimension_numbers = #tpu.dot_dimension_numbers<[1], [0], [0], [1], [0, 0, 1, 1], [], []>} : vector<16x8xbf16>, vector<8x32xbf16>, vector<16x32xf32> -> vector<16x32xf32>
    %815 = arith.addf %785, %814 : vector<16x32xf32>
    %816 = vector.extract_strided_slice %752 {offsets = [0, 16], sizes = [16, 8], strides = [1, 1]} : vector<16x96xf32> to vector<16x8xf32>
    %817 = vector.shape_cast %816 : vector<16x8xf32> to vector<2x8x8xf32>
    %818 = arith.truncf %817 : vector<2x8x8xf32> to vector<2x8x8xbf16>
    %819 = vector.extract_strided_slice %752 {offsets = [0, 48], sizes = [16, 8], strides = [1, 1]} : vector<16x96xf32> to vector<16x8xf32>
    %820 = vector.shape_cast %819 : vector<16x8xf32> to vector<2x8x8xf32>
    %821 = arith.truncf %820 : vector<2x8x8xf32> to vector<2x8x8xbf16>
    %822 = vector.extract_strided_slice %752 {offsets = [0, 80], sizes = [16, 8], strides = [1, 1]} : vector<16x96xf32> to vector<16x8xf32>
    %823 = vector.shape_cast %822 : vector<16x8xf32> to vector<2x8x8xf32>
    %824 = arith.truncf %823 : vector<2x8x8xf32> to vector<2x8x8xbf16>
    "tpu.trace_start"() <{level = 10 : i32, message = "bqd,bkd->bqk"}> : () -> ()
    %cst_219 = arith.constant dense<0.000000e+00> : vector<2x8x8xf32>
    %825 = tpu.matmul %818, %821, %cst_219 {dimension_numbers = #tpu.dot_dimension_numbers<[2], [2], [1], [1], [0, 0, 0, 1, 1, 1], [0], [0]>} : vector<2x8x8xbf16>, vector<2x8x8xbf16>, vector<2x8x8xf32> -> vector<2x8x8xf32>
    "tpu.trace_stop"() : () -> ()
    %cst_220 = arith.constant 0.353553385 : f32
    %826 = vector.broadcast %cst_220 : f32 to vector<2x8x8xf32>
    %827 = arith.mulf %825, %826 : vector<2x8x8xf32>
    %828 = vector.broadcast %27 : vector<2x1x8xf32> to vector<2x8x8xf32>
    %829 = arith.addf %827, %828 : vector<2x8x8xf32>
    %cst_221 = arith.constant dense<0xFF800000> : vector<2x8xf32>
    %830 = vector.multi_reduction <maximumf>, %829, %cst_221 [2] : vector<2x8x8xf32> to vector<2x8xf32>
    %831 = vector.shape_cast %830 : vector<2x8xf32> to vector<2x8x1xf32>
    %832 = vector.broadcast %831 : vector<2x8x1xf32> to vector<2x8x8xf32>
    %833 = arith.subf %829, %832 : vector<2x8x8xf32>
    %834 = math.exp %833 : vector<2x8x8xf32>
    %cst_222 = arith.constant dense<0.000000e+00> : vector<2x8xf32>
    %835 = vector.multi_reduction <add>, %834, %cst_222 [2] : vector<2x8x8xf32> to vector<2x8xf32>
    %836 = vector.shape_cast %835 : vector<2x8xf32> to vector<2x8x1xf32>
    %837 = vector.broadcast %836 : vector<2x8x1xf32> to vector<2x8x8xf32>
    %838 = arith.divf %834, %837 : vector<2x8x8xf32>
    %839 = arith.truncf %838 : vector<2x8x8xf32> to vector<2x8x8xbf16>
    "tpu.trace_start"() <{level = 10 : i32, message = "bqk,bkd->bqd"}> : () -> ()
    %cst_223 = arith.constant dense<0.000000e+00> : vector<2x8x8xf32>
    %840 = tpu.matmul %839, %824, %cst_223 {dimension_numbers = #tpu.dot_dimension_numbers<[2], [1], [1], [2], [0, 0, 0, 1, 1, 2], [0], [0]>} : vector<2x8x8xbf16>, vector<2x8x8xbf16>, vector<2x8x8xf32> -> vector<2x8x8xf32>
    "tpu.trace_stop"() : () -> ()
    %841 = vector.shape_cast %840 : vector<2x8x8xf32> to vector<16x8xf32>
    %842 = arith.truncf %841 : vector<16x8xf32> to vector<16x8xbf16>
    %843 = vector.extract_strided_slice %754 {offsets = [16, 0], sizes = [8, 32], strides = [1, 1]} : vector<32x32xbf16> to vector<8x32xbf16>
    %cst_224 = arith.constant dense<0.000000e+00> : vector<16x32xf32>
    %844 = tpu.matmul %842, %843, %cst_224 {dimension_numbers = #tpu.dot_dimension_numbers<[1], [0], [0], [1], [0, 0, 1, 1], [], []>} : vector<16x8xbf16>, vector<8x32xbf16>, vector<16x32xf32> -> vector<16x32xf32>
    %845 = arith.addf %815, %844 : vector<16x32xf32>
    %846 = vector.extract_strided_slice %752 {offsets = [0, 24], sizes = [16, 8], strides = [1, 1]} : vector<16x96xf32> to vector<16x8xf32>
    %847 = vector.shape_cast %846 : vector<16x8xf32> to vector<2x8x8xf32>
    %848 = arith.truncf %847 : vector<2x8x8xf32> to vector<2x8x8xbf16>
    %849 = vector.extract_strided_slice %752 {offsets = [0, 56], sizes = [16, 8], strides = [1, 1]} : vector<16x96xf32> to vector<16x8xf32>
    %850 = vector.shape_cast %849 : vector<16x8xf32> to vector<2x8x8xf32>
    %851 = arith.truncf %850 : vector<2x8x8xf32> to vector<2x8x8xbf16>
    %852 = vector.extract_strided_slice %752 {offsets = [0, 88], sizes = [16, 8], strides = [1, 1]} : vector<16x96xf32> to vector<16x8xf32>
    %853 = vector.shape_cast %852 : vector<16x8xf32> to vector<2x8x8xf32>
    %854 = arith.truncf %853 : vector<2x8x8xf32> to vector<2x8x8xbf16>
    "tpu.trace_start"() <{level = 10 : i32, message = "bqd,bkd->bqk"}> : () -> ()
    %cst_225 = arith.constant dense<0.000000e+00> : vector<2x8x8xf32>
    %855 = tpu.matmul %848, %851, %cst_225 {dimension_numbers = #tpu.dot_dimension_numbers<[2], [2], [1], [1], [0, 0, 0, 1, 1, 1], [0], [0]>} : vector<2x8x8xbf16>, vector<2x8x8xbf16>, vector<2x8x8xf32> -> vector<2x8x8xf32>
    "tpu.trace_stop"() : () -> ()
    %cst_226 = arith.constant 0.353553385 : f32
    %856 = vector.broadcast %cst_226 : f32 to vector<2x8x8xf32>
    %857 = arith.mulf %855, %856 : vector<2x8x8xf32>
    %858 = vector.broadcast %27 : vector<2x1x8xf32> to vector<2x8x8xf32>
    %859 = arith.addf %857, %858 : vector<2x8x8xf32>
    %cst_227 = arith.constant dense<0xFF800000> : vector<2x8xf32>
    %860 = vector.multi_reduction <maximumf>, %859, %cst_227 [2] : vector<2x8x8xf32> to vector<2x8xf32>
    %861 = vector.shape_cast %860 : vector<2x8xf32> to vector<2x8x1xf32>
    %862 = vector.broadcast %861 : vector<2x8x1xf32> to vector<2x8x8xf32>
    %863 = arith.subf %859, %862 : vector<2x8x8xf32>
    %864 = math.exp %863 : vector<2x8x8xf32>
    %cst_228 = arith.constant dense<0.000000e+00> : vector<2x8xf32>
    %865 = vector.multi_reduction <add>, %864, %cst_228 [2] : vector<2x8x8xf32> to vector<2x8xf32>
    %866 = vector.shape_cast %865 : vector<2x8xf32> to vector<2x8x1xf32>
    %867 = vector.broadcast %866 : vector<2x8x1xf32> to vector<2x8x8xf32>
    %868 = arith.divf %864, %867 : vector<2x8x8xf32>
    %869 = arith.truncf %868 : vector<2x8x8xf32> to vector<2x8x8xbf16>
    "tpu.trace_start"() <{level = 10 : i32, message = "bqk,bkd->bqd"}> : () -> ()
    %cst_229 = arith.constant dense<0.000000e+00> : vector<2x8x8xf32>
    %870 = tpu.matmul %869, %854, %cst_229 {dimension_numbers = #tpu.dot_dimension_numbers<[2], [1], [1], [2], [0, 0, 0, 1, 1, 2], [0], [0]>} : vector<2x8x8xbf16>, vector<2x8x8xbf16>, vector<2x8x8xf32> -> vector<2x8x8xf32>
    "tpu.trace_stop"() : () -> ()
    %871 = vector.shape_cast %870 : vector<2x8x8xf32> to vector<16x8xf32>
    %872 = arith.truncf %871 : vector<16x8xf32> to vector<16x8xbf16>
    %873 = vector.extract_strided_slice %754 {offsets = [24, 0], sizes = [8, 32], strides = [1, 1]} : vector<32x32xbf16> to vector<8x32xbf16>
    %cst_230 = arith.constant dense<0.000000e+00> : vector<16x32xf32>
    %874 = tpu.matmul %872, %873, %cst_230 {dimension_numbers = #tpu.dot_dimension_numbers<[1], [0], [0], [1], [0, 0, 1, 1], [], []>} : vector<16x8xbf16>, vector<8x32xbf16>, vector<16x32xf32> -> vector<16x32xf32>
    %875 = arith.addf %845, %874 : vector<16x32xf32>
    %876 = vector.shape_cast %733 : vector<32xf32> to vector<1x32xf32>
    %877 = vector.broadcast %876 : vector<1x32xf32> to vector<16x32xf32>
    %878 = arith.addf %875, %877 : vector<16x32xf32>
    %879 = arith.addf %878, %729 : vector<16x32xf32>
    %cst_231 = arith.constant dense<0.000000e+00> : vector<16xf32>
    %880 = vector.multi_reduction <add>, %879, %cst_231 [1] : vector<16x32xf32> to vector<16xf32>
    %881 = vector.shape_cast %880 : vector<16xf32> to vector<16x1xf32>
    %cst_232 = arith.constant 3.200000e+01 : f32
    %882 = vector.broadcast %cst_232 : f32 to vector<16x1xf32>
    %883 = arith.divf %881, %882 : vector<16x1xf32>
    %884 = vector.broadcast %883 : vector<16x1xf32> to vector<16x32xf32>
    %885 = arith.subf %879, %884 : vector<16x32xf32>
    %886 = arith.mulf %885, %885 : vector<16x32xf32>
    %cst_233 = arith.constant dense<0.000000e+00> : vector<16xf32>
    %887 = vector.multi_reduction <add>, %886, %cst_233 [1] : vector<16x32xf32> to vector<16xf32>
    %888 = vector.shape_cast %887 : vector<16xf32> to vector<16x1xf32>
    %cst_234 = arith.constant 3.200000e+01 : f32
    %889 = vector.broadcast %cst_234 : f32 to vector<16x1xf32>
    %890 = arith.divf %888, %889 : vector<16x1xf32>
    %891 = vector.broadcast %883 : vector<16x1xf32> to vector<16x32xf32>
    %892 = arith.subf %879, %891 : vector<16x32xf32>
    %cst_235 = arith.constant 9.99999996E-13 : f32
    %893 = vector.broadcast %cst_235 : f32 to vector<16x1xf32>
    %894 = arith.addf %890, %893 : vector<16x1xf32>
    %895 = math.rsqrt %894 : vector<16x1xf32>
    %896 = vector.broadcast %895 : vector<16x1xf32> to vector<16x32xf32>
    %897 = arith.mulf %892, %896 : vector<16x32xf32>
    %898 = vector.shape_cast %735 : vector<32xf32> to vector<1x32xf32>
    %899 = vector.broadcast %898 : vector<1x32xf32> to vector<16x32xf32>
    %900 = arith.mulf %897, %899 : vector<16x32xf32>
    %901 = vector.shape_cast %737 : vector<32xf32> to vector<1x32xf32>
    %902 = vector.broadcast %901 : vector<1x32xf32> to vector<16x32xf32>
    %903 = arith.addf %900, %902 : vector<16x32xf32>
    %904 = arith.truncf %903 : vector<16x32xf32> to vector<16x32xbf16>
    %c3_236 = arith.constant 3 : index
    %c0_237 = arith.constant 0 : index
    %c0_238 = arith.constant 0 : index
    %905 = vector.load %arg7[%c3_236, %c0_237, %c0_238] : memref<4x32x64xbf16, #tpu.memory_space<vmem>>, vector<1x32x64xbf16>
    %906 = vector.shape_cast %905 : vector<1x32x64xbf16> to vector<32x64xbf16>
    %cst_239 = arith.constant dense<0.000000e+00> : vector<16x64xf32>
    %907 = tpu.matmul %904, %906, %cst_239 {dimension_numbers = #tpu.dot_dimension_numbers<[1], [0], [0], [1], [0, 0, 1, 1], [], []>} : vector<16x32xbf16>, vector<32x64xbf16>, vector<16x64xf32> -> vector<16x64xf32>
    %908 = vector.shape_cast %739 : vector<64xf32> to vector<1x64xf32>
    %909 = vector.broadcast %908 : vector<1x64xf32> to vector<16x64xf32>
    %910 = arith.addf %907, %909 : vector<16x64xf32>
    %cst_240 = arith.constant 5.000000e-01 : f32
    %911 = vector.broadcast %cst_240 : f32 to vector<16x64xf32>
    %912 = arith.mulf %911, %910 : vector<16x64xf32>
    %cst_241 = arith.constant 4.471500e-02 : f32
    %913 = vector.broadcast %cst_241 : f32 to vector<16x64xf32>
    %914 = arith.mulf %913, %910 : vector<16x64xf32>
    %915 = arith.mulf %914, %910 : vector<16x64xf32>
    %916 = arith.mulf %915, %910 : vector<16x64xf32>
    %917 = arith.addf %910, %916 : vector<16x64xf32>
    %cst_242 = arith.constant 0.797884583 : f32
    %918 = vector.broadcast %cst_242 : f32 to vector<16x64xf32>
    %919 = arith.mulf %918, %917 : vector<16x64xf32>
    %920 = math.tanh %919 : vector<16x64xf32>
    %cst_243 = arith.constant 1.000000e+00 : f32
    %921 = vector.broadcast %cst_243 : f32 to vector<16x64xf32>
    %922 = arith.addf %921, %920 : vector<16x64xf32>
    %923 = arith.mulf %912, %922 : vector<16x64xf32>
    %924 = arith.truncf %923 : vector<16x64xf32> to vector<16x64xbf16>
    %c3_244 = arith.constant 3 : index
    %c0_245 = arith.constant 0 : index
    %c0_246 = arith.constant 0 : index
    %925 = vector.load %arg8[%c3_244, %c0_245, %c0_246] : memref<4x64x32xbf16, #tpu.memory_space<vmem>>, vector<1x64x32xbf16>
    %926 = vector.shape_cast %925 : vector<1x64x32xbf16> to vector<64x32xbf16>
    %cst_247 = arith.constant dense<0.000000e+00> : vector<16x32xf32>
    %927 = tpu.matmul %924, %926, %cst_247 {dimension_numbers = #tpu.dot_dimension_numbers<[1], [0], [0], [1], [0, 0, 1, 1], [], []>} : vector<16x64xbf16>, vector<64x32xbf16>, vector<16x32xf32> -> vector<16x32xf32>
    %928 = vector.shape_cast %741 : vector<32xf32> to vector<1x32xf32>
    %929 = vector.broadcast %928 : vector<1x32xf32> to vector<16x32xf32>
    %930 = arith.addf %927, %929 : vector<16x32xf32>
    %931 = arith.addf %930, %903 : vector<16x32xf32>
    %cst_248 = arith.constant dense<0.000000e+00> : vector<16xf32>
    %932 = vector.multi_reduction <add>, %931, %cst_248 [1] : vector<16x32xf32> to vector<16xf32>
    %933 = vector.shape_cast %932 : vector<16xf32> to vector<16x1xf32>
    %cst_249 = arith.constant 3.200000e+01 : f32
    %934 = vector.broadcast %cst_249 : f32 to vector<16x1xf32>
    %935 = arith.divf %933, %934 : vector<16x1xf32>
    %936 = vector.broadcast %935 : vector<16x1xf32> to vector<16x32xf32>
    %937 = arith.subf %931, %936 : vector<16x32xf32>
    %938 = arith.mulf %937, %937 : vector<16x32xf32>
    %cst_250 = arith.constant dense<0.000000e+00> : vector<16xf32>
    %939 = vector.multi_reduction <add>, %938, %cst_250 [1] : vector<16x32xf32> to vector<16xf32>
    %940 = vector.shape_cast %939 : vector<16xf32> to vector<16x1xf32>
    %cst_251 = arith.constant 3.200000e+01 : f32
    %941 = vector.broadcast %cst_251 : f32 to vector<16x1xf32>
    %942 = arith.divf %940, %941 : vector<16x1xf32>
    %943 = vector.broadcast %935 : vector<16x1xf32> to vector<16x32xf32>
    %944 = arith.subf %931, %943 : vector<16x32xf32>
    %cst_252 = arith.constant 9.99999996E-13 : f32
    %945 = vector.broadcast %cst_252 : f32 to vector<16x1xf32>
    %946 = arith.addf %942, %945 : vector<16x1xf32>
    %947 = math.rsqrt %946 : vector<16x1xf32>
    %948 = vector.broadcast %947 : vector<16x1xf32> to vector<16x32xf32>
    %949 = arith.mulf %944, %948 : vector<16x32xf32>
    %950 = vector.shape_cast %743 : vector<32xf32> to vector<1x32xf32>
    %951 = vector.broadcast %950 : vector<1x32xf32> to vector<16x32xf32>
    %952 = arith.mulf %949, %951 : vector<16x32xf32>
    %953 = vector.shape_cast %745 : vector<32xf32> to vector<1x32xf32>
    %954 = vector.broadcast %953 : vector<1x32xf32> to vector<16x32xf32>
    %955 = arith.addf %952, %954 : vector<16x32xf32>
    %c0_253 = arith.constant 0 : index
    %c0_254 = arith.constant 0 : index
    %956 = vector.load %arg16[%c0_253, %c0_254] : memref<16x32xf32, #tpu.memory_space<vmem>>, vector<16x32xf32>
    tpu.vector_store %arg16[%c0_253, %c0_254], %955 {strides = array<i32>} : memref<16x32xf32, #tpu.memory_space<vmem>>, vector<16x32xf32>,
    %c0_255 = arith.constant 0 : index
    %c0_256 = arith.constant 0 : index
    %957 = tpu.strided_load %arg16[%c0_255, %c0_256] {strides = array<i32: 8, 1>} : memref<16x32xf32, #tpu.memory_space<vmem>>, vector<2x32xf32>
    %c3_257 = arith.constant 3 : index
    %958 = memref.load %arg10[%c3_257] : memref<4xf32, #tpu.memory_space<smem>>
    %959 = vector.broadcast %958 : f32 to vector<2x32xf32>
    %960 = arith.mulf %959, %957 : vector<2x32xf32>
    %961 = arith.addf %728, %960 : vector<2x32xf32>
    %c0_258 = arith.constant 0 : index
    %c0_259 = arith.constant 0 : index
    %962 = vector.load %arg11[%c0_258, %c0_259] : memref<1x32xf32, #tpu.memory_space<vmem>>, vector<1x32xf32>
    %c0_260 = arith.constant 0 : index
    %c0_261 = arith.constant 0 : index
    %963 = vector.load %arg12[%c0_260, %c0_261] : memref<1x32xf32, #tpu.memory_space<vmem>>, vector<1x32xf32>
    %cst_262 = arith.constant dense<0.000000e+00> : vector<2xf32>
    %964 = vector.multi_reduction <add>, %961, %cst_262 [1] : vector<2x32xf32> to vector<2xf32>
    %965 = vector.shape_cast %964 : vector<2xf32> to vector<2x1xf32>
    %cst_263 = arith.constant 3.200000e+01 : f32
    %966 = vector.broadcast %cst_263 : f32 to vector<2x1xf32>
    %967 = arith.divf %965, %966 : vector<2x1xf32>
    %968 = vector.broadcast %967 : vector<2x1xf32> to vector<2x32xf32>
    %969 = arith.subf %961, %968 : vector<2x32xf32>
    %970 = arith.mulf %969, %969 : vector<2x32xf32>
    %cst_264 = arith.constant dense<0.000000e+00> : vector<2xf32>
    %971 = vector.multi_reduction <add>, %970, %cst_264 [1] : vector<2x32xf32> to vector<2xf32>
    %972 = vector.shape_cast %971 : vector<2xf32> to vector<2x1xf32>
    %cst_265 = arith.constant 3.200000e+01 : f32
    %973 = vector.broadcast %cst_265 : f32 to vector<2x1xf32>
    %974 = arith.divf %972, %973 : vector<2x1xf32>
    %975 = vector.broadcast %967 : vector<2x1xf32> to vector<2x32xf32>
    %976 = arith.subf %961, %975 : vector<2x32xf32>
    %cst_266 = arith.constant 9.99999974E-6 : f32
    %977 = vector.broadcast %cst_266 : f32 to vector<2x1xf32>
    %978 = arith.addf %974, %977 : vector<2x1xf32>
    %979 = math.rsqrt %978 : vector<2x1xf32>
    %980 = vector.broadcast %979 : vector<2x1xf32> to vector<2x32xf32>
    %981 = arith.mulf %976, %980 : vector<2x32xf32>
    %982 = vector.broadcast %962 : vector<1x32xf32> to vector<2x32xf32>
    %983 = arith.mulf %981, %982 : vector<2x32xf32>
    %984 = vector.broadcast %963 : vector<1x32xf32> to vector<2x32xf32>
    %985 = arith.addf %983, %984 : vector<2x32xf32>
    %c0_267 = arith.constant 0 : index
    %c0_268 = arith.constant 0 : index
    %986 = vector.load %arg13[%c0_267, %c0_268] : memref<32x3xf32, #tpu.memory_space<vmem>>, vector<32x3xf32>
    %cst_269 = arith.constant dense<0.000000e+00> : vector<2x3xf32>
    %987 = tpu.matmul %985, %986, %cst_269 {dimension_numbers = #tpu.dot_dimension_numbers<[1], [0], [0], [1], [0, 0, 1, 1], [], []>} : vector<2x32xf32>, vector<32x3xf32>, vector<2x3xf32> -> vector<2x3xf32>
    %c0_270 = arith.constant 0 : index
    %c0_271 = arith.constant 0 : index
    %988 = vector.load %arg14[%c0_270, %c0_271] : memref<1x3xf32, #tpu.memory_space<vmem>>, vector<1x3xf32>
    %989 = vector.broadcast %988 : vector<1x3xf32> to vector<2x3xf32>
    %990 = arith.addf %987, %989 : vector<2x3xf32>
    %cst_272 = arith.constant dense<0xFF800000> : vector<2xf32>
    %991 = vector.multi_reduction <maximumf>, %990, %cst_272 [1] : vector<2x3xf32> to vector<2xf32>
    %992 = vector.shape_cast %991 : vector<2xf32> to vector<2x1xf32>
    %993 = vector.broadcast %992 : vector<2x1xf32> to vector<2x3xf32>
    %994 = arith.subf %990, %993 : vector<2x3xf32>
    %995 = math.exp %994 : vector<2x3xf32>
    %cst_273 = arith.constant dense<0.000000e+00> : vector<2xf32>
    %996 = vector.multi_reduction <add>, %995, %cst_273 [1] : vector<2x3xf32> to vector<2xf32>
    %997 = vector.shape_cast %996 : vector<2xf32> to vector<2x1xf32>
    %998 = vector.broadcast %997 : vector<2x1xf32> to vector<2x3xf32>
    %999 = arith.divf %995, %998 : vector<2x3xf32>
    %c0_274 = arith.constant 0 : index
    %c0_275 = arith.constant 0 : index
    %1000 = vector.load %arg15[%c0_274, %c0_275] : memref<2x3xf32, #tpu.memory_space<vmem>>, vector<2x3xf32>
    tpu.vector_store %arg15[%c0_274, %c0_275], %999 {strides = array<i32>} : memref<2x3xf32, #tpu.memory_space<vmem>>, vector<2x3xf32>,
    return
  }
  func.func @transform_0(%arg0: i32) -> (i32, i32) {
    %c0_i32 = arith.constant 0 : i32
    %c0_i32_0 = arith.constant 0 : i32
    %c0_i32_1 = arith.constant 0 : i32
    return %c0_i32, %c0_i32_0 : i32, i32
  }
  func.func @transform_1(%arg0: i32) -> (i32, i32) {
    %c0_i32 = arith.constant 0 : i32
    %c0_i32_0 = arith.constant 0 : i32
    %c0_i32_1 = arith.constant 0 : i32
    return %c0_i32, %c0_i32_0 : i32, i32
  }
  func.func @transform_2(%arg0: i32) -> (i32, i32) {
    %c0_i32 = arith.constant 0 : i32
    %c0_i32_0 = arith.constant 0 : i32
    %c0_i32_1 = arith.constant 0 : i32
    return %c0_i32, %c0_i32_0 : i32, i32
  }
  func.func @transform_3(%arg0: i32) -> (i32, i32) {
    %c0_i32 = arith.constant 0 : i32
    %c0_i32_0 = arith.constant 0 : i32
    %c0_i32_1 = arith.constant 0 : i32
    return %c0_i32, %c0_i32_0 : i32, i32
  }
  func.func @transform_4(%arg0: i32) -> (i32, i32, i32) {
    %c0_i32 = arith.constant 0 : i32
    %c0_i32_0 = arith.constant 0 : i32
    %c0_i32_1 = arith.constant 0 : i32
    %c0_i32_2 = arith.constant 0 : i32
    return %c0_i32, %c0_i32_0, %c0_i32_1 : i32, i32, i32
  }
  func.func @transform_5(%arg0: i32) -> (i32, i32, i32) {
    %c0_i32 = arith.constant 0 : i32
    %c0_i32_0 = arith.constant 0 : i32
    %c0_i32_1 = arith.constant 0 : i32
    %c0_i32_2 = arith.constant 0 : i32
    return %c0_i32, %c0_i32_0, %c0_i32_1 : i32, i32, i32
  }
  func.func @transform_6(%arg0: i32) -> (i32, i32, i32) {
    %c0_i32 = arith.constant 0 : i32
    %c0_i32_0 = arith.constant 0 : i32
    %c0_i32_1 = arith.constant 0 : i32
    %c0_i32_2 = arith.constant 0 : i32
    return %c0_i32, %c0_i32_0, %c0_i32_1 : i32, i32, i32
  }
  func.func @transform_7(%arg0: i32) -> (i32, i32, i32) {
    %c0_i32 = arith.constant 0 : i32
    %c0_i32_0 = arith.constant 0 : i32
    %c0_i32_1 = arith.constant 0 : i32
    %c0_i32_2 = arith.constant 0 : i32
    return %c0_i32, %c0_i32_0, %c0_i32_1 : i32, i32, i32
  }
  func.func @transform_8(%arg0: i32) -> (i32, i32, i32) {
    %c0_i32 = arith.constant 0 : i32
    %c0_i32_0 = arith.constant 0 : i32
    %c0_i32_1 = arith.constant 0 : i32
    %c0_i32_2 = arith.constant 0 : i32
    return %c0_i32, %c0_i32_0, %c0_i32_1 : i32, i32, i32
  }
  func.func @transform_9(%arg0: i32) -> i32 {
    %c0_i32 = arith.constant 0 : i32
    %c0_i32_0 = arith.constant 0 : i32
    return %c0_i32 : i32
  }
  func.func @transform_10(%arg0: i32) -> (i32, i32) {
    %c0_i32 = arith.constant 0 : i32
    %c0_i32_0 = arith.constant 0 : i32
    %c0_i32_1 = arith.constant 0 : i32
    return %c0_i32, %c0_i32_0 : i32, i32
  }
  func.func @transform_11(%arg0: i32) -> (i32, i32) {
    %c0_i32 = arith.constant 0 : i32
    %c0_i32_0 = arith.constant 0 : i32
    %c0_i32_1 = arith.constant 0 : i32
    return %c0_i32, %c0_i32_0 : i32, i32
  }
  func.func @transform_12(%arg0: i32) -> (i32, i32) {
    %c0_i32 = arith.constant 0 : i32
    %c0_i32_0 = arith.constant 0 : i32
    %c0_i32_1 = arith.constant 0 : i32
    return %c0_i32, %c0_i32_0 : i32, i32
  }
  func.func @transform_13(%arg0: i32) -> (i32, i32) {
    %c0_i32 = arith.constant 0 : i32
    %c0_i32_0 = arith.constant 0 : i32
    %c0_i32_1 = arith.constant 0 : i32
    return %c0_i32, %c0_i32_0 : i32, i32
  }
  func.func @transform_14(%arg0: i32) -> (i32, i32) {
    %c0_i32 = arith.constant 0 : i32
    %c0_i32_0 = arith.constant 0 : i32
    %c0_i32_1 = arith.constant 0 : i32
    return %c0_i32, %c0_i32_0 : i32, i32
  }
}

</mosaic_0001>

<bundles_post_ra>
// kernel: bert_classifier_forward.1
= control target key start
LH: loop header
LB: loop body
LE: loop exit
PB: predicated region body
PF: predicated region fallthrough
CT: control target
= control target key end

     0   :  { %19 = vsyncpa [#allocation5], 0  ;;  %s5545_s0 = inlined_call_operand.vmem [shape: f32[16,32], index: 0, kind: input, shape index: {}]   ;;  %s5546_s1 = inlined_call_operand.vmem [shape: f32[1,32], index: 1, kind: input, shape index: {}]   ;;  %s5547_s2 = inlined_call_operand.vmem [shape: f32[1,32], index: 2, kind: input, shape index: {}]   ;;  %s5548_s3 = inlined_call_operand.vmem [shape: f32[2,8], index: 3, kind: input, shape index: {}]   ;;  %s5549_s4 = inlined_call_operand.vmem [shape: bf16[4,32,96], index: 4, kind: input, shape index: {}]   ;;  %s5550_s5 = inlined_call_operand.vmem [shape: bf16[4,32,32], index: 5, kind: input, shape index: {}]   ;;  %s5551_s6 = inlined_call_operand.vmem [shape: bf16[4,32,64], index: 6, kind: input, shape index: {}]   ;;  %s5552_s7 = inlined_call_operand.vmem [shape: bf16[4,64,32], index: 7, kind: input, shape index: {}]   ;;  %s5553_s8 = inlined_call_operand.vmem [shape: f32[4,8,96], index: 8, kind: input, shape index: {}]   ;;  %s5554_s9 = inlined_call_operand.vmem [shape: f32[4], index: 9, kind: input, shape index: {}]   ;;  %s5555_s10 = inlined_call_operand.vmem [shape: f32[1,32], index: 10, kind: input, shape index: {}]   ;;  %s5556_s11 = inlined_call_operand.vmem [shape: f32[1,32], index: 11, kind: input, shape index: {}]   ;;  %s5557_s12 = inlined_call_operand.vmem [shape: f32[32,3], index: 12, kind: input, shape index: {}]   ;;  %s5558_s13 = inlined_call_operand.vmem [shape: f32[1,3], index: 13, kind: input, shape index: {}]   ;;  %s5559_s14 = inlined_call_operand.hbm [shape: f32[2,3], index: 14, kind: output, shape index: {}]  }
   0x1   :  { %20 = vsyncpa [#allocation4], 0  ;;  %s44_s15 = sshll.u32 %s5554_s9, 4  ;;  %s4506_s16 = smov [#allocation3]   ;;  %s45_s15 = int_to_ptr.vmem [resolvable:$true] %s44_s15 }
   0x2   :  { %47 = dma.vmem_to_smem %s45_s15, 16, %s4506_s16, [#allocation5]  }
   0x3   :  { %4502 = dma.done.wait [#allocation5], 16  }
   0x4   :  { %4503 = vsyncadd [#allocation5], 4294967280 }
   0x5   :  { %60 = sfence }
   0x6   :  { %v62_v0 = vld [vmem:[%s5545_s0] sm:$0xff]  ;;  %vm66_vm0 = vcmask 261120   ;;  %v63_v2 = vld [vmem:[%s5545_s0 + $0x8] sm:$0xff]  ;;  %v4507_v4 = vmov 32.0   ;;  %s4508_s27 = smov 96   ;;  %s4509_s28 = smov 88  }
   0x7   :  { %v67_v1 = vsel %vm66_vm0, %v62_v0, 0.0  ;;  %v70_v3 = vsel %vm66_vm0, %v63_v2, 0.0  ;;  %4274 = vrcp.f32 %v4507_v4  ;;  %v4224_v24 = vld [vmem:[%s5549_s4 + $0x8] sm:$0xff]  ;;  %v4223_v25 = vld [vmem:[%s5549_s4] sm:$0xff]  ;;  %s4510_s29 = smov 120   ;;  %s4511_s30 = smov 56  }
   0x8   :  { %68 = vadd.xlane.f32.xlu0 %v67_v1  ;;  %166 = vmatpush.bf16.msra.mxu0 %v4224_v24  ;;  %v4269_v37 = vld [vmem:[%s5546_s1] ss:$0 sm:$0xff]  ;;  %s4512_s15 = smov 80   ;;  %vm185_vm8 = vcmask 64512   ;;  %vm292_vm9 = vcmask 1043456   ;;  %s4513_s18 = smov 112  }
   0x9   :  { %v4270_v40 = vld [vmem:[%s5547_s2] ss:$0 sm:$0xff]  ;;  %s4515_s19 = smov 48   ;;  %s4516_s20 = smov 72  }
   0xa   :  { %v4638_v54 = vld [vmem:[%s5553_s8] sm:$0xff]  ;;  %s4517_s0 = smov 104   ;;  %s4518_s24 = smov 40  }
   0xb   :  { %v144_v55 = vperm.slane %v4638_v54, 0  ;;  %s4069_s21 = sld [smem:[#allocation3 + $0x1]]  ;;  %s3929_s25 = sshll.u32 %s5559_s14, 4  ;;  %s3930_s25 = int_to_ptr.hbm [resolvable:$true] %s3929_s25 }
   0xc   :  { %167 = vmatpush.bf16.msra.mxu0 %v4223_v25  ;;  %s4221_s22 = sld [smem:[#allocation3 + $0x3]] }
   0xd   :  { %v4275_v5 = vpop.eup %4274 }
   0xe   :  { %v74_v6 = vmul.f32 32.0, %v4275_v5  ;;  %vm78_vm1 = vweird.f32 %v4275_v5 }
  0x10   :  { %71 = vadd.xlane.f32.xlu0 %v70_v3  ;;  %v75_v7 = vsub.f32 1.0, %v74_v6 }
  0x12   :  { %v76_v8 = vmul.f32 %v4275_v5, %v75_v7 }
  0x14   :  { %v77_v9 = vadd.f32 %v4275_v5, %v76_v8 }
  0x16   :  { %v4606_v10 = vsel %vm78_vm1, %v4275_v5, %v77_v9 }
  0x7b   :  { %v69_v11 = vpop.xlane.xlu0 %68 }
  0x7c   :  { %v80_v12 = vmul.f32 %v4606_v10, %v69_v11 }
  0x7e   :  { %v82_v13 = vsub.f32 %v62_v0, %v80_v12 }
  0x80   :  { %v84_v14 = vmul.f32 %v82_v13, %v82_v13 }
  0x82   :  { %v86_v15 = vsel %vm66_vm0, %v84_v14, 0.0 }
  0x83   :  { %87 = vadd.xlane.f32.xlu1 %v86_v15  ;;  %v72_v16 = vpop.xlane.xlu0 %71 }
  0x84   :  { %v81_v17 = vmul.f32 %v4606_v10, %v72_v16 }
  0x86   :  { %v83_v18 = vsub.f32 %v63_v2, %v81_v17  ;;  %v130_v17 = vld [vmem:[%s5548_s3] sm:$0x3]  ;;  %s4514_s3 = smov 64  }
  0x88   :  { %v85_v19 = vmul.f32 %v83_v18, %v83_v18 }
  0x8a   :  { %v89_v20 = vsel %vm66_vm0, %v85_v19, 0.0 }
  0x8b   :  { %90 = vadd.xlane.f32.xlu1 %v89_v20 }
  0xf6   :  { %v88_v21 = vpop.xlane.xlu1 %87 }
  0xf7   :  { %v92_v22 = vmul.f32 %v88_v21, %v4606_v10 }
  0xf9   :  { %v94_v23 = vadd.f32 1e-12, %v92_v22 }
  0xfb   :  { %4276 = vrsqrt.f32 %v94_v23  ;;  %vm102_vm3 = vweird.f32 %v94_v23 }
  0xfe   :  { %v91_v26 = vpop.xlane.xlu1 %90 }
  0xff   :  { %v93_v27 = vmul.f32 %v91_v26, %v4606_v10 }
 0x101   :  { %v4277_v28 = vpop.eup %4276  ;;  %v95_v29 = vadd.f32 1e-12, %v93_v27 }
 0x102   :  { %v97_v30 = vmul.f32 %v4277_v28, %v94_v23  ;;  %vm103_vm2 = vweird.f32 %v4277_v28 }
 0x103   :  { %4278 = vrsqrt.f32 %v95_v29  ;;  %vm104_vm4 = vmor %vm102_vm3, %vm103_vm2  ;;  %vm112_vm6 = vweird.f32 %v95_v29 }
 0x104   :  { %v98_v31 = vmul.f32 %v4277_v28, %v97_v30 }
 0x106   :  { %v99_v32 = vmul.f32 0.5, %v98_v31 }
 0x108   :  { %v100_v33 = vsub.f32 1.5, %v99_v32 }
 0x109   :  { %v4279_v34 = vpop.eup %4278 }
 0x10a   :  { %v101_v35 = vmul.f32 %v4277_v28, %v100_v33  ;;  %v107_v36 = vmul.f32 %v4279_v34, %v95_v29  ;;  %vm113_vm5 = vweird.f32 %v4279_v34 }
 0x10b   :  { %vm114_vm7 = vmor %vm112_vm6, %vm113_vm5 }
 0x10c   :  { %v105_v38 = vsel %vm104_vm4, %v4277_v28, %v101_v35  ;;  %v108_v39 = vmul.f32 %v4279_v34, %v107_v36  ;;  %v132_v36 = vrot.slane %v130_v17, 1 }
 0x10d   :  { %v116_v41 = vmul.f32 %v105_v38, %v82_v13 }
 0x10e   :  { %v109_v42 = vmul.f32 0.5, %v108_v39 }
 0x10f   :  { %v121_v43 = vmul.f32 %v4269_v37, %v116_v41 }
 0x110   :  { %v110_v44 = vsub.f32 1.5, %v109_v42 }
 0x111   :  { %v126_v45 = vadd.f32 %v4270_v40, %v121_v43 }
 0x112   :  { %v111_v46 = vmul.f32 %v4279_v34, %v110_v44 }
 0x113   :  { %128 = vst.msk [vmem:[#allocation2] sm:$0xff] %vm66_vm0, %v126_v45 }
 0x114   :  { %v115_v47 = vsel %vm114_vm7, %v4279_v34, %v111_v46 }
 0x115   :  { %v117_v48 = vmul.f32 %v115_v47, %v83_v18  ;;  %v4674_v18 = vperm.slane %v130_v17, 0 }
 0x117   :  { %v122_v49 = vmul.f32 %v4269_v37, %v117_v48 }
 0x119   :  { %v127_v50 = vadd.f32 %v4270_v40, %v122_v49  ;;  %v4697_v40 = vperm.slane %v132_v36, 0 }
 0x11a   :  { %v4628_v51 = vld [vmem:[#allocation2] sm:$0xff] }
 0x11b   :  { %129 = vst.msk [vmem:[#allocation2 + $0x8] sm:$0xff] %vm66_vm0, %v127_v50 }
 0x122   :  { %v4630_v52 = vld [vmem:[#allocation2 + $0x8] sm:$0xff] }
 0x123   :  { %v139_v53 = vpack.c.bf16 %v4630_v52, %v4628_v51 }
 0x125   :  { %3947 = vmatmul.msk.bf16.vlgmr.msra.gmra.mxu0 %vm66_vm0, %v139_v53  ;;  %v175_v53 = vld [vmem:[%s5550_s5 + $0x4] sm:$0xf] }
 0x1a2   :  { %v169_v56 = vpop.f32.mrf.mxu0 }
 0x1a3   :  { %v170_v57 = vadd.f32 %v169_v56, %v144_v55 }
 0x1a5   :  { %v178_v58 = vpack.c.bf16 %v170_v57, %v170_v57 }
 0x1a7   :  { %v181_v59 = vunpack.c.l.b16 %v178_v58 }
 0x1a9   :  { %v4641_v60 = vpack.c.b16 %v181_v59, %v181_v59 }
 0x1aa   :  { %v171_v61 = vpop.f32.mrf.mxu0 }
 0x1ab   :  { %v172_v62 = vadd.f32 %v171_v61, %v144_v55  ;;  %183 = vrot.lane.b32.xlu0 %v4641_v60, %s4508_s27  ;;  %333 = vrot.lane.b32.xlu2 %v4641_v60, %s4509_s28  ;;  %v478_v55 = vsel %vm292_vm9, %v175_v53, 0 }
 0x1ad   :  { %v179_v63 = vpack.c.bf16 %v172_v62, %v172_v62 }
 0x1af   :  { %v206_v0 = vunpack.c.l.b16 %v179_v63 }
 0x1b1   :  { %v4647_v1 = vpack.c.b16 %v206_v0, %v206_v0 }
 0x1b3   :  { %208 = vrot.lane.b32.xlu1 %v4647_v1, %s4508_s27  ;;  %331 = vrot.lane.b32.xlu2 %v4641_v60, %s4510_s29 }
 0x1bb   :  { %431 = vrot.lane.b32.xlu1 %v4641_v60, %s4511_s30  ;;  %356 = vrot.lane.b32.xlu2 %v4647_v1, %s4509_s28 }
 0x1c3   :  { %516 = vrot.lane.b32.xlu1 %v4641_v60, %s4512_s15  ;;  %354 = vrot.lane.b32.xlu2 %v4647_v1, %s4510_s29 }
 0x205   :  { %v334_v2 = vpop.permute.xlu2 %333 }
 0x206   :  { %v339_v3 = vsel %vm185_vm8, %v334_v2, 0 }
 0x207   :  { %348 = vmatpush.bf16.xpose.msrb.mxu0 %v339_v3 }
 0x20d   :  { %v332_v4 = vpop.permute.xlu2 %331 }
 0x20e   :  { %3952 = vmatmul.msk.bf16.vlgmr.msrb.gmra.mxu0 %vm185_vm8, %v332_v4 }
 0x20f   :  { %487 = vmatpush.bf16.msra.mxu0 %v478_v55 }
 0x215   :  { %v357_v5 = vpop.permute.xlu2 %356 }
 0x216   :  { %v362_v8 = vsel %vm185_vm8, %v357_v5, 0 }
 0x21d   :  { %v184_v6 = vpop.permute.xlu0 %183  ;;  %v355_v14 = vpop.permute.xlu2 %354 }
 0x21e   :  { %v190_v7 = vsel %vm185_vm8, %v184_v6, 0 }
 0x21f   :  { %199 = vmatpush.bf16.xpose.msra.mxu1 %v190_v7 }
 0x225   :  { %v209_v9 = vpop.permute.xlu1 %208 }
 0x226   :  { %3948 = vmatmul.msk.bf16.vlgmr.msra.gmra.mxu1 %vm185_vm8, %v178_v58  ;;  %v214_v11 = vsel %vm185_vm8, %v209_v9, 0 }
 0x227   :  { %371 = vmatpush.bf16.xpose.msrb.mxu1 %v362_v8  ;;  %223 = vmatpush.bf16.xpose.msra.mxu2 %v214_v11 }
 0x22d   :  { %v432_v12 = vpop.permute.xlu1 %431 }
 0x22e   :  { %3949 = vmatmul.msk.bf16.vlgmr.msra.gmra.mxu2 %vm185_vm8, %v179_v63  ;;  %v437_v13 = vsel %vm292_vm9, %v432_v12, 0 }
 0x22f   :  { %446 = vmatpush.bf16.msrb.mxu2 %v437_v13 }
 0x235   :  { %v517_v15 = vpop.permute.xlu1 %516 }
 0x236   :  { %v522_v16 = vsel %vm185_vm8, %v517_v15, 0  ;;  %3953 = vmatmul.msk.bf16.vlgmr.msrb.gmra.mxu1 %vm185_vm8, %v355_v14 }
 0x237   :  { %531 = vmatpush.bf16.xpose.msra.mxu2 %v522_v16 }
 0x28b   :  { %v350_v19 = vpop.f32.mrf.mxu0 }
 0x28c   :  { %v377_v20 = vmul.f32 0.35355338, %v350_v19 }
 0x28e   :  { %v379_v21 = vadd.f32 %v377_v20, %v4674_v18 }
 0x290   :  { %v381_v22 = vsel %vm185_vm8, %v379_v21, -inf }
 0x291   :  { %382 = vmax.xlane.f32.xlu2 %v381_v22 }
 0x293   :  { %v352_v23 = vpop.f32.mrf.mxu0 }
 0x2a3   :  { %v201_v24 = vpop.f32.mrf.mxu1 }
 0x2a4   :  { %v229_v25 = vmul.f32 0.35355338, %v201_v24 }
 0x2a6   :  { %v235_v26 = vadd.f32 %v4674_v18, %v229_v25 }
 0x2a8   :  { %v237_v27 = vsel %vm185_vm8, %v235_v26, -inf }
 0x2a9   :  { %238 = vmax.xlane.f32.xlu1 %v237_v27  ;;  %514 = vrot.lane.b32.xlu2 %v4641_v60, %s4513_s18 }
 0x2ab   :  { %v203_v28 = vpop.f32.mrf.mxu1 }
 0x2b1   :  { %v225_v29 = vpop.f32.mrf.mxu2 }
 0x2b2   :  { %v230_v38 = vmul.f32 0.35355338, %v225_v29 }
 0x2b3   :  { %v373_v30 = vpop.f32.mrf.mxu1 }
 0x2b4   :  { %v236_v41 = vadd.f32 %v4697_v40, %v230_v38  ;;  %v378_v42 = vmul.f32 0.35355338, %v373_v30 }
 0x2b6   :  { %v240_v43 = vsel %vm185_vm8, %v236_v41, -inf  ;;  %v380_v45 = vadd.f32 %v378_v42, %v4697_v40 }
 0x2b8   :  { %v384_v48 = vsel %vm185_vm8, %v380_v45, -inf }
 0x2b9   :  { %v227_v31 = vpop.f32.mrf.mxu2 }
 0x2bb   :  { %v375_v32 = vpop.f32.mrf.mxu1 }
 0x2c2   :  { %287 = vrot.lane.b32.xlu1 %v4641_v60, %s4514_s3 }
 0x2ca   :  { %452 = vrot.lane.b32.xlu1 %v4647_v1, %s4511_s30 }
 0x2d2   :  { %537 = vrot.lane.b32.xlu1 %v4647_v1, %s4513_s18 }
 0x2da   :  { %614 = vrot.lane.b32.xlu1 %v4641_v60, %s4515_s19 }
 0x2e2   :  { %704 = vrot.lane.b32.xlu1 %v4647_v1, %s4516_s20 }
 0x2ea   :  { %679 = vrot.lane.b32.xlu1 %v4641_v60, %s4517_s0 }
 0x2f2   :  { %702 = vrot.lane.b32.xlu1 %v4647_v1, %s4517_s0 }
 0x304   :  { %v383_v33 = vpop.xlane.xlu2 %382 }
 0x305   :  { %v387_v34 = vsub.f32 %v379_v21, %v383_v33 }
 0x307   :  { %v389_v35 = vmul.f32 1.442695, %v387_v34 }
 0x309   :  { %4280 = vpow2.f32 %v389_v35 }
 0x30c   :  { %v515_v32 = vpop.permute.xlu2 %514 }
 0x30f   :  { %v4281_v37 = vpop.eup %4280 }
 0x310   :  { %v393_v39 = vsel %vm185_vm8, %v4281_v37, 0.0 }
 0x311   :  { %394 = vadd.xlane.f32.xlu0 %v393_v39 }
 0x319   :  { %241 = vmax.xlane.f32.xlu0 %v240_v43 }
 0x31c   :  { %v239_v44 = vpop.xlane.xlu1 %238 }
 0x31d   :  { %v243_v46 = vsub.f32 %v235_v26, %v239_v44 }
 0x31f   :  { %v245_v47 = vmul.f32 1.442695, %v243_v46 }
 0x321   :  { %4282 = vpow2.f32 %v245_v47  ;;  %385 = vmax.xlane.f32.xlu0 %v384_v48 }
 0x327   :  { %v4703_v49 = vpop.eup %4282 }
 0x328   :  { %v249_v50 = vsel %vm185_vm8, %v4703_v49, 0.0 }
 0x329   :  { %250 = vadd.xlane.f32.xlu0 %v249_v50 }
 0x334   :  { %v288_v56 = vpop.permute.xlu1 %287 }
 0x335   :  { %v294_v57 = vsel %vm292_vm9, %v288_v56, 0 }
 0x336   :  { %303 = vmatpush.bf16.msra.mxu3 %v294_v57 }
 0x33c   :  { %v453_v58 = vpop.permute.xlu1 %452 }
 0x33d   :  { %309 = vrot.lane.b32.xlu0 %v4647_v1, %s4514_s3  ;;  %v458_v42 = vsel %vm292_vm9, %v453_v58, 0 }
 0x344   :  { %v4714_v59 = vpop.permute.xlu1 %537 }
 0x34c   :  { %v615_v61 = vpop.permute.xlu1 %614 }
 0x34d   :  { %v620_v62 = vsel %vm292_vm9, %v615_v61, 0 }
 0x34e   :  { %629 = vmatpush.bf16.msrb.mxu0 %v620_v62 }
 0x384   :  { %v395_v63 = vpop.xlane.xlu0 %394 }
 0x385   :  { %4284 = vrcp.f32 %v395_v63  ;;  %v410_v6 = vand.u32 2147483648, %v395_v63  ;;  %v408_v9 = vand.u32 2147483647, %v395_v63  ;;  %vm404_vm11 = vweird.f32 %v395_v63 }
 0x387   :  { %v411_v12 = vor.u32 1.1754944e-38, %v410_v6  ;;  %vm409_vm13 = vcmp.eq.f32.partialorder %v408_v9, 8.507059e+37 }
 0x38b   :  { %v4285_v0 = vpop.eup %4284 }
 0x38c   :  { %v400_v2 = vmul.f32 %v4285_v0, %v395_v63  ;;  %v242_v3 = vpop.xlane.xlu0 %241  ;;  %vm405_vm10 = vweird.f32 %v4285_v0 }
 0x38d   :  { %v244_v4 = vsub.f32 %v236_v41, %v242_v3  ;;  %vm406_vm12 = vmor %vm404_vm11, %vm405_vm10 }
 0x38e   :  { %v401_v5 = vsub.f32 1.0, %v400_v2 }
 0x38f   :  { %v247_v7 = vmul.f32 1.442695, %v244_v4 }
 0x390   :  { %v402_v8 = vmul.f32 %v4285_v0, %v401_v5 }
 0x391   :  { %4286 = vpow2.f32 %v247_v7 }
 0x392   :  { %v403_v11 = vadd.f32 %v4285_v0, %v402_v8 }
 0x394   :  { %v386_v13 = vpop.xlane.xlu0 %385  ;;  %v407_v14 = vsel %vm406_vm12, %v4285_v0, %v403_v11 }
 0x395   :  { %v388_v15 = vsub.f32 %v380_v45, %v386_v13  ;;  %v412_v16 = vsel %vm409_vm13, %v411_v12, %v407_v14 }
 0x396   :  { %v413_v17 = vmul.f32 %v4281_v37, %v412_v16 }
 0x397   :  { %v4287_v19 = vpop.eup %4286  ;;  %v391_v20 = vmul.f32 1.442695, %v388_v15 }
 0x398   :  { %v252_v21 = vsel %vm185_vm8, %v4287_v19, 0.0  ;;  %v429_v22 = vpack.c.bf16 %v413_v17, %v413_v17 }
 0x399   :  { %4288 = vpow2.f32 %v391_v20  ;;  %253 = vadd.xlane.f32.xlu2 %v252_v21 }
 0x39a   :  { %3954 = vmatmul.msk.bf16.vlgmr.msrb.gmra.mxu2 %vm185_vm8, %v429_v22 }
 0x39c   :  { %v251_v23 = vpop.xlane.xlu0 %250 }
 0x39d   :  { %4290 = vrcp.f32 %v251_v23  ;;  %v266_v29 = vand.u32 2147483648, %v251_v23  ;;  %v264_v31 = vand.u32 2147483647, %v251_v23  ;;  %vm260_vm15 = vweird.f32 %v251_v23 }
 0x39f   :  { %v4719_v24 = vpop.eup %4288  ;;  %v267_v34 = vor.u32 1.1754944e-38, %v266_v29  ;;  %vm265_vm2 = vcmp.eq.f32.partialorder %v264_v31, 8.507059e+37 }
 0x3a0   :  { %v396_v25 = vsel %vm185_vm8, %v4719_v24, 0.0 }
 0x3a1   :  { %397 = vadd.xlane.f32.xlu0 %v396_v25 }
 0x3a3   :  { %v4291_v26 = vpop.eup %4290 }
 0x3a4   :  { %v256_v27 = vmul.f32 %v4291_v26, %v251_v23  ;;  %vm261_vm14 = vweird.f32 %v4291_v26 }
 0x3a5   :  { %vm262_vm1 = vmor %vm260_vm15, %vm261_vm14 }
 0x3a6   :  { %v257_v28 = vsub.f32 1.0, %v256_v27 }
 0x3a8   :  { %v258_v30 = vmul.f32 %v4291_v26, %v257_v28 }
 0x3aa   :  { %3958 = vmatmul.msk.bf16.vlgmr.msra.gmra.mxu2 %vm185_vm8, %v515_v32  ;;  %v259_v33 = vadd.f32 %v4291_v26, %v258_v30 }
 0x3ac   :  { %v263_v35 = vsel %vm262_vm1, %v4291_v26, %v259_v33  ;;  %v705_v33 = vpop.permute.xlu1 %704 }
 0x3ad   :  { %v268_v36 = vsel %vm265_vm2, %v267_v34, %v263_v35 }
 0x3ae   :  { %v269_v37 = vmul.f32 %v4703_v49, %v268_v36  ;;  %v710_v36 = vsel %vm185_vm8, %v705_v33, 0 }
 0x3af   :  { %v310_v38 = vpop.permute.xlu0 %309 }
 0x3b0   :  { %v315_v39 = vsel %vm292_vm9, %v310_v38, 0  ;;  %v285_v41 = vpack.c.bf16 %v269_v37, %v269_v37 }
 0x3b1   :  { %324 = vmatpush.bf16.msrb.mxu3 %v315_v39 }
 0x3b2   :  { %3950 = vmatmul.msk.bf16.vlgmr.msra.gmra.mxu3 %vm185_vm8, %v285_v41 }
 0x3b5   :  { %467 = vmatpush.bf16.msra.mxu3 %v458_v42  ;;  %539 = vrot.lane.b32.xlu0 %v4647_v1, %s4512_s15 }
 0x40c   :  { %v254_v43 = vpop.xlane.xlu2 %253 }
 0x40d   :  { %4292 = vrcp.f32 %v254_v43  ;;  %v281_v48 = vand.u32 2147483648, %v254_v43  ;;  %v279_v50 = vand.u32 2147483647, %v254_v43  ;;  %vm275_vm4 = vweird.f32 %v254_v43 }
 0x40f   :  { %v282_v56 = vor.u32 1.1754944e-38, %v281_v48  ;;  %vm280_vm6 = vcmp.eq.f32.partialorder %v279_v50, 8.507059e+37 }
 0x413   :  { %v4293_v44 = vpop.eup %4292 }
 0x414   :  { %v271_v45 = vmul.f32 %v4293_v44, %v254_v43  ;;  %v398_v46 = vpop.xlane.xlu0 %397  ;;  %vm276_vm3 = vweird.f32 %v4293_v44 }
 0x415   :  { %4294 = vrcp.f32 %v398_v46  ;;  %vm277_vm5 = vmor %vm275_vm4, %vm276_vm3  ;;  %v425_v5 = vand.u32 2147483648, %v398_v46  ;;  %vm419_vm10 = vweird.f32 %v398_v46  ;;  %v423_v6 = vand.u32 2147483647, %v398_v46 }
 0x416   :  { %v272_v47 = vsub.f32 1.0, %v271_v45 }
 0x417   :  { %v426_v9 = vor.u32 1.1754944e-38, %v425_v5  ;;  %vm424_vm12 = vcmp.eq.f32.partialorder %v423_v6, 8.507059e+37 }
 0x418   :  { %v273_v49 = vmul.f32 %v4293_v44, %v272_v47 }
 0x41a   :  { %v274_v53 = vadd.f32 %v4293_v44, %v273_v49 }
 0x41b   :  { %v4295_v55 = vpop.eup %4294 }
 0x41c   :  { %v415_v57 = vmul.f32 %v4295_v55, %v398_v46  ;;  %v278_v58 = vsel %vm277_vm5, %v4293_v44, %v274_v53  ;;  %vm420_vm7 = vweird.f32 %v4295_v55 }
 0x41d   :  { %v448_v61 = vpop.f32.mrf.mxu2  ;;  %v283_v62 = vsel %vm280_vm6, %v282_v56, %v278_v58  ;;  %vm421_vm11 = vmor %vm419_vm10, %vm420_vm7 }
 0x41e   :  { %v416_v63 = vsub.f32 1.0, %v415_v57  ;;  %v284_v0 = vmul.f32 %v4287_v19, %v283_v62 }
 0x420   :  { %v417_v2 = vmul.f32 %v4295_v55, %v416_v63  ;;  %v286_v3 = vpack.c.bf16 %v284_v0, %v284_v0  ;;  %v680_v0 = vpop.permute.xlu1 %679 }
 0x422   :  { %v418_v4 = vadd.f32 %v4295_v55, %v417_v2  ;;  %3951 = vmatmul.msk.bf16.vlgmr.msrb.gmra.mxu3 %vm185_vm8, %v286_v3 }
 0x424   :  { %v422_v8 = vsel %vm421_vm11, %v4295_v55, %v418_v4 }
 0x425   :  { %v450_v7 = vpop.f32.mrf.mxu2  ;;  %v427_v13 = vsel %vm424_vm12, %v426_v9, %v422_v8 }
 0x426   :  { %v428_v14 = vmul.f32 %v4719_v24, %v427_v13  ;;  %v174_v24 = vld [vmem:[%s5550_s5] sm:$0xf] }
 0x427   :  { %v540_v11 = vpop.permute.xlu0 %539  ;;  %v498_v25 = vsel %vm292_vm9, %v174_v24, 0 }
 0x428   :  { %v545_v12 = vsel %vm185_vm8, %v540_v11, 0  ;;  %v430_v17 = vpack.c.bf16 %v428_v14, %v428_v14  ;;  %507 = vmatpush.bf16.msra.mxu1 %v498_v25  ;;  %v703_v7 = vpop.permute.xlu1 %702 }
 0x429   :  { %554 = vmatpush.bf16.xpose.msrb.mxu3 %v545_v12 }
 0x42d   :  { %v533_v15 = vpop.f32.mrf.mxu2 }
 0x42e   :  { %v560_v16 = vmul.f32 0.35355338, %v533_v15 }
 0x430   :  { %v562_v19 = vadd.f32 %v560_v16, %v4674_v18 }
 0x432   :  { %3955 = vmatmul.msk.bf16.vlgmr.msra.gmra.mxu3 %vm185_vm8, %v430_v17  ;;  %v564_v20 = vsel %vm185_vm8, %v562_v19, -inf }
 0x433   :  { %565 = vmax.xlane.f32.xlu0 %v564_v20 }
 0x435   :  { %v305_v21 = vpop.f32.mrf.mxu3  ;;  %v535_v22 = vpop.f32.mrf.mxu2 }
 0x43d   :  { %v307_v23 = vpop.f32.mrf.mxu3 }
 0x442   :  { %3959 = vmatmul.msk.bf16.vlgmr.msrb.gmra.mxu3 %vm185_vm8, %v4714_v59 }
 0x447   :  { %635 = vrot.lane.b32.xlu0 %v4647_v1, %s4515_s19 }
 0x4a5   :  { %v326_v26 = vpop.f32.mrf.mxu3 }
 0x4a6   :  { %v330_v27 = vpack.c.bf16 %v326_v26, %v305_v21  ;;  %v566_v28 = vpop.xlane.xlu0 %565 }
 0x4a7   :  { %v570_v29 = vsub.f32 %v562_v19, %v566_v28 }
 0x4a8   :  { %3957 = vmatmul.msk.bf16.vlgmr.msra.gmra.mxu1 %vm185_vm8, %v330_v27 }
 0x4a9   :  { %v572_v30 = vmul.f32 1.442695, %v570_v29 }
 0x4ab   :  { %4296 = vpow2.f32 %v572_v30 }
 0x4ad   :  { %v328_v31 = vpop.f32.mrf.mxu3 }
 0x4b1   :  { %v4297_v59 = vpop.eup %4296 }
 0x4b2   :  { %v576_v32 = vsel %vm185_vm8, %v4297_v59, 0.0 }
 0x4b3   :  { %577 = vadd.xlane.f32.xlu2 %v576_v32 }
 0x4b5   :  { %v469_v34 = vpop.f32.mrf.mxu3 }
 0x4b6   :  { %v473_v35 = vpack.c.bf16 %v469_v34, %v448_v61 }
 0x4b8   :  { %3956 = vmatmul.msk.bf16.vlgmr.msra.gmra.mxu0 %vm185_vm8, %v473_v35 }
 0x4b9   :  { %719 = vmatpush.bf16.xpose.msra.mxu0 %v710_v36  ;;  %v636_v37 = vpop.permute.xlu0 %635 }
 0x4ba   :  { %v641_v38 = vsel %vm292_vm9, %v636_v37, 0 }
 0x4bb   :  { %650 = vmatpush.bf16.msrb.mxu1 %v641_v38 }
 0x4bd   :  { %v471_v39 = vpop.f32.mrf.mxu3 }
 0x4c5   :  { %v556_v41 = vpop.f32.mrf.mxu3 }
 0x4c6   :  { %v561_v43 = vmul.f32 0.35355338, %v556_v41 }
 0x4c8   :  { %v563_v44 = vadd.f32 %v561_v43, %v4697_v40 }
 0x4ca   :  { %v567_v45 = vsel %vm185_vm8, %v563_v44, -inf }
 0x4cb   :  { %681 = vrot.lane.b32.xlu2 %v4641_v60, %s4516_s20 }
 0x4cd   :  { %v558_v42 = vpop.f32.mrf.mxu3 }
 0x4f4   :  { %568 = vmax.xlane.f32.xlu2 %v567_v45 }
 0x525   :  { %v509_v61 = vpop.f32.mrf.mxu1 }
 0x526   :  { %v578_v46 = vpop.xlane.xlu2 %577 }
 0x527   :  { %4298 = vrcp.f32 %v578_v46  ;;  %v593_v55 = vand.u32 2147483648, %v578_v46  ;;  %v591_v57 = vand.u32 2147483647, %v578_v46  ;;  %vm587_vm14 = vweird.f32 %v578_v46 }
 0x529   :  { %v594_v62 = vor.u32 1.1754944e-38, %v593_v55  ;;  %vm592_vm1 = vcmp.eq.f32.partialorder %v591_v57, 8.507059e+37 }
 0x52d   :  { %v4299_v47 = vpop.eup %4298 }
 0x52e   :  { %v583_v48 = vmul.f32 %v4299_v47, %v578_v46  ;;  %v682_v49 = vpop.permute.xlu2 %681  ;;  %vm588_vm13 = vweird.f32 %v4299_v47 }
 0x52f   :  { %v687_v50 = vsel %vm185_vm8, %v682_v49, 0  ;;  %vm589_vm15 = vmor %vm587_vm14, %vm588_vm13 }
 0x530   :  { %v584_v53 = vsub.f32 1.0, %v583_v48  ;;  %696 = vmatpush.bf16.xpose.msra.mxu3 %v687_v50 }
 0x532   :  { %v585_v56 = vmul.f32 %v4299_v47, %v584_v53  ;;  %v176_v53 = vld [vmem:[%s5550_s5 + $0x8] sm:$0xf] }
 0x533   :  { %v661_v55 = vsel %vm292_vm9, %v176_v53, 0 }
 0x534   :  { %v586_v58 = vadd.f32 %v4299_v47, %v585_v56  ;;  %670 = vmatpush.bf16.msrb.mxu2 %v661_v55  ;;  %v4777_v56 = vpop.f32.mrf.mxu1 }
 0x535   :  { %v489_v63 = vpop.f32.mrf.mxu0 }
 0x536   :  { %v590_v2 = vsel %vm589_vm15, %v4299_v47, %v586_v58  ;;  %v4754_v3 = vadd.f32 %v509_v61, %v489_v63 }
 0x537   :  { %3963 = vmatmul.msk.bf16.vlgmr.msra.gmra.mxu3 %vm185_vm8, %v680_v0  ;;  %v595_v4 = vsel %vm592_vm1, %v594_v62, %v590_v2 }
 0x538   :  { %v596_v5 = vmul.f32 %v4297_v59, %v595_v4 }
 0x53a   :  { %v612_v6 = vpack.c.bf16 %v596_v5, %v596_v5 }
 0x53c   :  { %3960 = vmatmul.msk.bf16.vlgmr.msrb.gmra.mxu0 %vm185_vm8, %v612_v6 }
 0x53d   :  { %v4760_v14 = vpop.f32.mrf.mxu0 }
 0x54c   :  { %3964 = vmatmul.msk.bf16.vlgmr.msra.gmra.mxu0 %vm185_vm8, %v703_v7 }
 0x567   :  { %v569_v8 = vpop.xlane.xlu2 %568 }
 0x568   :  { %v571_v9 = vsub.f32 %v563_v44, %v569_v8 }
 0x56a   :  { %v574_v11 = vmul.f32 1.442695, %v571_v9 }
 0x56c   :  { %4300 = vpow2.f32 %v574_v11 }
 0x572   :  { %v4301_v12 = vpop.eup %4300 }
 0x573   :  { %v579_v13 = vsel %vm185_vm8, %v4301_v12, 0.0 }
 0x574   :  { %580 = vadd.xlane.f32.xlu1 %v579_v13 }
 0x5b9   :  { %v631_v15 = vpop.f32.mrf.mxu0 }
 0x5ba   :  { %v698_v16 = vpop.f32.mrf.mxu3 }
 0x5bb   :  { %v725_v17 = vmul.f32 0.35355338, %v698_v16 }
 0x5bd   :  { %v727_v19 = vadd.f32 %v725_v17, %v4674_v18 }
 0x5bf   :  { %v729_v20 = vsel %vm185_vm8, %v727_v19, -inf }
 0x5c0   :  { %730 = vmax.xlane.f32.xlu2 %v729_v20 }
 0x5c1   :  { %v633_v21 = vpop.f32.mrf.mxu0 }
 0x5c2   :  { %v700_v22 = vpop.f32.mrf.mxu3 }
 0x5c9   :  { %v721_v23 = vpop.f32.mrf.mxu0 }
 0x5ca   :  { %v726_v24 = vmul.f32 0.35355338, %v721_v23 }
 0x5cc   :  { %v728_v25 = vadd.f32 %v726_v24, %v4697_v40 }
 0x5ce   :  { %v732_v26 = vsel %vm185_vm8, %v728_v25, -inf }
 0x5cf   :  { %733 = vmax.xlane.f32.xlu0 %v732_v26 }
 0x5d1   :  { %v723_v27 = vpop.f32.mrf.mxu0 }
 0x5e7   :  { %v581_v28 = vpop.xlane.xlu1 %580 }
 0x5e8   :  { %4302 = vrcp.f32 %v581_v28  ;;  %v608_v59 = vand.u32 2147483648, %v581_v28  ;;  %v606_v33 = vand.u32 2147483647, %v581_v28  ;;  %vm602_vm3 = vweird.f32 %v581_v28 }
 0x5ea   :  { %v609_v35 = vor.u32 1.1754944e-38, %v608_v59  ;;  %vm607_vm5 = vcmp.eq.f32.partialorder %v606_v33, 8.507059e+37 }
 0x5ee   :  { %v4303_v29 = vpop.eup %4302 }
 0x5ef   :  { %v598_v30 = vmul.f32 %v4303_v29, %v581_v28  ;;  %vm603_vm2 = vweird.f32 %v4303_v29 }
 0x5f0   :  { %vm604_vm4 = vmor %vm602_vm3, %vm603_vm2 }
 0x5f1   :  { %v599_v31 = vsub.f32 1.0, %v598_v30 }
 0x5f3   :  { %v600_v32 = vmul.f32 %v4303_v29, %v599_v31 }
 0x5f5   :  { %v601_v34 = vadd.f32 %v4303_v29, %v600_v32  ;;  %v177_v32 = vld [vmem:[%s5550_s5 + $0xc] sm:$0xf] }
 0x5f6   :  { %v826_v33 = vsel %vm292_vm9, %v177_v32, 0 }
 0x5f7   :  { %v605_v36 = vsel %vm604_vm4, %v4303_v29, %v601_v34  ;;  %835 = vmatpush.bf16.msrb.mxu3 %v826_v33 }
 0x5f8   :  { %v610_v37 = vsel %vm607_vm5, %v609_v35, %v605_v36 }
 0x5f9   :  { %v611_v38 = vmul.f32 %v4301_v12, %v610_v37 }
 0x5fb   :  { %v613_v39 = vpack.c.bf16 %v611_v38, %v611_v38 }
 0x5fd   :  { %3961 = vmatmul.msk.bf16.vlgmr.msrb.gmra.mxu1 %vm185_vm8, %v613_v39 }
 0x633   :  { %v731_v41 = vpop.xlane.xlu2 %730 }
 0x634   :  { %v735_v42 = vsub.f32 %v727_v19, %v731_v41  ;;  %v844_v41 = vperm.slane %v4638_v54, 1 }
 0x636   :  { %v737_v43 = vmul.f32 1.442695, %v735_v42 }
 0x638   :  { %4304 = vpow2.f32 %v737_v43 }
 0x63e   :  { %v4305_v44 = vpop.eup %4304 }
 0x63f   :  { %v741_v45 = vsel %vm185_vm8, %v4305_v44, 0.0 }
 0x640   :  { %742 = vadd.xlane.f32.xlu2 %v741_v45 }
 0x642   :  { %v734_v46 = vpop.xlane.xlu0 %733 }
 0x643   :  { %v736_v47 = vsub.f32 %v728_v25, %v734_v46 }
 0x645   :  { %v739_v48 = vmul.f32 1.442695, %v736_v47 }
 0x647   :  { %4306 = vpow2.f32 %v739_v48 }
 0x64d   :  { %v4307_v49 = vpop.eup %4306 }
 0x64e   :  { %v744_v50 = vsel %vm185_vm8, %v4307_v49, 0.0 }
 0x64f   :  { %745 = vadd.xlane.f32.xlu1 %v744_v50 }
 0x658   :  { %779 = vrot.lane.b32.xlu2 %v4641_v60, %s4518_s24 }
 0x668   :  { %800 = vrot.lane.b32.xlu1 %v4647_v1, %s4518_s24 }
 0x67a   :  { %v652_v57 = vpop.f32.mrf.mxu1 }
 0x67b   :  { %v656_v58 = vpack.c.bf16 %v652_v57, %v631_v15 }
 0x67d   :  { %3962 = vmatmul.msk.bf16.vlgmr.msrb.gmra.mxu2 %vm185_vm8, %v656_v58 }
 0x682   :  { %v654_v61 = vpop.f32.mrf.mxu1 }
 0x6b3   :  { %v743_v62 = vpop.xlane.xlu2 %742 }
 0x6b4   :  { %4308 = vrcp.f32 %v743_v62  ;;  %v758_v5 = vand.u32 2147483648, %v743_v62  ;;  %v756_v1 = vand.u32 2147483647, %v743_v62  ;;  %vm752_vm7 = vweird.f32 %v743_v62 }
 0x6b6   :  { %v759_v8 = vor.u32 1.1754944e-38, %v758_v5  ;;  %vm757_vm11 = vcmp.eq.f32.partialorder %v756_v1, 8.507059e+37 }
 0x6ba   :  { %v4309_v60 = vpop.eup %4308 }
 0x6bb   :  { %v748_v63 = vmul.f32 %v4309_v60, %v743_v62  ;;  %v780_v0 = vpop.permute.xlu2 %779  ;;  %vm753_vm6 = vweird.f32 %v4309_v60 }
 0x6bc   :  { %v785_v2 = vsel %vm292_vm9, %v780_v0, 0  ;;  %vm754_vm10 = vmor %vm752_vm7, %vm753_vm6  ;;  %vm986_vm7 = vcmask 523264  }
 0x6bd   :  { %v749_v4 = vsub.f32 1.0, %v748_v63  ;;  %794 = vmatpush.bf16.msra.mxu1 %v785_v2 }
 0x6bf   :  { %v750_v6 = vmul.f32 %v4309_v60, %v749_v4 }
 0x6c1   :  { %v751_v7 = vadd.f32 %v4309_v60, %v750_v6  ;;  %v4225_v6 = vld [vmem:[%s5551_s6] sm:$0xff] }
 0x6c2   :  { %v746_v9 = vpop.xlane.xlu1 %745 }
 0x6c3   :  { %v755_v11 = vsel %vm754_vm10, %v4309_v60, %v751_v7  ;;  %4310 = vrcp.f32 %v746_v9  ;;  %v773_v22 = vand.u32 2147483648, %v746_v9  ;;  %vm767_vm13 = vweird.f32 %v746_v9 }
 0x6c4   :  { %v760_v12 = vsel %vm757_vm11, %v759_v8, %v755_v11  ;;  %v771_v23 = vand.u32 2147483647, %v746_v9 }
 0x6c5   :  { %v761_v13 = vmul.f32 %v4305_v44, %v760_v12  ;;  %v774_v25 = vor.u32 1.1754944e-38, %v773_v22  ;;  %v512_v44 = vadd.f32 %v4777_v56, %v4760_v14 }
 0x6c6   :  { %vm772_vm15 = vcmp.eq.f32.partialorder %v771_v23, 8.507059e+37 }
 0x6c7   :  { %v777_v15 = vpack.c.bf16 %v761_v13, %v761_v13 }
 0x6c9   :  { %v4311_v16 = vpop.eup %4310  ;;  %3965 = vmatmul.msk.bf16.vlgmr.msra.gmra.mxu1 %vm185_vm8, %v777_v15 }
 0x6ca   :  { %v763_v17 = vmul.f32 %v4311_v16, %v746_v9  ;;  %vm768_vm12 = vweird.f32 %v4311_v16 }
 0x6cb   :  { %vm769_vm14 = vmor %vm767_vm13, %vm768_vm12 }
 0x6cc   :  { %v764_v19 = vsub.f32 1.0, %v763_v17 }
 0x6ce   :  { %v765_v20 = vmul.f32 %v4311_v16, %v764_v19 }
 0x6d0   :  { %v766_v21 = vadd.f32 %v4311_v16, %v765_v20 }
 0x6d2   :  { %v770_v24 = vsel %vm769_vm14, %v4311_v16, %v766_v21 }
 0x6d3   :  { %v775_v26 = vsel %vm772_vm15, %v774_v25, %v770_v24  ;;  %v893_v24 = vperm.slane %v4638_v54, 2 }
 0x6d4   :  { %v776_v27 = vmul.f32 %v4307_v49, %v775_v26 }
 0x6d6   :  { %v778_v30 = vpack.c.bf16 %v776_v27, %v776_v27 }
 0x6da   :  { %v801_v28 = vpop.permute.xlu1 %800 }
 0x6db   :  { %v806_v29 = vsel %vm292_vm9, %v801_v28, 0 }
 0x6dc   :  { %815 = vmatpush.bf16.msra.mxu2 %v806_v29  ;;  %v896_v29 = vperm.slane %v4638_v54, 3 }
 0x6df   :  { %3966 = vmatmul.msk.bf16.vlgmr.msra.gmra.mxu2 %vm185_vm8, %v778_v30 }
 0x700   :  { %v672_v31 = vpop.f32.mrf.mxu2 }
 0x701   :  { %v677_v59 = vadd.f32 %v672_v31, %v4754_v3 }
 0x708   :  { %v674_v36 = vpop.f32.mrf.mxu2 }
 0x709   :  { %v678_v46 = vadd.f32 %v674_v36, %v512_v44  ;;  %v4228_v36 = vld [vmem:[%s5552_s7 + $0x8] sm:$0xff] }
 0x746   :  { %v796_v34 = vpop.f32.mrf.mxu1 }
 0x74e   :  { %v798_v35 = vpop.f32.mrf.mxu1 }
 0x74f   :  { %v4229_v35 = vld [vmem:[%s5552_s7 + $0x10] sm:$0xff] }
 0x762   :  { %v817_v37 = vpop.f32.mrf.mxu2 }
 0x763   :  { %v821_v38 = vpack.c.bf16 %v817_v37, %v796_v34  ;;  %v4230_v34 = vld [vmem:[%s5552_s7 + $0x18] sm:$0xff]  ;;  %v4227_v37 = vld [vmem:[%s5552_s7] sm:$0xff] }
 0x764   :  { %994 = vmatpush.bf16.msrb.mxu1 %v4230_v34 }
 0x765   :  { %3967 = vmatmul.msk.bf16.vlgmr.msrb.gmra.mxu3 %vm185_vm8, %v821_v38  ;;  %v904_v38 = vperm.slane %v4638_v54, 4 }
 0x768   :  { %995 = vmatpush.bf16.msrb.mxu1 %v4229_v35 }
 0x76a   :  { %v819_v39 = vpop.f32.mrf.mxu2 }
 0x76c   :  { %996 = vmatpush.bf16.msrb.mxu1 %v4228_v36 }
 0x770   :  { %997 = vmatpush.bf16.msrb.mxu1 %v4227_v37 }
 0x7e8   :  { %v837_v42 = vpop.f32.mrf.mxu3 }
 0x7e9   :  { %v842_v43 = vadd.f32 %v837_v42, %v677_v59 }
 0x7eb   :  { %v845_v3 = vadd.f32 %v844_v41, %v842_v43 }
 0x7ed   :  { %v847_v45 = vadd.f32 %v845_v3, %v4628_v51 }
 0x7ef   :  { %v849_v47 = vsel %vm66_vm0, %v847_v45, 0.0 }
 0x7f0   :  { %850 = vadd.xlane.f32.xlu0 %v849_v47  ;;  %v839_v48 = vpop.f32.mrf.mxu3 }
 0x7f1   :  { %v843_v49 = vadd.f32 %v839_v48, %v678_v46 }
 0x7f3   :  { %v846_v50 = vadd.f32 %v844_v41, %v843_v49 }
 0x7f5   :  { %v848_v53 = vadd.f32 %v846_v50, %v4630_v52  ;;  %v4226_v52 = vld [vmem:[%s5551_s6 + $0x8] sm:$0xff] }
 0x7f6   :  { %926 = vmatpush.bf16.msrb.mxu0 %v4226_v52 }
 0x7f7   :  { %v852_v55 = vsel %vm66_vm0, %v848_v53, 0.0 }
 0x7f8   :  { %853 = vadd.xlane.f32.xlu1 %v852_v55 }
 0x7fa   :  { %927 = vmatpush.bf16.msrb.mxu0 %v4225_v6 }
 0x863   :  { %v851_v57 = vpop.xlane.xlu0 %850 }
 0x864   :  { %v855_v58 = vmul.f32 %v851_v57, %v4606_v10 }
 0x866   :  { %v857_v61 = vsub.f32 %v847_v45, %v855_v58 }
 0x868   :  { %v859_v62 = vmul.f32 %v857_v61, %v857_v61 }
 0x86a   :  { %v861_v14 = vsel %vm66_vm0, %v859_v62, 0.0 }
 0x86b   :  { %862 = vadd.xlane.f32.xlu0 %v861_v14  ;;  %v854_v51 = vpop.xlane.xlu1 %853 }
 0x86c   :  { %v856_v56 = vmul.f32 %v854_v51, %v4606_v10 }
 0x86e   :  { %v858_v60 = vsub.f32 %v848_v53, %v856_v56 }
 0x870   :  { %v860_v63 = vmul.f32 %v858_v60, %v858_v60 }
 0x872   :  { %v864_v0 = vsel %vm66_vm0, %v860_v63, 0.0  ;;  %v4829_v63 = vld [vmem:[%s5553_s8] sm:$0xff] }
 0x873   :  { %865 = vadd.xlane.f32.xlu2 %v864_v0  ;;  %v961_v0 = vperm.slane %v4829_v63, 5  ;;  %v1050_v37 = vperm.slane %v4829_v63, 6 }
 0x8de   :  { %v863_v2 = vpop.xlane.xlu0 %862 }
 0x8df   :  { %v867_v4 = vmul.f32 %v863_v2, %v4606_v10 }
 0x8e1   :  { %v869_v5 = vadd.f32 1e-12, %v867_v4 }
 0x8e3   :  { %4312 = vrsqrt.f32 %v869_v5  ;;  %vm877_vm2 = vweird.f32 %v869_v5 }
 0x8e6   :  { %v866_v1 = vpop.xlane.xlu2 %865 }
 0x8e7   :  { %v868_v7 = vmul.f32 %v866_v1, %v4606_v10 }
 0x8e9   :  { %v4313_v8 = vpop.eup %4312  ;;  %v870_v9 = vadd.f32 1e-12, %v868_v7 }
 0x8ea   :  { %v872_v11 = vmul.f32 %v4313_v8, %v869_v5  ;;  %vm878_vm1 = vweird.f32 %v4313_v8 }
 0x8eb   :  { %4314 = vrsqrt.f32 %v870_v9  ;;  %vm879_vm3 = vmor %vm877_vm2, %vm878_vm1  ;;  %vm887_vm5 = vweird.f32 %v870_v9 }
 0x8ec   :  { %v873_v12 = vmul.f32 %v4313_v8, %v872_v11 }
 0x8ee   :  { %v874_v13 = vmul.f32 0.5, %v873_v12 }
 0x8f0   :  { %v875_v15 = vsub.f32 1.5, %v874_v13 }
 0x8f1   :  { %v4315_v16 = vpop.eup %4314 }
 0x8f2   :  { %v876_v17 = vmul.f32 %v4313_v8, %v875_v15  ;;  %v882_v19 = vmul.f32 %v4315_v16, %v870_v9  ;;  %vm888_vm4 = vweird.f32 %v4315_v16 }
 0x8f3   :  { %vm889_vm6 = vmor %vm887_vm5, %vm888_vm4 }
 0x8f4   :  { %v883_v20 = vmul.f32 %v4315_v16, %v882_v19  ;;  %v880_v21 = vsel %vm879_vm3, %v4313_v8, %v876_v17 }
 0x8f5   :  { %v891_v25 = vmul.f32 %v880_v21, %v857_v61 }
 0x8f6   :  { %v884_v22 = vmul.f32 0.5, %v883_v20 }
 0x8f7   :  { %v894_v28 = vmul.f32 %v893_v24, %v891_v25  ;;  %v4232_v25 = vld [vmem:[%s5549_s4 + $0x18] sm:$0xff] }
 0x8f8   :  { %v885_v23 = vsub.f32 1.5, %v884_v22  ;;  %1093 = vmatpush.bf16.msrb.mxu2 %v4232_v25 }
 0x8f9   :  { %v897_v32 = vadd.f32 %v896_v29, %v894_v28 }
 0x8fa   :  { %v886_v26 = vmul.f32 %v4315_v16, %v885_v23 }
 0x8fc   :  { %v890_v27 = vsel %vm889_vm6, %v4315_v16, %v886_v26  ;;  %v4231_v26 = vld [vmem:[%s5549_s4 + $0x10] sm:$0xff] }
 0x8fd   :  { %v892_v30 = vmul.f32 %v890_v27, %v858_v60  ;;  %1094 = vmatpush.bf16.msrb.mxu2 %v4231_v26 }
 0x8ff   :  { %v895_v31 = vmul.f32 %v893_v24, %v892_v30 }
 0x901   :  { %v898_v59 = vadd.f32 %v896_v29, %v895_v31 }
 0x903   :  { %v899_v33 = vpack.c.bf16 %v898_v59, %v897_v32 }
 0x905   :  { %3976 = vmatmul.msk.bf16.vlgmr.msrb.gmra.mxu0 %vm66_vm0, %v899_v33 }
 0x982   :  { %v929_v39 = vpop.f32.mrf.mxu0 }
 0x983   :  { %v930_v41 = vadd.f32 %v929_v39, %v904_v38 }
 0x985   :  { %v936_v42 = vmul.f32 0.044715, %v930_v41  ;;  %v934_v61 = vmul.f32 0.5, %v930_v41 }
 0x987   :  { %v938_v43 = vmul.f32 %v936_v42, %v930_v41 }
 0x989   :  { %v940_v3 = vmul.f32 %v938_v43, %v930_v41 }
 0x98a   :  { %v931_v44 = vpop.f32.mrf.mxu0 }
 0x98b   :  { %v942_v45 = vadd.f32 %v940_v3, %v930_v41  ;;  %v932_v46 = vadd.f32 %v931_v44, %v904_v38  ;;  %v1053_v41 = vperm.slane %v4829_v63, 7 }
 0x98d   :  { %v937_v47 = vmul.f32 0.044715, %v932_v46  ;;  %v944_v48 = vmul.f32 0.7978846, %v942_v45  ;;  %v935_v62 = vmul.f32 0.5, %v932_v46 }
 0x98f   :  { %v939_v49 = vmul.f32 %v937_v47, %v932_v46  ;;  %4316 = vtanh.f32 %v944_v48 }
 0x991   :  { %v941_v50 = vmul.f32 %v939_v49, %v932_v46 }
 0x993   :  { %v943_v53 = vadd.f32 %v941_v50, %v932_v46 }
 0x995   :  { %v945_v55 = vmul.f32 0.7978846, %v943_v53  ;;  %v4317_v57 = vpop.eup %4316 }
 0x996   :  { %v948_v58 = vadd.f32 1.0, %v4317_v57 }
 0x997   :  { %4318 = vtanh.f32 %v945_v55 }
 0x998   :  { %v950_v51 = vmul.f32 %v948_v58, %v934_v61  ;;  %v4860_v58 = vld [vmem:[%s5553_s8 + $0x8] sm:$0xff] }
 0x99d   :  { %v4319_v54 = vpop.eup %4318 }
 0x99e   :  { %v949_v14 = vadd.f32 1.0, %v4319_v54  ;;  %v1071_v54 = vperm.slane %v4860_v58, 0 }
 0x9a0   :  { %v951_v56 = vmul.f32 %v949_v14, %v935_v62 }
 0x9a2   :  { %v952_v60 = vpack.c.bf16 %v951_v56, %v950_v51 }
 0x9a4   :  { %3993 = vmatmul.msk.bf16.vlgmr.msrb.gmra.mxu1 %vm986_vm7, %v952_v60 }
 0xa21   :  { %v999_v52 = vpop.f32.mrf.mxu1 }
 0xa22   :  { %v1000_v2 = vadd.f32 %v999_v52, %v961_v0 }
 0xa24   :  { %v1004_v4 = vadd.f32 %v1000_v2, %v897_v32 }
 0xa26   :  { %v1006_v5 = vsel %vm66_vm0, %v1004_v4, 0.0 }
 0xa27   :  { %1007 = vadd.xlane.f32.xlu0 %v1006_v5 }
 0xa29   :  { %v1001_v6 = vpop.f32.mrf.mxu1 }
 0xa2a   :  { %v1002_v1 = vadd.f32 %v1001_v6, %v961_v0 }
 0xa2c   :  { %v1005_v7 = vadd.f32 %v1002_v1, %v898_v59 }
 0xa2e   :  { %v1009_v8 = vsel %vm66_vm0, %v1005_v7, 0.0 }
 0xa2f   :  { %1010 = vadd.xlane.f32.xlu0 %v1009_v8 }
 0xa9a   :  { %v1008_v9 = vpop.xlane.xlu0 %1007 }
 0xa9b   :  { %v1012_v11 = vmul.f32 %v1008_v9, %v4606_v10 }
 0xa9d   :  { %v1014_v12 = vsub.f32 %v1004_v4, %v1012_v11 }
 0xa9f   :  { %v1016_v13 = vmul.f32 %v1014_v12, %v1014_v12 }
 0xaa1   :  { %v1018_v15 = vsel %vm66_vm0, %v1016_v13, 0.0 }
 0xaa2   :  { %1019 = vadd.xlane.f32.xlu0 %v1018_v15  ;;  %v1011_v16 = vpop.xlane.xlu0 %1010 }
 0xaa3   :  { %v1013_v17 = vmul.f32 %v1011_v16, %v4606_v10 }
 0xaa5   :  { %v1015_v19 = vsub.f32 %v1005_v7, %v1013_v17 }
 0xaa7   :  { %v1017_v20 = vmul.f32 %v1015_v19, %v1015_v19 }
 0xaa9   :  { %v1021_v21 = vsel %vm66_vm0, %v1017_v20, 0.0 }
 0xaaa   :  { %1022 = vadd.xlane.f32.xlu0 %v1021_v21 }
 0xb15   :  { %v1020_v22 = vpop.xlane.xlu0 %1019 }
 0xb16   :  { %v1024_v23 = vmul.f32 %v1020_v22, %v4606_v10 }
 0xb18   :  { %v1026_v24 = vadd.f32 1e-12, %v1024_v23 }
 0xb1a   :  { %4320 = vrsqrt.f32 %v1026_v24  ;;  %vm1034_vm11 = vweird.f32 %v1026_v24 }
 0xb1d   :  { %v1023_v27 = vpop.xlane.xlu0 %1022 }
 0xb1e   :  { %v1025_v28 = vmul.f32 %v1023_v27, %v4606_v10 }
 0xb20   :  { %v4321_v29 = vpop.eup %4320  ;;  %v1027_v30 = vadd.f32 1e-12, %v1025_v28 }
 0xb21   :  { %v1029_v31 = vmul.f32 %v4321_v29, %v1026_v24  ;;  %vm1035_vm10 = vweird.f32 %v4321_v29 }
 0xb22   :  { %4322 = vrsqrt.f32 %v1027_v30  ;;  %vm1036_vm12 = vmor %vm1034_vm11, %vm1035_vm10  ;;  %vm1044_vm14 = vweird.f32 %v1027_v30 }
 0xb23   :  { %v1030_v59 = vmul.f32 %v4321_v29, %v1029_v31 }
 0xb25   :  { %v1031_v32 = vmul.f32 0.5, %v1030_v59 }
 0xb27   :  { %v1032_v33 = vsub.f32 1.5, %v1031_v32 }
 0xb28   :  { %v4323_v34 = vpop.eup %4322 }
 0xb29   :  { %v1033_v35 = vmul.f32 %v4321_v29, %v1032_v33  ;;  %v1039_v36 = vmul.f32 %v4323_v34, %v1027_v30  ;;  %vm1045_vm13 = vweird.f32 %v4323_v34 }
 0xb2a   :  { %vm1046_vm15 = vmor %vm1044_vm14, %vm1045_vm13 }
 0xb2b   :  { %v1037_v38 = vsel %vm1036_vm12, %v4321_v29, %v1033_v35  ;;  %v1040_v39 = vmul.f32 %v4323_v34, %v1039_v36 }
 0xb2c   :  { %v1048_v42 = vmul.f32 %v1037_v38, %v1014_v12 }
 0xb2d   :  { %v1041_v43 = vmul.f32 0.5, %v1040_v39 }
 0xb2e   :  { %v1051_v3 = vmul.f32 %v1050_v37, %v1048_v42 }
 0xb2f   :  { %v1042_v44 = vsub.f32 1.5, %v1041_v43 }
 0xb30   :  { %v1054_v45 = vadd.f32 %v1053_v41, %v1051_v3 }
 0xb31   :  { %v1043_v46 = vmul.f32 %v4323_v34, %v1042_v44 }
 0xb32   :  { %1056 = vst.msk [vmem:[#allocation2] sm:$0xff] %vm66_vm0, %v1054_v45 }
 0xb33   :  { %v1047_v47 = vsel %vm1046_vm15, %v4323_v34, %v1043_v46 }
 0xb34   :  { %v1049_v48 = vmul.f32 %v1047_v47, %v1015_v19 }
 0xb36   :  { %v1052_v49 = vmul.f32 %v1050_v37, %v1049_v48 }
 0xb38   :  { %v1055_v50 = vadd.f32 %v1053_v41, %v1052_v49 }
 0xb39   :  { %v4850_v53 = vld [vmem:[#allocation2] sm:$0xff] }
 0xb3a   :  { %1057 = vst.msk [vmem:[#allocation2 + $0x8] sm:$0xff] %vm66_vm0, %v1055_v50  ;;  %v4008_v50 = vld [vmem:[%s5550_s5 + $0x14] sm:$0xf] }
 0xb41   :  { %v4852_v55 = vld [vmem:[#allocation2 + $0x8] sm:$0xff] }
 0xb42   :  { %v1065_v57 = vpack.c.bf16 %v4852_v55, %v4850_v53 }
 0xb44   :  { %4006 = vmatmul.msk.bf16.vlgmr.msrb.gmra.mxu2 %vm66_vm0, %v1065_v57  ;;  %v1400_v57 = vsel %vm292_vm9, %v4008_v50, 0 }
 0xbc7   :  { %v1096_v61 = vpop.f32.mrf.mxu2 }
 0xbc8   :  { %v1097_v62 = vadd.f32 %v1096_v61, %v1071_v54 }
 0xbca   :  { %v1106_v14 = vpack.c.bf16 %v1097_v62, %v1097_v62 }
 0xbcc   :  { %v1109_v51 = vunpack.c.l.b16 %v1106_v14 }
 0xbce   :  { %v4863_v56 = vpack.c.b16 %v1109_v51, %v1109_v51 }
 0xbcf   :  { %v1098_v60 = vpop.f32.mrf.mxu2 }
 0xbd0   :  { %v1099_v63 = vadd.f32 %v1098_v60, %v1071_v54  ;;  %1253 = vrot.lane.b32.xlu2 %v4863_v56, %s4510_s29  ;;  %1255 = vrot.lane.b32.xlu0 %v4863_v56, %s4509_s28 }
 0xbd1   :  { %1111 = vrot.lane.b32.xlu1 %v4863_v56, %s4508_s27 }
 0xbd2   :  { %v1107_v0 = vpack.c.bf16 %v1099_v63, %v1099_v63 }
 0xbd4   :  { %v1133_v52 = vunpack.c.l.b16 %v1107_v0 }
 0xbd6   :  { %v4871_v2 = vpack.c.b16 %v1133_v52, %v1133_v52 }
 0xbd8   :  { %1276 = vrot.lane.b32.xlu2 %v4871_v2, %s4510_s29  ;;  %1135 = vrot.lane.b32.xlu0 %v4871_v2, %s4508_s27 }
 0xbd9   :  { %1278 = vrot.lane.b32.xlu1 %v4871_v2, %s4509_s28 }
 0xc2a   :  { %v1254_v12 = vpop.permute.xlu2 %1253 }
 0xc32   :  { %v1277_v13 = vpop.permute.xlu2 %1276 }
 0xc42   :  { %v1256_v4 = vpop.permute.xlu0 %1255 }
 0xc43   :  { %v1261_v5 = vsel %vm185_vm8, %v1256_v4, 0  ;;  %v1112_v6 = vpop.permute.xlu1 %1111  ;;  %v4007_v4 = vld [vmem:[%s5550_s5 + $0x10] sm:$0xf] }
 0xc44   :  { %v1117_v1 = vsel %vm185_vm8, %v1112_v6, 0 }
 0xc45   :  { %1126 = vmatpush.bf16.xpose.msra.mxu3 %v1117_v1 }
 0xc4a   :  { %v1136_v7 = vpop.permute.xlu0 %1135 }
 0xc4b   :  { %v1141_v8 = vsel %vm185_vm8, %v1136_v7, 0  ;;  %v1279_v9 = vpop.permute.xlu1 %1278 }
 0xc4c   :  { %v1284_v11 = vsel %vm185_vm8, %v1279_v9, 0  ;;  %4011 = vmatmul.msk.bf16.vlgmr.msra.gmra.mxu3 %vm185_vm8, %v1106_v14  ;;  %1150 = vmatpush.bf16.xpose.msra.mxu0 %v1141_v8 }
 0xc4d   :  { %1270 = vmatpush.bf16.xpose.msrb.mxu3 %v1261_v5  ;;  %v1420_v5 = vsel %vm292_vm9, %v4007_v4, 0 }
 0xc53   :  { %4012 = vmatmul.msk.bf16.vlgmr.msra.gmra.mxu0 %vm185_vm8, %v1107_v0 }
 0xc54   :  { %1293 = vmatpush.bf16.xpose.msrb.mxu0 %v1284_v11 }
 0xc55   :  { %1409 = vmatpush.bf16.msra.mxu3 %v1400_v57 }
 0xc5c   :  { %4015 = vmatmul.msk.bf16.vlgmr.msrb.gmra.mxu3 %vm185_vm8, %v1254_v12  ;;  %1429 = vmatpush.bf16.msra.mxu0 %v1420_v5 }
 0xc63   :  { %4016 = vmatmul.msk.bf16.vlgmr.msrb.gmra.mxu0 %vm185_vm8, %v1277_v13 }
 0xccf   :  { %v1128_v15 = vpop.f32.mrf.mxu3 }
 0xcd0   :  { %v1156_v16 = vmul.f32 0.35355338, %v1128_v15  ;;  %v1152_v17 = vpop.f32.mrf.mxu0 }
 0xcd1   :  { %v1157_v30 = vmul.f32 0.35355338, %v1152_v17 }
 0xcd2   :  { %v1158_v19 = vadd.f32 %v1156_v16, %v4674_v18 }
 0xcd3   :  { %v1159_v31 = vadd.f32 %v1157_v30, %v4697_v40 }
 0xcd4   :  { %v1160_v20 = vsel %vm185_vm8, %v1158_v19, -inf }
 0xcd5   :  { %1161 = vmax.xlane.f32.xlu0 %v1160_v20  ;;  %v1163_v59 = vsel %vm185_vm8, %v1159_v31, -inf }
 0xcd7   :  { %v1130_v21 = vpop.f32.mrf.mxu3 }
 0xcd8   :  { %v1154_v22 = vpop.f32.mrf.mxu0 }
 0xcdf   :  { %v1272_v23 = vpop.f32.mrf.mxu3 }
 0xce0   :  { %v1299_v24 = vmul.f32 0.35355338, %v1272_v23  ;;  %v1295_v25 = vpop.f32.mrf.mxu0 }
 0xce1   :  { %v1300_v44 = vmul.f32 0.35355338, %v1295_v25 }
 0xce2   :  { %v1301_v26 = vadd.f32 %v1299_v24, %v4674_v18 }
 0xce3   :  { %v4927_v45 = vadd.f32 %v1300_v44, %v4697_v40 }
 0xce4   :  { %v1303_v27 = vsel %vm185_vm8, %v1301_v26, -inf }
 0xce5   :  { %1304 = vmax.xlane.f32.xlu1 %v1303_v27  ;;  %v1306_v46 = vsel %vm185_vm8, %v4927_v45, -inf }
 0xce7   :  { %v1274_v28 = vpop.f32.mrf.mxu3 }
 0xce8   :  { %v1297_v29 = vpop.f32.mrf.mxu0 }
 0xce9   :  { %1438 = vrot.lane.b32.xlu0 %v4863_v56, %s4512_s15 }
 0xcfe   :  { %1210 = vrot.lane.b32.xlu1 %v4863_v56, %s4514_s3 }
 0xd28   :  { %1164 = vmax.xlane.f32.xlu1 %v1163_v59 }
 0xd41   :  { %1231 = vrot.lane.b32.xlu1 %v4871_v2, %s4514_s3 }
 0xd48   :  { %v1162_v32 = vpop.xlane.xlu0 %1161 }
 0xd49   :  { %v1166_v33 = vsub.f32 %v1158_v19, %v1162_v32  ;;  %1459 = vrot.lane.b32.xlu1 %v4871_v2, %s4513_s18 }
 0xd4b   :  { %v1168_v34 = vmul.f32 1.442695, %v1166_v33 }
 0xd4d   :  { %4324 = vpow2.f32 %v1168_v34 }
 0xd51   :  { %1536 = vrot.lane.b32.xlu1 %v4863_v56, %s4515_s19 }
 0xd53   :  { %v4903_v35 = vpop.eup %4324 }
 0xd54   :  { %v1172_v36 = vsel %vm185_vm8, %v4903_v35, 0.0 }
 0xd55   :  { %1173 = vadd.xlane.f32.xlu2 %v1172_v36 }
 0xd58   :  { %v1305_v37 = vpop.xlane.xlu1 %1304 }
 0xd59   :  { %v1309_v38 = vsub.f32 %v1301_v26, %v1305_v37  ;;  %1603 = vrot.lane.b32.xlu1 %v4863_v56, %s4516_s20 }
 0xd5b   :  { %v1311_v39 = vmul.f32 1.442695, %v1309_v38  ;;  %v1439_v1 = vpop.permute.xlu0 %1438 }
 0xd5c   :  { %v1444_v26 = vsel %vm185_vm8, %v1439_v1, 0 }
 0xd5d   :  { %4326 = vpow2.f32 %v1311_v39 }
 0xd61   :  { %1626 = vrot.lane.b32.xlu1 %v4871_v2, %s4516_s20 }
 0xd63   :  { %v4911_v41 = vpop.eup %4326 }
 0xd64   :  { %v1315_v42 = vsel %vm185_vm8, %v4911_v41, 0.0 }
 0xd65   :  { %1316 = vadd.xlane.f32.xlu0 %v1315_v42 }
 0xd69   :  { %1601 = vrot.lane.b32.xlu1 %v4863_v56, %s4517_s0 }
 0xd6d   :  { %1353 = vrot.lane.b32.xlu2 %v4863_v56, %s4511_s30 }
 0xd70   :  { %v1211_v43 = vpop.permute.xlu1 %1210 }
 0xd71   :  { %v1216_v3 = vsel %vm292_vm9, %v1211_v43, 0  ;;  %1624 = vrot.lane.b32.xlu1 %v4871_v2, %s4517_s0 }
 0xd72   :  { %1225 = vmatpush.bf16.msra.mxu1 %v1216_v3 }
 0xd79   :  { %1557 = vrot.lane.b32.xlu1 %v4871_v2, %s4515_s19  ;;  %1436 = vrot.lane.b32.xlu0 %v4863_v56, %s4513_s18 }
 0xd96   :  { %1307 = vmax.xlane.f32.xlu2 %v1306_v46 }
 0xd9b   :  { %v1165_v47 = vpop.xlane.xlu1 %1164 }
 0xd9c   :  { %v1167_v48 = vsub.f32 %v1159_v31, %v1165_v47 }
 0xd9e   :  { %v1170_v49 = vmul.f32 1.442695, %v1167_v48 }
 0xda0   :  { %4328 = vpow2.f32 %v1170_v49 }
 0xda6   :  { %v4935_v54 = vpop.eup %4328 }
 0xda7   :  { %v1175_v61 = vsel %vm185_vm8, %v4935_v54, 0.0 }
 0xda8   :  { %1176 = vadd.xlane.f32.xlu0 %v1175_v61 }
 0xdb3   :  { %v1232_v62 = vpop.permute.xlu1 %1231 }
 0xdb4   :  { %v1237_v14 = vsel %vm292_vm9, %v1232_v62, 0 }
 0xdb5   :  { %1246 = vmatpush.bf16.msra.mxu2 %v1237_v14 }
 0xdbb   :  { %v4940_v51 = vpop.permute.xlu1 %1459 }
 0xdbc   :  { %1374 = vrot.lane.b32.xlu0 %v4871_v2, %s4511_s30 }
 0xdc3   :  { %v1537_v60 = vpop.permute.xlu1 %1536 }
 0xdc4   :  { %v1542_v63 = vsel %vm292_vm9, %v1537_v60, 0 }
 0xdc5   :  { %1551 = vmatpush.bf16.msrb.mxu3 %v1542_v63 }
 0xdc8   :  { %v1174_v0 = vpop.xlane.xlu2 %1173 }
 0xdc9   :  { %4330 = vrcp.f32 %v1174_v0  ;;  %v1189_v12 = vand.u32 2147483648, %v1174_v0  ;;  %v1187_v16 = vand.u32 2147483647, %v1174_v0  ;;  %vm1183_vm2 = vweird.f32 %v1174_v0 }
 0xdcb   :  { %v4945_v52 = vpop.permute.xlu1 %1603  ;;  %v1190_v19 = vor.u32 1.1754944e-38, %v1189_v12  ;;  %vm1188_vm4 = vcmp.eq.f32.partialorder %v1187_v16, 8.507059e+37 }
 0xdcf   :  { %v4331_v6 = vpop.eup %4330 }
 0xdd0   :  { %v1179_v7 = vmul.f32 %v4331_v6, %v1174_v0  ;;  %v1354_v8 = vpop.permute.xlu2 %1353  ;;  %vm1184_vm1 = vweird.f32 %v4331_v6 }
 0xdd1   :  { %v1359_v9 = vsel %vm292_vm9, %v1354_v8, 0  ;;  %vm1185_vm3 = vmor %vm1183_vm2, %vm1184_vm1 }
 0xdd2   :  { %v1180_v11 = vsub.f32 1.0, %v1179_v7  ;;  %1368 = vmatpush.bf16.msrb.mxu1 %v1359_v9 }
 0xdd3   :  { %v4952_v13 = vpop.permute.xlu1 %1626 }
 0xdd4   :  { %v1181_v15 = vmul.f32 %v4331_v6, %v1180_v11 }
 0xdd6   :  { %v1182_v17 = vadd.f32 %v4331_v6, %v1181_v15 }
 0xdd8   :  { %v1186_v20 = vsel %vm1185_vm3, %v4331_v6, %v1182_v17  ;;  %v1317_v21 = vpop.xlane.xlu0 %1316 }
 0xdd9   :  { %v1191_v22 = vsel %vm1188_vm4, %v1190_v19, %v1186_v20  ;;  %4332 = vrcp.f32 %v1317_v21  ;;  %v1332_v30 = vand.u32 2147483648, %v1317_v21  ;;  %v1330_v32 = vand.u32 2147483647, %v1317_v21 }
 0xdda   :  { %v1192_v23 = vmul.f32 %v4903_v35, %v1191_v22  ;;  %vm1326_vm6 = vweird.f32 %v1317_v21 }
 0xddb   :  { %v4955_v24 = vpop.permute.xlu1 %1601  ;;  %v1333_v34 = vor.u32 1.1754944e-38, %v1332_v30  ;;  %vm1331_vm11 = vcmp.eq.f32.partialorder %v1330_v32, 8.507059e+37 }
 0xddc   :  { %v1208_v25 = vpack.c.bf16 %v1192_v23, %v1192_v23 }
 0xdde   :  { %4013 = vmatmul.msk.bf16.vlgmr.msra.gmra.mxu1 %vm185_vm8, %v1208_v25 }
 0xddf   :  { %v4333_v27 = vpop.eup %4332  ;;  %1453 = vmatpush.bf16.xpose.msra.mxu1 %v1444_v26 }
 0xde0   :  { %v1322_v28 = vmul.f32 %v4333_v27, %v1317_v21  ;;  %vm1327_vm5 = vweird.f32 %v4333_v27 }
 0xde1   :  { %vm1328_vm10 = vmor %vm1326_vm6, %vm1327_vm5 }
 0xde2   :  { %v1323_v29 = vsub.f32 1.0, %v1322_v28 }
 0xde3   :  { %v4959_v31 = vpop.permute.xlu1 %1624 }
 0xde4   :  { %v1324_v59 = vmul.f32 %v4333_v27, %v1323_v29 }
 0xde6   :  { %v1325_v33 = vadd.f32 %v4333_v27, %v1324_v59 }
 0xde8   :  { %v1329_v35 = vsel %vm1328_vm10, %v4333_v27, %v1325_v33 }
 0xde9   :  { %v1334_v36 = vsel %vm1331_vm11, %v1333_v34, %v1329_v35  ;;  %v1609_v35 = vsel %vm185_vm8, %v4945_v52, 0 }
 0xdea   :  { %v1335_v37 = vmul.f32 %v4911_v41, %v1334_v36 }
 0xdeb   :  { %v1558_v38 = vpop.permute.xlu1 %1557  ;;  %v1437_v43 = vpop.permute.xlu0 %1436 }
 0xdec   :  { %v1563_v39 = vsel %vm292_vm9, %v1558_v38, 0  ;;  %v1351_v42 = vpack.c.bf16 %v1335_v37, %v1335_v37 }
 0xded   :  { %1572 = vmatpush.bf16.msrb.mxu0 %v1563_v39 }
 0xdee   :  { %4017 = vmatmul.msk.bf16.vlgmr.msrb.gmra.mxu1 %vm185_vm8, %v1351_v42 }
 0xdfe   :  { %4021 = vmatmul.msk.bf16.vlgmr.msra.gmra.mxu1 %vm185_vm8, %v1437_v43 }
 0xe09   :  { %v1308_v3 = vpop.xlane.xlu2 %1307 }
 0xe0a   :  { %v1310_v44 = vsub.f32 %v4927_v45, %v1308_v3 }
 0xe0c   :  { %v1313_v46 = vmul.f32 1.442695, %v1310_v44 }
 0xe0e   :  { %4334 = vpow2.f32 %v1313_v46 }
 0xe14   :  { %v4335_v47 = vpop.eup %4334 }
 0xe15   :  { %v1318_v48 = vsel %vm185_vm8, %v4335_v47, 0.0 }
 0xe16   :  { %1319 = vadd.xlane.f32.xlu2 %v1318_v48 }
 0xe1b   :  { %v1177_v41 = vpop.xlane.xlu0 %1176 }
 0xe1c   :  { %4336 = vrcp.f32 %v1177_v41  ;;  %v1204_v61 = vand.u32 2147483648, %v1177_v41  ;;  %v1202_v14 = vand.u32 2147483647, %v1177_v41  ;;  %vm1198_vm13 = vweird.f32 %v1177_v41 }
 0xe1e   :  { %v1205_v63 = vor.u32 1.1754944e-38, %v1204_v61  ;;  %vm1203_vm15 = vcmp.eq.f32.partialorder %v1202_v14, 8.507059e+37 }
 0xe22   :  { %v4337_v49 = vpop.eup %4336 }
 0xe23   :  { %v1194_v50 = vmul.f32 %v4337_v49, %v1177_v41  ;;  %vm1199_vm12 = vweird.f32 %v4337_v49 }
 0xe24   :  { %vm1200_vm14 = vmor %vm1198_vm13, %vm1199_vm12 }
 0xe25   :  { %v1195_v57 = vsub.f32 1.0, %v1194_v50 }
 0xe27   :  { %v1196_v62 = vmul.f32 %v4337_v49, %v1195_v57 }
 0xe29   :  { %v1197_v60 = vadd.f32 %v4337_v49, %v1196_v62 }
 0xe2b   :  { %v1201_v45 = vsel %vm1200_vm14, %v4337_v49, %v1197_v60 }
 0xe2c   :  { %v1206_v0 = vsel %vm1203_vm15, %v1205_v63, %v1201_v45 }
 0xe2d   :  { %v1207_v4 = vmul.f32 %v4935_v54, %v1206_v0 }
 0xe2e   :  { %1461 = vrot.lane.b32.xlu2 %v4871_v2, %s4512_s15  ;;  %v1375_v5 = vpop.permute.xlu0 %1374 }
 0xe2f   :  { %v1380_v6 = vsel %vm292_vm9, %v1375_v5, 0  ;;  %v1209_v1 = vpack.c.bf16 %v1207_v4, %v1207_v4 }
 0xe30   :  { %1389 = vmatpush.bf16.msrb.mxu2 %v1380_v6 }
 0xe31   :  { %4014 = vmatmul.msk.bf16.vlgmr.msra.gmra.mxu2 %vm185_vm8, %v1209_v1 }
 0xe5b   :  { %v1227_v7 = vpop.f32.mrf.mxu1 }
 0xe63   :  { %v1229_v8 = vpop.f32.mrf.mxu1 }
 0xe6b   :  { %v1370_v9 = vpop.f32.mrf.mxu1 }
 0xe73   :  { %v1372_v11 = vpop.f32.mrf.mxu1 }
 0xe7b   :  { %v1455_v12 = vpop.f32.mrf.mxu1 }
 0xe7c   :  { %v1482_v15 = vmul.f32 0.35355338, %v1455_v12 }
 0xe7e   :  { %v1484_v16 = vadd.f32 %v1482_v15, %v4674_v18 }
 0xe80   :  { %v1486_v54 = vsel %vm185_vm8, %v1484_v16, -inf }
 0xe81   :  { %1487 = vmax.xlane.f32.xlu0 %v1486_v54 }
 0xe83   :  { %v1457_v17 = vpop.f32.mrf.mxu1 }
 0xe89   :  { %v1320_v19 = vpop.xlane.xlu2 %1319 }
 0xe8a   :  { %4338 = vrcp.f32 %v1320_v19  ;;  %v1347_v26 = vand.u32 2147483648, %v1320_v19  ;;  %v1345_v28 = vand.u32 2147483647, %v1320_v19  ;;  %vm1341_vm2 = vweird.f32 %v1320_v19 }
 0xe8c   :  { %v1348_v30 = vor.u32 1.1754944e-38, %v1347_v26  ;;  %vm1346_vm4 = vcmp.eq.f32.partialorder %v1345_v28, 8.507059e+37 }
 0xe90   :  { %v4339_v20 = vpop.eup %4338 }
 0xe91   :  { %v1337_v21 = vmul.f32 %v4339_v20, %v1320_v19  ;;  %v1462_v22 = vpop.permute.xlu2 %1461  ;;  %vm1342_vm1 = vweird.f32 %v4339_v20 }
 0xe92   :  { %v1467_v23 = vsel %vm185_vm8, %v1462_v22, 0  ;;  %vm1343_vm3 = vmor %vm1341_vm2, %vm1342_vm1 }
 0xe93   :  { %v1338_v25 = vsub.f32 1.0, %v1337_v21  ;;  %1476 = vmatpush.bf16.xpose.msra.mxu2 %v1467_v23 }
 0xe95   :  { %v1339_v27 = vmul.f32 %v4339_v20, %v1338_v25 }
 0xe97   :  { %v1340_v29 = vadd.f32 %v4339_v20, %v1339_v27 }
 0xe99   :  { %v1344_v59 = vsel %vm1343_vm3, %v4339_v20, %v1340_v29 }
 0xe9a   :  { %v1349_v32 = vsel %vm1346_vm4, %v1348_v30, %v1344_v59 }
 0xe9b   :  { %v1350_v33 = vmul.f32 %v4335_v47, %v1349_v32 }
 0xe9d   :  { %v1352_v34 = vpack.c.bf16 %v1350_v33, %v1350_v33 }
 0xe9f   :  { %4018 = vmatmul.msk.bf16.vlgmr.msrb.gmra.mxu2 %vm185_vm8, %v1352_v34 }
 0xea0   :  { %1618 = vmatpush.bf16.xpose.msrb.mxu2 %v1609_v35 }
 0xeaf   :  { %4022 = vmatmul.msk.bf16.vlgmr.msra.gmra.mxu2 %vm185_vm8, %v4940_v51  ;;  %v1632_v51 = vsel %vm185_vm8, %v4952_v13, 0 }
 0xeb4   :  { %v1248_v36 = vpop.f32.mrf.mxu2 }
 0xeb5   :  { %v1252_v37 = vpack.c.bf16 %v1248_v36, %v1227_v7 }
 0xeb7   :  { %4020 = vmatmul.msk.bf16.vlgmr.msra.gmra.mxu0 %vm185_vm8, %v1252_v37 }
 0xebc   :  { %v1250_v38 = vpop.f32.mrf.mxu2 }
 0xebf   :  { %4026 = vmatmul.msk.bf16.vlgmr.msrb.gmra.mxu2 %vm185_vm8, %v4955_v24 }
 0xef4   :  { %v1488_v39 = vpop.xlane.xlu0 %1487 }
 0xef5   :  { %v1492_v42 = vsub.f32 %v1484_v16, %v1488_v39 }
 0xef7   :  { %v1494_v43 = vmul.f32 1.442695, %v1492_v42 }
 0xef9   :  { %4340 = vpow2.f32 %v1494_v43 }
 0xeff   :  { %v4341_v3 = vpop.eup %4340 }
 0xf00   :  { %v1498_v52 = vsel %vm185_vm8, %v4341_v3, 0.0 }
 0xf01   :  { %1499 = vadd.xlane.f32.xlu2 %v1498_v52 }
 0xf22   :  { %v1391_v44 = vpop.f32.mrf.mxu2 }
 0xf23   :  { %v1395_v46 = vpack.c.bf16 %v1391_v44, %v1370_v9 }
 0xf25   :  { %4019 = vmatmul.msk.bf16.vlgmr.msra.gmra.mxu3 %vm185_vm8, %v1395_v46 }
 0xf26   :  { %1641 = vmatpush.bf16.xpose.msra.mxu3 %v1632_v51 }
 0xf2a   :  { %v1393_v47 = vpop.f32.mrf.mxu2 }
 0xf32   :  { %v1478_v48 = vpop.f32.mrf.mxu2 }
 0xf33   :  { %v1483_v41 = vmul.f32 0.35355338, %v1478_v48 }
 0xf35   :  { %v1485_v24 = vadd.f32 %v1483_v41, %v4697_v40 }
 0xf37   :  { %v1489_v49 = vsel %vm185_vm8, %v1485_v24, -inf }
 0xf38   :  { %1490 = vmax.xlane.f32.xlu0 %v1489_v49 }
 0xf3a   :  { %v1480_v50 = vpop.f32.mrf.mxu2 }
 0xf42   :  { %v1620_v57 = vpop.f32.mrf.mxu2 }
 0xf43   :  { %v1647_v61 = vmul.f32 0.35355338, %v1620_v57 }
 0xf45   :  { %v1649_v62 = vadd.f32 %v1647_v61, %v4674_v18 }
 0xf47   :  { %v1651_v14 = vsel %vm185_vm8, %v1649_v62, -inf }
 0xf48   :  { %1652 = vmax.xlane.f32.xlu0 %v1651_v14 }
 0xf4a   :  { %v1622_v13 = vpop.f32.mrf.mxu2 }
 0xf74   :  { %v1500_v60 = vpop.xlane.xlu2 %1499 }
 0xf75   :  { %4342 = vrcp.f32 %v1500_v60  ;;  %v1515_v4 = vand.u32 2147483648, %v1500_v60  ;;  %v1513_v6 = vand.u32 2147483647, %v1500_v60  ;;  %vm1509_vm6 = vweird.f32 %v1500_v60 }
 0xf77   :  { %v1516_v7 = vor.u32 1.1754944e-38, %v1515_v4  ;;  %vm1514_vm11 = vcmp.eq.f32.partialorder %v1513_v6, 8.507059e+37 }
 0xf7b   :  { %v4343_v63 = vpop.eup %4342 }
 0xf7c   :  { %v1505_v45 = vmul.f32 %v4343_v63, %v1500_v60  ;;  %vm1510_vm5 = vweird.f32 %v4343_v63 }
 0xf7d   :  { %vm1511_vm10 = vmor %vm1509_vm6, %vm1510_vm5 }
 0xf7e   :  { %v1506_v0 = vsub.f32 1.0, %v1505_v45 }
 0xf80   :  { %v1507_v5 = vmul.f32 %v4343_v63, %v1506_v0  ;;  %v4009_v0 = vld [vmem:[%s5550_s5 + $0x18] sm:$0xf] }
 0xf82   :  { %v1508_v1 = vadd.f32 %v4343_v63, %v1507_v5  ;;  %v1583_v5 = vsel %vm292_vm9, %v4009_v0, 0 }
 0xf83   :  { %1592 = vmatpush.bf16.msrb.mxu1 %v1583_v5 }
 0xf84   :  { %v1512_v8 = vsel %vm1511_vm10, %v4343_v63, %v1508_v1 }
 0xf85   :  { %v1517_v9 = vsel %vm1514_vm11, %v1516_v7, %v1512_v8 }
 0xf86   :  { %v1518_v11 = vmul.f32 %v4341_v3, %v1517_v9  ;;  %v1431_v9 = vpop.f32.mrf.mxu0 }
 0xf88   :  { %v1534_v12 = vpack.c.bf16 %v1518_v11, %v1518_v11 }
 0xf8a   :  { %4023 = vmatmul.msk.bf16.vlgmr.msrb.gmra.mxu3 %vm185_vm8, %v1534_v12 }
 0xf8e   :  { %v1433_v11 = vpop.f32.mrf.mxu0 }
 0xf9a   :  { %4027 = vmatmul.msk.bf16.vlgmr.msra.gmra.mxu3 %vm185_vm8, %v4959_v31 }
 0xfa8   :  { %v4996_v26 = vpop.f32.mrf.mxu3 }
 0xfab   :  { %v1491_v15 = vpop.xlane.xlu0 %1490 }
 0xfac   :  { %v1493_v16 = vsub.f32 %v1485_v24, %v1491_v15 }
 0xfae   :  { %v1496_v54 = vmul.f32 1.442695, %v1493_v16 }
 0xfb0   :  { %4344 = vpow2.f32 %v1496_v54  ;;  %v4998_v27 = vpop.f32.mrf.mxu3 }
 0xfb6   :  { %v4345_v17 = vpop.eup %4344 }
 0xfb7   :  { %v1501_v19 = vsel %vm185_vm8, %v4345_v17, 0.0 }
 0xfb8   :  { %1502 = vadd.xlane.f32.xlu2 %v1501_v19 }
 0xfbb   :  { %v1653_v20 = vpop.xlane.xlu0 %1652 }
 0xfbc   :  { %v1657_v21 = vsub.f32 %v1649_v62, %v1653_v20 }
 0xfbe   :  { %v1659_v22 = vmul.f32 1.442695, %v1657_v21 }
 0xfc0   :  { %4346 = vpow2.f32 %v1659_v22 }
 0xfc6   :  { %v4347_v23 = vpop.eup %4346 }
 0xfc7   :  { %v1663_v25 = vsel %vm185_vm8, %v4347_v23, 0.0 }
 0xfc8   :  { %1664 = vadd.xlane.f32.xlu1 %v1663_v25 }
0x100d   :  { %v5000_v31 = vpop.f32.mrf.mxu3 }
0x1015   :  { %v1555_v28 = vpop.f32.mrf.mxu3 }
0x101d   :  { %v1643_v29 = vpop.f32.mrf.mxu3 }
0x101e   :  { %v1648_v30 = vmul.f32 0.35355338, %v1643_v29 }
0x1020   :  { %v1650_v59 = vadd.f32 %v1648_v30, %v4697_v40 }
0x1022   :  { %v1654_v32 = vsel %vm185_vm8, %v1650_v59, -inf }
0x1023   :  { %1655 = vmax.xlane.f32.xlu2 %v1654_v32 }
0x1025   :  { %v1645_v33 = vpop.f32.mrf.mxu3 }
0x102b   :  { %v1503_v34 = vpop.xlane.xlu2 %1502 }
0x102c   :  { %4348 = vrcp.f32 %v1503_v34  ;;  %v1530_v38 = vand.u32 2147483648, %v1503_v34  ;;  %v1528_v42 = vand.u32 2147483647, %v1503_v34  ;;  %vm1524_vm13 = vweird.f32 %v1503_v34 }
0x102e   :  { %v1531_v3 = vor.u32 1.1754944e-38, %v1530_v38  ;;  %vm1529_vm15 = vcmp.eq.f32.partialorder %v1528_v42, 8.507059e+37  ;;  %v4010_v38 = vld [vmem:[%s5550_s5 + $0x1c] sm:$0xf] }
0x1032   :  { %v4349_v35 = vpop.eup %4348 }
0x1033   :  { %v1520_v36 = vmul.f32 %v4349_v35, %v1503_v34  ;;  %vm1525_vm12 = vweird.f32 %v4349_v35 }
0x1034   :  { %vm1526_vm14 = vmor %vm1524_vm13, %vm1525_vm12 }
0x1035   :  { %v1521_v37 = vsub.f32 1.0, %v1520_v36 }
0x1037   :  { %v1522_v39 = vmul.f32 %v4349_v35, %v1521_v37 }
0x1039   :  { %v1523_v43 = vadd.f32 %v4349_v35, %v1522_v39  ;;  %v1748_v39 = vsel %vm292_vm9, %v4010_v38, 0  ;;  %v4238_v38 = vld [vmem:[%s5552_s7 + $0x38] sm:$0xff] }
0x103a   :  { %1757 = vmatpush.bf16.msra.mxu2 %v1748_v39  ;;  %v4237_v39 = vld [vmem:[%s5552_s7 + $0x30] sm:$0xff] }
0x103b   :  { %v1527_v52 = vsel %vm1526_vm14, %v4349_v35, %v1523_v43  ;;  %1701 = vrot.lane.b32.xlu2 %v4863_v56, %s4518_s24  ;;  %v1665_v47 = vpop.xlane.xlu1 %1664  ;;  %v1432_v35 = vadd.f32 %v1431_v9, %v4996_v26 }
0x103c   :  { %v1532_v44 = vsel %vm1529_vm15, %v1531_v3, %v1527_v52  ;;  %4350 = vrcp.f32 %v1665_v47  ;;  %v1680_v57 = vand.u32 2147483648, %v1665_v47  ;;  %vm1674_vm2 = vweird.f32 %v1665_v47 }
0x103d   :  { %v1533_v46 = vmul.f32 %v4345_v17, %v1532_v44  ;;  %v1678_v61 = vand.u32 2147483647, %v1665_v47  ;;  %v1766_v44 = vperm.slane %v4860_v58, 1 }
0x103e   :  { %v1681_v13 = vor.u32 1.1754944e-38, %v1680_v57 }
0x103f   :  { %v1535_v51 = vpack.c.bf16 %v1533_v46, %v1533_v46  ;;  %vm1679_vm4 = vcmp.eq.f32.partialorder %v1678_v61, 8.507059e+37 }
0x1041   :  { %4024 = vmatmul.msk.bf16.vlgmr.msrb.gmra.mxu0 %vm185_vm8, %v1535_v51 }
0x1042   :  { %v4351_v48 = vpop.eup %4350 }
0x1043   :  { %v1670_v41 = vmul.f32 %v4351_v48, %v1665_v47  ;;  %vm1675_vm1 = vweird.f32 %v4351_v48  ;;  %v1434_v47 = vadd.f32 %v1433_v11, %v4998_v27 }
0x1044   :  { %vm1676_vm3 = vmor %vm1674_vm2, %vm1675_vm1 }
0x1045   :  { %v1671_v24 = vsub.f32 1.0, %v1670_v41 }
0x1047   :  { %v1672_v49 = vmul.f32 %v4351_v48, %v1671_v24 }
0x1049   :  { %v1673_v50 = vadd.f32 %v4351_v48, %v1672_v49 }
0x104b   :  { %v1677_v14 = vsel %vm1676_vm3, %v4351_v48, %v1673_v50 }
0x104c   :  { %v1682_v63 = vsel %vm1679_vm4, %v1681_v13, %v1677_v14 }
0x104d   :  { %v1683_v45 = vmul.f32 %v4347_v23, %v1682_v63 }
0x104f   :  { %v1699_v7 = vpack.c.bf16 %v1683_v45, %v1683_v45 }
0x1096   :  { %v1656_v62 = vpop.xlane.xlu2 %1655 }
0x1097   :  { %v1658_v56 = vsub.f32 %v1650_v59, %v1656_v62 }
0x1099   :  { %v1661_v60 = vmul.f32 1.442695, %v1658_v56 }
0x109b   :  { %4352 = vpow2.f32 %v1661_v60 }
0x109e   :  { %v1702_v4 = vpop.permute.xlu2 %1701 }
0x109f   :  { %v1707_v6 = vsel %vm292_vm9, %v1702_v4, 0 }
0x10a0   :  { %1716 = vmatpush.bf16.msra.mxu0 %v1707_v6 }
0x10a1   :  { %v4353_v1 = vpop.eup %4352 }
0x10a2   :  { %v1666_v8 = vsel %vm185_vm8, %v4353_v1, 0.0 }
0x10a3   :  { %1667 = vadd.xlane.f32.xlu0 %v1666_v8  ;;  %4028 = vmatmul.msk.bf16.vlgmr.msra.gmra.mxu0 %vm185_vm8, %v1699_v7  ;;  %v4233_v7 = vld [vmem:[%s5551_s6 + $0x10] sm:$0xff] }
0x10a4   :  { %1917 = vmatpush.bf16.msrb.mxu0 %v4238_v38 }
0x10a8   :  { %1918 = vmatpush.bf16.msrb.mxu0 %v4237_v39 }
0x10b7   :  { %1722 = vrot.lane.b32.xlu0 %v4871_v2, %s4518_s24 }
0x10be   :  { %v1574_v12 = vpop.f32.mrf.mxu0 }
0x10bf   :  { %v1578_v15 = vpack.c.bf16 %v1574_v12, %v5000_v31 }
0x10c1   :  { %4025 = vmatmul.msk.bf16.vlgmr.msrb.gmra.mxu1 %vm185_vm8, %v1578_v15 }
0x10c6   :  { %v1576_v16 = vpop.f32.mrf.mxu0 }
0x1116   :  { %v1668_v54 = vpop.xlane.xlu0 %1667 }
0x1117   :  { %4354 = vrcp.f32 %v1668_v54  ;;  %v1695_v22 = vand.u32 2147483648, %v1668_v54  ;;  %v1693_v25 = vand.u32 2147483647, %v1668_v54  ;;  %vm1689_vm6 = vweird.f32 %v1668_v54 }
0x1119   :  { %v1696_v2 = vor.u32 1.1754944e-38, %v1695_v22  ;;  %vm1694_vm11 = vcmp.eq.f32.partialorder %v1693_v25, 8.507059e+37 }
0x111d   :  { %v4355_v17 = vpop.eup %4354 }
0x111e   :  { %v1685_v19 = vmul.f32 %v4355_v17, %v1668_v54  ;;  %vm1690_vm5 = vweird.f32 %v4355_v17 }
0x111f   :  { %vm1691_vm10 = vmor %vm1689_vm6, %vm1690_vm5 }
0x1120   :  { %v1686_v20 = vsub.f32 1.0, %v1685_v19  ;;  %v1718_v21 = vpop.f32.mrf.mxu0 }
0x1122   :  { %v1687_v23 = vmul.f32 %v4355_v17, %v1686_v20 }
0x1124   :  { %v1688_v28 = vadd.f32 %v4355_v17, %v1687_v23 }
0x1126   :  { %v1692_v29 = vsel %vm1691_vm10, %v4355_v17, %v1688_v28 }
0x1127   :  { %v1697_v31 = vsel %vm1694_vm11, %v1696_v2, %v1692_v29  ;;  %v1815_v2 = vperm.slane %v4860_v58, 2 }
0x1128   :  { %v1698_v30 = vmul.f32 %v4353_v1, %v1697_v31  ;;  %v1720_v59 = vpop.f32.mrf.mxu0 }
0x1129   :  { %v1723_v32 = vpop.permute.xlu0 %1722  ;;  %v1818_v59 = vperm.slane %v4860_v58, 3 }
0x112a   :  { %v1728_v33 = vsel %vm292_vm9, %v1723_v32, 0  ;;  %v1700_v34 = vpack.c.bf16 %v1698_v30, %v1698_v30 }
0x112b   :  { %1737 = vmatpush.bf16.msra.mxu1 %v1728_v33 }
0x112e   :  { %4029 = vmatmul.msk.bf16.vlgmr.msra.gmra.mxu1 %vm185_vm8, %v1700_v34 }
0x113e   :  { %v1594_v36 = vpop.f32.mrf.mxu1 }
0x113f   :  { %v1599_v37 = vadd.f32 %v1594_v36, %v1432_v35 }
0x1146   :  { %v1596_v42 = vpop.f32.mrf.mxu1 }
0x1147   :  { %v1600_v41 = vadd.f32 %v1596_v42, %v1434_v47  ;;  %v4236_v42 = vld [vmem:[%s5552_s7 + $0x28] sm:$0xff] }
0x1148   :  { %1919 = vmatpush.bf16.msrb.mxu0 %v4236_v42  ;;  %v4463_v42 = vld [vmem:[%s5553_s8 + $0x8] sm:$0xff] }
0x11ab   :  { %v1739_v43 = vpop.f32.mrf.mxu1 }
0x11ac   :  { %v1743_v3 = vpack.c.bf16 %v1739_v43, %v1718_v21  ;;  %v4235_v43 = vld [vmem:[%s5552_s7 + $0x20] sm:$0xff] }
0x11ad   :  { %1920 = vmatpush.bf16.msrb.mxu0 %v4235_v43  ;;  %v1973_v43 = vperm.slane %v4463_v42, 6 }
0x11ae   :  { %4030 = vmatmul.msk.bf16.vlgmr.msra.gmra.mxu2 %vm185_vm8, %v1743_v3  ;;  %v1827_v3 = vperm.slane %v4860_v58, 4 }
0x11b3   :  { %v1741_v52 = vpop.f32.mrf.mxu1 }
0x1231   :  { %v1759_v46 = vpop.f32.mrf.mxu2 }
0x1232   :  { %v1764_v51 = vadd.f32 %v1759_v46, %v1599_v37 }
0x1234   :  { %v1767_v26 = vadd.f32 %v1766_v44, %v1764_v51 }
0x1236   :  { %v1769_v48 = vadd.f32 %v1767_v26, %v4850_v53 }
0x1238   :  { %v1771_v24 = vsel %vm66_vm0, %v1769_v48, 0.0 }
0x1239   :  { %1772 = vadd.xlane.f32.xlu2 %v1771_v24  ;;  %v1761_v49 = vpop.f32.mrf.mxu2 }
0x123a   :  { %v1765_v50 = vadd.f32 %v1761_v49, %v1600_v41 }
0x123c   :  { %v1768_v57 = vadd.f32 %v1766_v44, %v1765_v50 }
0x123e   :  { %v1770_v61 = vadd.f32 %v1768_v57, %v4852_v55  ;;  %v4234_v55 = vld [vmem:[%s5551_s6 + $0x18] sm:$0xff] }
0x123f   :  { %1849 = vmatpush.bf16.msrb.mxu3 %v4234_v55 }
0x1240   :  { %v1774_v62 = vsel %vm66_vm0, %v1770_v61, 0.0 }
0x1241   :  { %1775 = vadd.xlane.f32.xlu0 %v1774_v62 }
0x1243   :  { %1850 = vmatpush.bf16.msrb.mxu3 %v4233_v7 }
0x12ac   :  { %v1773_v14 = vpop.xlane.xlu2 %1772 }
0x12ad   :  { %v1777_v56 = vmul.f32 %v1773_v14, %v4606_v10 }
0x12af   :  { %v1779_v13 = vsub.f32 %v1769_v48, %v1777_v56 }
0x12b1   :  { %v1781_v60 = vmul.f32 %v1779_v13, %v1779_v13 }
0x12b3   :  { %v1783_v27 = vsel %vm66_vm0, %v1781_v60, 0.0 }
0x12b4   :  { %1784 = vadd.xlane.f32.xlu1 %v1783_v27  ;;  %v1776_v53 = vpop.xlane.xlu0 %1775 }
0x12b5   :  { %v1778_v63 = vmul.f32 %v1776_v53, %v4606_v10 }
0x12b7   :  { %v1780_v45 = vsub.f32 %v1770_v61, %v1778_v63 }
0x12b9   :  { %v1782_v0 = vmul.f32 %v1780_v45, %v1780_v45 }
0x12bb   :  { %v1786_v4 = vsel %vm66_vm0, %v1782_v0, 0.0 }
0x12bc   :  { %1787 = vadd.xlane.f32.xlu1 %v1786_v4  ;;  %v1885_v4 = vperm.slane %v4860_v58, 5 }
0x1327   :  { %v1785_v5 = vpop.xlane.xlu1 %1784 }
0x1328   :  { %v1789_v6 = vmul.f32 %v1785_v5, %v4606_v10 }
0x132a   :  { %v1791_v1 = vadd.f32 1e-12, %v1789_v6 }
0x132c   :  { %4356 = vrsqrt.f32 %v1791_v1  ;;  %vm1799_vm13 = vweird.f32 %v1791_v1 }
0x132f   :  { %v1788_v8 = vpop.xlane.xlu1 %1787 }
0x1330   :  { %v1790_v9 = vmul.f32 %v1788_v8, %v4606_v10 }
0x1332   :  { %v4357_v11 = vpop.eup %4356  ;;  %v1792_v12 = vadd.f32 1e-12, %v1790_v9 }
0x1333   :  { %v1794_v15 = vmul.f32 %v4357_v11, %v1791_v1  ;;  %vm1800_vm12 = vweird.f32 %v4357_v11 }
0x1334   :  { %4358 = vrsqrt.f32 %v1792_v12  ;;  %vm1801_vm14 = vmor %vm1799_vm13, %vm1800_vm12  ;;  %vm1809_vm1 = vweird.f32 %v1792_v12 }
0x1335   :  { %v1795_v16 = vmul.f32 %v4357_v11, %v1794_v15 }
0x1337   :  { %v1796_v54 = vmul.f32 0.5, %v1795_v16 }
0x1339   :  { %v1797_v17 = vsub.f32 1.5, %v1796_v54 }
0x133a   :  { %v4359_v19 = vpop.eup %4358 }
0x133b   :  { %v1798_v20 = vmul.f32 %v4357_v11, %v1797_v17  ;;  %v1804_v21 = vmul.f32 %v4359_v19, %v1792_v12  ;;  %vm1810_vm15 = vweird.f32 %v4359_v19 }
0x133c   :  { %vm1811_vm2 = vmor %vm1809_vm1, %vm1810_vm15 }
0x133d   :  { %v1805_v22 = vmul.f32 %v4359_v19, %v1804_v21  ;;  %v1802_v23 = vsel %vm1801_vm14, %v4357_v11, %v1798_v20 }
0x133e   :  { %v1813_v29 = vmul.f32 %v1802_v23, %v1779_v13 }
0x133f   :  { %v1806_v25 = vmul.f32 0.5, %v1805_v22 }
0x1340   :  { %v1816_v32 = vmul.f32 %v1815_v2, %v1813_v29  ;;  %v4239_v29 = vld [vmem:[%s5549_s4 + $0x20] sm:$0xff] }
0x1341   :  { %v1807_v28 = vsub.f32 1.5, %v1806_v25 }
0x1342   :  { %v1819_v35 = vadd.f32 %v1818_v59, %v1816_v32 }
0x1343   :  { %v1808_v31 = vmul.f32 %v4359_v19, %v1807_v28 }
0x1345   :  { %v1812_v30 = vsel %vm1811_vm2, %v4359_v19, %v1808_v31 }
0x1346   :  { %v1814_v33 = vmul.f32 %v1812_v30, %v1780_v45 }
0x1348   :  { %v1817_v34 = vmul.f32 %v1815_v2, %v1814_v33  ;;  %v4240_v2 = vld [vmem:[%s5549_s4 + $0x28] sm:$0xff] }
0x1349   :  { %2016 = vmatpush.bf16.msrb.mxu1 %v4240_v2 }
0x134a   :  { %v1820_v36 = vadd.f32 %v1818_v59, %v1817_v34 }
0x134c   :  { %v1821_v37 = vpack.c.bf16 %v1820_v36, %v1819_v35 }
0x134d   :  { %2017 = vmatpush.bf16.msrb.mxu1 %v4239_v29 }
0x134e   :  { %4043 = vmatmul.msk.bf16.vlgmr.msrb.gmra.mxu3 %vm66_vm0, %v1821_v37 }
0x13d1   :  { %v1852_v52 = vpop.f32.mrf.mxu3 }
0x13d2   :  { %v1853_v44 = vadd.f32 %v1852_v52, %v1827_v3 }
0x13d4   :  { %v1859_v46 = vmul.f32 0.044715, %v1853_v44  ;;  %v1857_v60 = vmul.f32 0.5, %v1853_v44 }
0x13d6   :  { %v1861_v51 = vmul.f32 %v1859_v46, %v1853_v44 }
0x13d8   :  { %v1863_v26 = vmul.f32 %v1861_v51, %v1853_v44 }
0x13d9   :  { %v1854_v47 = vpop.f32.mrf.mxu3 }
0x13da   :  { %v1865_v48 = vadd.f32 %v1863_v26, %v1853_v44  ;;  %v1855_v41 = vadd.f32 %v1854_v47, %v1827_v3  ;;  %v1976_v44 = vperm.slane %v4463_v42, 7 }
0x13dc   :  { %v1860_v24 = vmul.f32 0.044715, %v1855_v41  ;;  %v1867_v49 = vmul.f32 0.7978846, %v1865_v48  ;;  %v1858_v27 = vmul.f32 0.5, %v1855_v41 }
0x13de   :  { %v1862_v50 = vmul.f32 %v1860_v24, %v1855_v41  ;;  %4360 = vtanh.f32 %v1867_v49 }
0x13e0   :  { %v1864_v57 = vmul.f32 %v1862_v50, %v1855_v41 }
0x13e2   :  { %v1866_v61 = vadd.f32 %v1864_v57, %v1855_v41  ;;  %v5079_v41 = vld [vmem:[#allocation2] ss:$8 sm:$0x3] }
0x13e4   :  { %v1868_v62 = vmul.f32 0.7978846, %v1866_v61  ;;  %v4361_v14 = vpop.eup %4360 }
0x13e5   :  { %v1871_v56 = vadd.f32 1.0, %v4361_v14 }
0x13e6   :  { %4362 = vtanh.f32 %v1868_v62 }
0x13e7   :  { %v1873_v63 = vmul.f32 %v1871_v56, %v1857_v60 }
0x13ec   :  { %v4363_v13 = vpop.eup %4362 }
0x13ed   :  { %v1872_v53 = vadd.f32 1.0, %v4363_v13  ;;  %v5093_v13 = vld [vmem:[%s5553_s8 + $0x10] sm:$0xff] }
0x13ee   :  { %v1994_v60 = vperm.slane %v5093_v13, 0 }
0x13ef   :  { %v1874_v45 = vmul.f32 %v1872_v53, %v1858_v27 }
0x13f1   :  { %v1875_v0 = vpack.c.bf16 %v1874_v45, %v1873_v63 }
0x13f3   :  { %4068 = vmatmul.msk.bf16.vlgmr.msrb.gmra.mxu0 %vm986_vm7, %v1875_v0 }
0x1470   :  { %v1922_v55 = vpop.f32.mrf.mxu0 }
0x1471   :  { %v1923_v5 = vadd.f32 %v1922_v55, %v1885_v4 }
0x1473   :  { %v1927_v6 = vadd.f32 %v1923_v5, %v1819_v35 }
0x1475   :  { %v1929_v1 = vsel %vm66_vm0, %v1927_v6, 0.0 }
0x1476   :  { %1930 = vadd.xlane.f32.xlu1 %v1929_v1 }
0x1478   :  { %v1924_v7 = vpop.f32.mrf.mxu0 }
0x1479   :  { %v1925_v8 = vadd.f32 %v1924_v7, %v1885_v4 }
0x147b   :  { %v1928_v9 = vadd.f32 %v1925_v8, %v1820_v36 }
0x147d   :  { %v1932_v11 = vsel %vm66_vm0, %v1928_v9, 0.0 }
0x147e   :  { %1933 = vadd.xlane.f32.xlu1 %v1932_v11 }
0x14e9   :  { %v1931_v12 = vpop.xlane.xlu1 %1930 }
0x14ea   :  { %v1935_v15 = vmul.f32 %v1931_v12, %v4606_v10 }
0x14ec   :  { %v1937_v16 = vsub.f32 %v1927_v6, %v1935_v15 }
0x14ee   :  { %v1939_v54 = vmul.f32 %v1937_v16, %v1937_v16 }
0x14f0   :  { %v1941_v17 = vsel %vm66_vm0, %v1939_v54, 0.0 }
0x14f1   :  { %1942 = vadd.xlane.f32.xlu2 %v1941_v17  ;;  %v1934_v58 = vpop.xlane.xlu1 %1933 }
0x14f2   :  { %v1936_v19 = vmul.f32 %v1934_v58, %v4606_v10 }
0x14f4   :  { %v1938_v20 = vsub.f32 %v1928_v9, %v1936_v19 }
0x14f6   :  { %v1940_v21 = vmul.f32 %v1938_v20, %v1938_v20 }
0x14f8   :  { %v1944_v22 = vsel %vm66_vm0, %v1940_v21, 0.0 }
0x14f9   :  { %1945 = vadd.xlane.f32.xlu0 %v1944_v22 }
0x1564   :  { %v1943_v23 = vpop.xlane.xlu2 %1942 }
0x1565   :  { %v1947_v25 = vmul.f32 %v1943_v23, %v4606_v10 }
0x1567   :  { %v1949_v28 = vadd.f32 1e-12, %v1947_v25 }
0x1569   :  { %4364 = vrsqrt.f32 %v1949_v28  ;;  %vm1957_vm4 = vweird.f32 %v1949_v28 }
0x156c   :  { %v1946_v31 = vpop.xlane.xlu0 %1945 }
0x156d   :  { %v1948_v30 = vmul.f32 %v1946_v31, %v4606_v10 }
0x156f   :  { %v4365_v59 = vpop.eup %4364  ;;  %v1950_v32 = vadd.f32 1e-12, %v1948_v30 }
0x1570   :  { %v1952_v33 = vmul.f32 %v4365_v59, %v1949_v28  ;;  %vm1958_vm3 = vweird.f32 %v4365_v59 }
0x1571   :  { %4366 = vrsqrt.f32 %v1950_v32  ;;  %vm1959_vm5 = vmor %vm1957_vm4, %vm1958_vm3  ;;  %vm1967_vm10 = vweird.f32 %v1950_v32 }
0x1572   :  { %v1953_v34 = vmul.f32 %v4365_v59, %v1952_v33 }
0x1574   :  { %v1954_v35 = vmul.f32 0.5, %v1953_v34 }
0x1576   :  { %v1955_v36 = vsub.f32 1.5, %v1954_v35 }
0x1577   :  { %v4367_v37 = vpop.eup %4366 }
0x1578   :  { %v1956_v38 = vmul.f32 %v4365_v59, %v1955_v36  ;;  %v1962_v39 = vmul.f32 %v4367_v37, %v1950_v32  ;;  %vm1968_vm6 = vweird.f32 %v4367_v37 }
0x1579   :  { %vm1969_vm11 = vmor %vm1967_vm10, %vm1968_vm6 }
0x157a   :  { %v1960_v3 = vsel %vm1959_vm5, %v4365_v59, %v1956_v38  ;;  %v1963_v52 = vmul.f32 %v4367_v37, %v1962_v39 }
0x157b   :  { %v1971_v46 = vmul.f32 %v1960_v3, %v1937_v16 }
0x157c   :  { %v1964_v51 = vmul.f32 0.5, %v1963_v52 }
0x157d   :  { %v1974_v26 = vmul.f32 %v1973_v43, %v1971_v46 }
0x157e   :  { %v1965_v47 = vsub.f32 1.5, %v1964_v51 }
0x157f   :  { %v1977_v48 = vadd.f32 %v1976_v44, %v1974_v26 }
0x1580   :  { %v1966_v24 = vmul.f32 %v4367_v37, %v1965_v47 }
0x1581   :  { %1979 = vst.msk [vmem:[#allocation2] sm:$0xff] %vm66_vm0, %v1977_v48 }
0x1582   :  { %v1970_v49 = vsel %vm1969_vm11, %v4367_v37, %v1966_v24 }
0x1583   :  { %v1972_v50 = vmul.f32 %v1970_v49, %v1938_v20 }
0x1585   :  { %v1975_v57 = vmul.f32 %v1973_v43, %v1972_v50 }
0x1587   :  { %v1978_v61 = vadd.f32 %v1976_v44, %v1975_v57 }
0x1588   :  { %v5083_v62 = vld [vmem:[#allocation2] sm:$0xff] }
0x1589   :  { %1980 = vst.msk [vmem:[#allocation2 + $0x8] sm:$0xff] %vm66_vm0, %v1978_v61 }
0x1590   :  { %v5085_v14 = vld [vmem:[#allocation2 + $0x8] sm:$0xff] }
0x1591   :  { %v1988_v56 = vpack.c.bf16 %v5085_v14, %v5083_v62 }
0x1593   :  { %4082 = vmatmul.msk.bf16.vlgmr.msrb.gmra.mxu1 %vm66_vm0, %v1988_v56 }
0x1610   :  { %v2019_v27 = vpop.f32.mrf.mxu1 }
0x1611   :  { %v2020_v53 = vadd.f32 %v2019_v27, %v1994_v60 }
0x1613   :  { %v2029_v63 = vpack.c.bf16 %v2020_v53, %v2020_v53 }
0x1615   :  { %v2032_v45 = vunpack.c.l.b16 %v2029_v63 }
0x1617   :  { %v5096_v0 = vpack.c.b16 %v2032_v45, %v2032_v45 }
0x1618   :  { %v2021_v4 = vpop.f32.mrf.mxu1 }
0x1619   :  { %v2022_v55 = vadd.f32 %v2021_v4, %v1994_v60  ;;  %2176 = vrot.lane.b32.xlu0 %v5096_v0, %s4510_s29  ;;  %2178 = vrot.lane.b32.xlu2 %v5096_v0, %s4509_s28 }
0x161a   :  { %2034 = vrot.lane.b32.xlu1 %v5096_v0, %s4508_s27 }
0x161b   :  { %v2030_v5 = vpack.c.bf16 %v2022_v55, %v2022_v55 }
0x161d   :  { %v2056_v6 = vunpack.c.l.b16 %v2030_v5 }
0x161f   :  { %v5104_v1 = vpack.c.b16 %v2056_v6, %v2056_v6 }
0x1621   :  { %2201 = vrot.lane.b32.xlu0 %v5104_v1, %s4509_s28  ;;  %2199 = vrot.lane.b32.xlu2 %v5104_v1, %s4510_s29 }
0x1622   :  { %2058 = vrot.lane.b32.xlu1 %v5104_v1, %s4508_s27 }
0x1673   :  { %v2179_v7 = vpop.permute.xlu2 %2178 }
0x1674   :  { %v2184_v12 = vsel %vm185_vm8, %v2179_v7, 0 }
0x167b   :  { %v2200_v58 = vpop.permute.xlu2 %2199 }
0x168b   :  { %v2177_v8 = vpop.permute.xlu0 %2176 }
0x168c   :  { %v2035_v9 = vpop.permute.xlu1 %2034 }
0x168d   :  { %v2040_v11 = vsel %vm185_vm8, %v2035_v9, 0 }
0x168e   :  { %2049 = vmatpush.bf16.xpose.msrb.mxu2 %v2040_v11 }
0x1693   :  { %v2202_v15 = vpop.permute.xlu0 %2201 }
0x1694   :  { %v2207_v16 = vsel %vm185_vm8, %v2202_v15, 0  ;;  %v2059_v54 = vpop.permute.xlu1 %2058 }
0x1695   :  { %v2064_v17 = vsel %vm185_vm8, %v2059_v54, 0  ;;  %4087 = vmatmul.msk.bf16.vlgmr.msrb.gmra.mxu2 %vm185_vm8, %v2029_v63 }
0x1696   :  { %2193 = vmatpush.bf16.xpose.msra.mxu2 %v2184_v12  ;;  %2073 = vmatpush.bf16.xpose.msra.mxu3 %v2064_v17 }
0x169d   :  { %4088 = vmatmul.msk.bf16.vlgmr.msra.gmra.mxu3 %vm185_vm8, %v2030_v5 }
0x169e   :  { %2216 = vmatpush.bf16.xpose.msrb.mxu3 %v2207_v16 }
0x16a5   :  { %4091 = vmatmul.msk.bf16.vlgmr.msra.gmra.mxu2 %vm185_vm8, %v2177_v8 }
0x16ad   :  { %4092 = vmatmul.msk.bf16.vlgmr.msrb.gmra.mxu3 %vm185_vm8, %v2200_v58 }
0x1718   :  { %v2051_v19 = vpop.f32.mrf.mxu2 }
0x1719   :  { %v2079_v20 = vmul.f32 0.35355338, %v2051_v19 }
0x171b   :  { %v2081_v21 = vadd.f32 %v2079_v20, %v4674_v18 }
0x171d   :  { %v2083_v22 = vsel %vm185_vm8, %v2081_v21, -inf }
0x171e   :  { %2084 = vmax.xlane.f32.xlu1 %v2083_v22 }
0x1720   :  { %v2053_v23 = vpop.f32.mrf.mxu2  ;;  %v2075_v25 = vpop.f32.mrf.mxu3 }
0x1721   :  { %v2080_v48 = vmul.f32 0.35355338, %v2075_v25 }
0x1723   :  { %v5145_v24 = vadd.f32 %v2080_v48, %v4697_v40 }
0x1725   :  { %v2086_v49 = vsel %vm185_vm8, %v5145_v24, -inf }
0x1728   :  { %v2077_v28 = vpop.f32.mrf.mxu3  ;;  %v2195_v2 = vpop.f32.mrf.mxu2 }
0x1729   :  { %v2222_v29 = vmul.f32 0.35355338, %v2195_v2 }
0x172b   :  { %v2224_v31 = vadd.f32 %v2222_v29, %v4674_v18 }
0x172d   :  { %v2226_v30 = vsel %vm185_vm8, %v2224_v31, -inf }
0x172e   :  { %2227 = vmax.xlane.f32.xlu0 %v2226_v30 }
0x1730   :  { %v2197_v59 = vpop.f32.mrf.mxu2  ;;  %v2218_v32 = vpop.f32.mrf.mxu3 }
0x1731   :  { %v2223_v34 = vmul.f32 0.35355338, %v2218_v32 }
0x1733   :  { %v2225_v35 = vadd.f32 %v2223_v34, %v4697_v40 }
0x1735   :  { %v2229_v36 = vsel %vm185_vm8, %v2225_v35, -inf }
0x1738   :  { %v2220_v33 = vpop.f32.mrf.mxu3 }
0x1742   :  { %2133 = vrot.lane.b32.xlu0 %v5096_v0, %s4514_s3 }
0x174a   :  { %2359 = vrot.lane.b32.xlu0 %v5096_v0, %s4513_s18 }
0x1774   :  { %2230 = vmax.xlane.f32.xlu0 %v2229_v36 }
0x1788   :  { %2154 = vrot.lane.b32.xlu0 %v5104_v1, %s4514_s3 }
0x1790   :  { %2382 = vrot.lane.b32.xlu0 %v5104_v1, %s4513_s18 }
0x1791   :  { %v2085_v37 = vpop.xlane.xlu1 %2084 }
0x1792   :  { %v2089_v38 = vsub.f32 %v2081_v21, %v2085_v37 }
0x1794   :  { %v2091_v39 = vmul.f32 1.442695, %v2089_v38  ;;  %v4084_v38 = vld [vmem:[%s5550_s5 + $0x24] sm:$0xf] }
0x1796   :  { %4368 = vpow2.f32 %v2091_v39  ;;  %v2323_v39 = vsel %vm292_vm9, %v4084_v38, 0 }
0x1797   :  { %2332 = vmatpush.bf16.msrb.mxu2 %v2323_v39 }
0x179c   :  { %v4369_v42 = vpop.eup %4368 }
0x179d   :  { %v2095_v43 = vsel %vm185_vm8, %v4369_v42, 0.0 }
0x179e   :  { %2096 = vadd.xlane.f32.xlu2 %v2095_v43 }
0x17a1   :  { %v2228_v3 = vpop.xlane.xlu0 %2227 }
0x17a2   :  { %v2232_v52 = vsub.f32 %v2224_v31, %v2228_v3 }
0x17a4   :  { %v2234_v44 = vmul.f32 1.442695, %v2232_v52 }
0x17a6   :  { %4370 = vpow2.f32 %v2234_v44 }
0x17ac   :  { %v5135_v46 = vpop.eup %4370 }
0x17ad   :  { %v2238_v51 = vsel %vm185_vm8, %v5135_v46, 0.0 }
0x17ae   :  { %2239 = vadd.xlane.f32.xlu1 %v2238_v51 }
0x17b4   :  { %v2134_v26 = vpop.permute.xlu0 %2133 }
0x17b5   :  { %v2139_v47 = vsel %vm292_vm9, %v2134_v26, 0 }
0x17b6   :  { %2148 = vmatpush.bf16.msra.mxu0 %v2139_v47  ;;  %2276 = vrot.lane.b32.xlu2 %v5096_v0, %s4511_s30 }
0x17bc   :  { %v2360_v50 = vpop.permute.xlu0 %2359 }
0x17c7   :  { %2361 = vrot.lane.b32.xlu1 %v5096_v0, %s4512_s15 }
0x17df   :  { %2087 = vmax.xlane.f32.xlu2 %v2086_v49 }
0x17e7   :  { %v2231_v57 = vpop.xlane.xlu0 %2230 }
0x17e8   :  { %v2233_v61 = vsub.f32 %v2225_v35, %v2231_v57 }
0x17ea   :  { %v2236_v56 = vmul.f32 1.442695, %v2233_v61 }
0x17ec   :  { %4372 = vpow2.f32 %v2236_v56 }
0x17f2   :  { %v5149_v60 = vpop.eup %4372 }
0x17f3   :  { %v2241_v27 = vsel %vm185_vm8, %v5149_v60, 0.0 }
0x17f4   :  { %2242 = vadd.xlane.f32.xlu2 %v2241_v27 }
0x17fa   :  { %v2155_v53 = vpop.permute.xlu0 %2154 }
0x17fb   :  { %v2160_v63 = vsel %vm292_vm9, %v2155_v53, 0 }
0x17fc   :  { %2169 = vmatpush.bf16.msra.mxu1 %v2160_v63 }
0x180c   :  { %2384 = vrot.lane.b32.xlu2 %v5104_v1, %s4512_s15 }
0x1811   :  { %v2097_v45 = vpop.xlane.xlu2 %2096 }
0x1812   :  { %4374 = vrcp.f32 %v2097_v45  ;;  %v2112_v8 = vand.u32 2147483648, %v2097_v45  ;;  %v2110_v11 = vand.u32 2147483647, %v2097_v45  ;;  %vm2106_vm13 = vweird.f32 %v2097_v45 }
0x1814   :  { %2459 = vrot.lane.b32.xlu2 %v5096_v0, %s4515_s19  ;;  %v2113_v15 = vor.u32 1.1754944e-38, %v2112_v8  ;;  %vm2111_vm15 = vcmp.eq.f32.partialorder %v2110_v11, 8.507059e+37 }
0x1818   :  { %v4375_v4 = vpop.eup %4374 }
0x1819   :  { %v2102_v55 = vmul.f32 %v4375_v4, %v2097_v45  ;;  %v2277_v5 = vpop.permute.xlu2 %2276  ;;  %vm2107_vm12 = vweird.f32 %v4375_v4 }
0x181a   :  { %v2282_v6 = vsel %vm292_vm9, %v2277_v5, 0  ;;  %vm2108_vm14 = vmor %vm2106_vm13, %vm2107_vm12 }
0x181b   :  { %v2103_v7 = vsub.f32 1.0, %v2102_v55  ;;  %2291 = vmatpush.bf16.msrb.mxu0 %v2282_v6 }
0x181c   :  { %2526 = vrot.lane.b32.xlu2 %v5096_v0, %s4516_s20 }
0x181d   :  { %v2104_v9 = vmul.f32 %v4375_v4, %v2103_v7 }
0x181f   :  { %v2105_v12 = vadd.f32 %v4375_v4, %v2104_v9 }
0x1821   :  { %v2109_v16 = vsel %vm2108_vm14, %v4375_v4, %v2105_v12  ;;  %v2240_v54 = vpop.xlane.xlu1 %2239 }
0x1822   :  { %v2114_v17 = vsel %vm2111_vm15, %v2113_v15, %v2109_v16  ;;  %4376 = vrcp.f32 %v2240_v54  ;;  %v2255_v23 = vand.u32 2147483648, %v2240_v54  ;;  %v2253_v28 = vand.u32 2147483647, %v2240_v54 }
0x1823   :  { %v2115_v58 = vmul.f32 %v4369_v42, %v2114_v17  ;;  %vm2249_vm2 = vweird.f32 %v2240_v54 }
0x1824   :  { %2549 = vrot.lane.b32.xlu2 %v5104_v1, %s4516_s20  ;;  %v2256_v29 = vor.u32 1.1754944e-38, %v2255_v23  ;;  %vm2254_vm4 = vcmp.eq.f32.partialorder %v2253_v28, 8.507059e+37 }
0x1825   :  { %v2131_v19 = vpack.c.bf16 %v2115_v58, %v2115_v58 }
0x1827   :  { %4089 = vmatmul.msk.bf16.vlgmr.msra.gmra.mxu0 %vm185_vm8, %v2131_v19 }
0x1828   :  { %v4377_v20 = vpop.eup %4376 }
0x1829   :  { %v2245_v21 = vmul.f32 %v4377_v20, %v2240_v54  ;;  %vm2250_vm1 = vweird.f32 %v4377_v20 }
0x182a   :  { %vm2251_vm3 = vmor %vm2249_vm2, %vm2250_vm1 }
0x182b   :  { %v2246_v22 = vsub.f32 1.0, %v2245_v21 }
0x182c   :  { %2524 = vrot.lane.b32.xlu2 %v5096_v0, %s4517_s0 }
0x182d   :  { %v2247_v25 = vmul.f32 %v4377_v20, %v2246_v22 }
0x182f   :  { %v2248_v2 = vadd.f32 %v4377_v20, %v2247_v25 }
0x1831   :  { %v2252_v31 = vsel %vm2251_vm3, %v4377_v20, %v2248_v2 }
0x1832   :  { %v2257_v30 = vsel %vm2254_vm4, %v2256_v29, %v2252_v31 }
0x1833   :  { %v2258_v59 = vmul.f32 %v5135_v46, %v2257_v30 }
0x1834   :  { %2547 = vrot.lane.b32.xlu2 %v5104_v1, %s4517_s0 }
0x1835   :  { %v2274_v32 = vpack.c.bf16 %v2258_v59, %v2258_v59  ;;  %v2383_v59 = vpop.permute.xlu0 %2382 }
0x1837   :  { %4093 = vmatmul.msk.bf16.vlgmr.msrb.gmra.mxu0 %vm185_vm8, %v2274_v32 }
0x1839   :  { %v2362_v33 = vpop.permute.xlu1 %2361 }
0x183a   :  { %v2367_v34 = vsel %vm185_vm8, %v2362_v33, 0 }
0x183b   :  { %2376 = vmatpush.bf16.xpose.msra.mxu0 %v2367_v34 }
0x1847   :  { %4097 = vmatmul.msk.bf16.vlgmr.msra.gmra.mxu0 %vm185_vm8, %v2360_v50 }
0x1852   :  { %v2088_v35 = vpop.xlane.xlu2 %2087 }
0x1853   :  { %v2090_v36 = vsub.f32 %v5145_v24, %v2088_v35 }
0x1855   :  { %v2093_v37 = vmul.f32 1.442695, %v2090_v36 }
0x1857   :  { %4378 = vpow2.f32 %v2093_v37 }
0x185d   :  { %v4379_v42 = vpop.eup %4378 }
0x185e   :  { %v2098_v43 = vsel %vm185_vm8, %v4379_v42, 0.0 }
0x185f   :  { %2099 = vadd.xlane.f32.xlu1 %v2098_v43 }
0x1867   :  { %v2243_v3 = vpop.xlane.xlu2 %2242 }
0x1868   :  { %4380 = vrcp.f32 %v2243_v3  ;;  %v2270_v58 = vand.u32 2147483648, %v2243_v3  ;;  %vm2264_vm13 = vweird.f32 %v2243_v3  ;;  %v2268_v19 = vand.u32 2147483647, %v2243_v3 }
0x186a   :  { %v2271_v25 = vor.u32 1.1754944e-38, %v2270_v58  ;;  %vm2269_vm15 = vcmp.eq.f32.partialorder %v2268_v19, 8.507059e+37 }
0x186e   :  { %v4381_v27 = vpop.eup %4380 }
0x186f   :  { %v2385_v52 = vpop.permute.xlu2 %2384  ;;  %v2260_v45 = vmul.f32 %v4381_v27, %v2243_v3  ;;  %vm2265_vm12 = vweird.f32 %v4381_v27 }
0x1870   :  { %vm2266_vm14 = vmor %vm2264_vm13, %vm2265_vm12  ;;  %v2390_v23 = vsel %vm185_vm8, %v2385_v52, 0 }
0x1871   :  { %v2261_v7 = vsub.f32 1.0, %v2260_v45 }
0x1873   :  { %v2262_v15 = vmul.f32 %v4381_v27, %v2261_v7 }
0x1875   :  { %v2263_v17 = vadd.f32 %v4381_v27, %v2262_v15  ;;  %v4085_v15 = vld [vmem:[%s5550_s5 + $0x28] sm:$0xf] }
0x1877   :  { %v2460_v44 = vpop.permute.xlu2 %2459  ;;  %v2267_v22 = vsel %vm2266_vm14, %v4381_v27, %v2263_v17 }
0x1878   :  { %v2465_v46 = vsel %vm292_vm9, %v2460_v44, 0  ;;  %2297 = vrot.lane.b32.xlu1 %v5104_v1, %s4511_s30  ;;  %v2272_v28 = vsel %vm2269_vm15, %v2271_v25, %v2267_v22 }
0x1879   :  { %2474 = vmatpush.bf16.msra.mxu2 %v2465_v46  ;;  %v2273_v2 = vmul.f32 %v5149_v60, %v2272_v28  ;;  %v4083_v60 = vld [vmem:[%s5550_s5 + $0x20] sm:$0xf] }
0x187a   :  { %v2343_v37 = vsel %vm292_vm9, %v4083_v60, 0 }
0x187b   :  { %v2275_v31 = vpack.c.bf16 %v2273_v2, %v2273_v2  ;;  %2352 = vmatpush.bf16.msra.mxu3 %v2343_v37 }
0x187f   :  { %v2527_v29 = vpop.permute.xlu2 %2526 }
0x1880   :  { %v2532_v30 = vsel %vm185_vm8, %v2527_v29, 0 }
0x1887   :  { %v2550_v32 = vpop.permute.xlu2 %2549 }
0x1888   :  { %v2555_v46 = vsel %vm185_vm8, %v2550_v32, 0 }
0x188f   :  { %v2525_v33 = vpop.permute.xlu2 %2524 }
0x18a4   :  { %v5181_v51 = vpop.f32.mrf.mxu0 }
0x18ac   :  { %v2152_v26 = vpop.f32.mrf.mxu0 }
0x18b4   :  { %v5183_v47 = vpop.f32.mrf.mxu0 }
0x18bc   :  { %v2295_v48 = vpop.f32.mrf.mxu0 }
0x18c4   :  { %v2378_v24 = vpop.f32.mrf.mxu0 }
0x18c5   :  { %v2405_v49 = vmul.f32 0.35355338, %v2378_v24 }
0x18c7   :  { %v2407_v50 = vadd.f32 %v2405_v49, %v4674_v18 }
0x18c9   :  { %v2409_v57 = vsel %vm185_vm8, %v2407_v50, -inf }
0x18ca   :  { %2410 = vmax.xlane.f32.xlu1 %v2409_v57 }
0x18cc   :  { %v2380_v61 = vpop.f32.mrf.mxu0 }
0x18d2   :  { %v2100_v56 = vpop.xlane.xlu1 %2099 }
0x18d3   :  { %4382 = vrcp.f32 %v2100_v56  ;;  %v2127_v55 = vand.u32 2147483648, %v2100_v56  ;;  %v2125_v6 = vand.u32 2147483647, %v2100_v56  ;;  %vm2121_vm6 = vweird.f32 %v2100_v56 }
0x18d5   :  { %v2128_v9 = vor.u32 1.1754944e-38, %v2127_v55  ;;  %vm2126_vm11 = vcmp.eq.f32.partialorder %v2125_v6, 8.507059e+37 }
0x18d9   :  { %v4383_v53 = vpop.eup %4382 }
0x18da   :  { %v2117_v63 = vmul.f32 %v4383_v53, %v2100_v56  ;;  %vm2122_vm5 = vweird.f32 %v4383_v53 }
0x18db   :  { %vm2123_vm10 = vmor %vm2121_vm6, %vm2122_vm5 }
0x18dc   :  { %v2118_v4 = vsub.f32 1.0, %v2117_v63 }
0x18de   :  { %v2119_v5 = vmul.f32 %v4383_v53, %v2118_v4 }
0x18e0   :  { %v2120_v8 = vadd.f32 %v4383_v53, %v2119_v5 }
0x18e2   :  { %v2124_v11 = vsel %vm2123_vm10, %v4383_v53, %v2120_v8 }
0x18e3   :  { %v2129_v12 = vsel %vm2126_vm11, %v2128_v9, %v2124_v11 }
0x18e4   :  { %v2130_v16 = vmul.f32 %v4379_v42, %v2129_v12  ;;  %v2548_v12 = vpop.permute.xlu2 %2547 }
0x18e6   :  { %v2132_v54 = vpack.c.bf16 %v2130_v16, %v2130_v16  ;;  %v2506_v16 = vsel %vm292_vm9, %v4085_v15, 0 }
0x18e7   :  { %2515 = vmatpush.bf16.msrb.mxu0 %v2506_v16 }
0x18e8   :  { %4090 = vmatmul.msk.bf16.vlgmr.msra.gmra.mxu1 %vm185_vm8, %v2132_v54 }
0x18ea   :  { %v2298_v20 = vpop.permute.xlu1 %2297 }
0x18eb   :  { %v2303_v21 = vsel %vm292_vm9, %v2298_v20, 0 }
0x18ec   :  { %2312 = vmatpush.bf16.msrb.mxu1 %v2303_v21 }
0x18f0   :  { %2399 = vmatpush.bf16.xpose.msra.mxu1 %v2390_v23 }
0x18f8   :  { %4094 = vmatmul.msk.bf16.vlgmr.msrb.gmra.mxu1 %vm185_vm8, %v2275_v31 }
0x18f9   :  { %2541 = vmatpush.bf16.xpose.msrb.mxu1 %v2532_v30 }
0x1908   :  { %4098 = vmatmul.msk.bf16.vlgmr.msra.gmra.mxu1 %vm185_vm8, %v2383_v59 }
0x1918   :  { %4102 = vmatmul.msk.bf16.vlgmr.msrb.gmra.mxu1 %vm185_vm8, %v2525_v33 }
0x193d   :  { %v2411_v34 = vpop.xlane.xlu1 %2410 }
0x193e   :  { %v2415_v35 = vsub.f32 %v2407_v50, %v2411_v34 }
0x1940   :  { %v2417_v36 = vmul.f32 1.442695, %v2415_v35 }
0x1942   :  { %4384 = vpow2.f32 %v2417_v36 }
0x1948   :  { %v4385_v38 = vpop.eup %4384 }
0x1949   :  { %v2421_v39 = vsel %vm185_vm8, %v4385_v38, 0.0 }
0x194a   :  { %2422 = vadd.xlane.f32.xlu0 %v2421_v39 }
0x195e   :  { %2480 = vrot.lane.b32.xlu0 %v5104_v1, %s4515_s19 }
0x1965   :  { %v2171_v42 = vpop.f32.mrf.mxu1 }
0x1966   :  { %v2175_v43 = vpack.c.bf16 %v2171_v42, %v5181_v51 }
0x1968   :  { %4096 = vmatmul.msk.bf16.vlgmr.msra.gmra.mxu3 %vm185_vm8, %v2175_v43 }
0x196d   :  { %v2173_v3 = vpop.f32.mrf.mxu1 }
0x1975   :  { %v2314_v52 = vpop.f32.mrf.mxu1 }
0x1976   :  { %v2318_v44 = vpack.c.bf16 %v2314_v52, %v5183_v47 }
0x1978   :  { %4095 = vmatmul.msk.bf16.vlgmr.msrb.gmra.mxu2 %vm185_vm8, %v2318_v44 }
0x1979   :  { %2564 = vmatpush.bf16.xpose.msrb.mxu2 %v2555_v46 }
0x197d   :  { %v2316_v26 = vpop.f32.mrf.mxu1 }
0x1985   :  { %v2401_v48 = vpop.f32.mrf.mxu1 }
0x1986   :  { %v2406_v24 = vmul.f32 0.35355338, %v2401_v48 }
0x1988   :  { %v2408_v49 = vadd.f32 %v2406_v24, %v4697_v40 }
0x198a   :  { %v2412_v50 = vsel %vm185_vm8, %v2408_v49, -inf }
0x198b   :  { %2413 = vmax.xlane.f32.xlu2 %v2412_v50 }
0x198d   :  { %v2403_v51 = vpop.f32.mrf.mxu1 }
0x1995   :  { %v2543_v57 = vpop.f32.mrf.mxu1 }
0x1996   :  { %v2570_v28 = vmul.f32 0.35355338, %v2543_v57 }
0x1998   :  { %v2572_v29 = vadd.f32 %v2570_v28, %v4674_v18 }
0x199a   :  { %v2574_v31 = vsel %vm185_vm8, %v2572_v29, -inf }
0x199d   :  { %v2545_v61 = vpop.f32.mrf.mxu1 }
0x19a3   :  { %2645 = vrot.lane.b32.xlu2 %v5104_v1, %s4518_s24 }
0x19bd   :  { %v2423_v47 = vpop.xlane.xlu0 %2422 }
0x19be   :  { %4386 = vrcp.f32 %v2423_v47  ;;  %v2438_v63 = vand.u32 2147483648, %v2423_v47  ;;  %v2436_v4 = vand.u32 2147483647, %v2423_v47  ;;  %vm2432_vm2 = vweird.f32 %v2423_v47 }
0x19c0   :  { %v2439_v5 = vor.u32 1.1754944e-38, %v2438_v63  ;;  %vm2437_vm4 = vcmp.eq.f32.partialorder %v2436_v4, 8.507059e+37 }
0x19c4   :  { %v4387_v56 = vpop.eup %4386 }
0x19c5   :  { %v2428_v27 = vmul.f32 %v4387_v56, %v2423_v47  ;;  %vm2433_vm1 = vweird.f32 %v4387_v56 }
0x19c6   :  { %vm2434_vm3 = vmor %vm2432_vm2, %vm2433_vm1 }
0x19c7   :  { %v2429_v53 = vsub.f32 1.0, %v2428_v27 }
0x19c9   :  { %v2430_v45 = vmul.f32 %v4387_v56, %v2429_v53 }
0x19cb   :  { %v2431_v55 = vadd.f32 %v4387_v56, %v2430_v45 }
0x19cd   :  { %v2435_v6 = vsel %vm2434_vm3, %v4387_v56, %v2431_v55 }
0x19ce   :  { %v2440_v7 = vsel %vm2437_vm4, %v2439_v5, %v2435_v6 }
0x19cf   :  { %v2441_v8 = vmul.f32 %v4385_v38, %v2440_v7 }
0x19d0   :  { %v2481_v9 = vpop.permute.xlu0 %2480 }
0x19d1   :  { %v2457_v11 = vpack.c.bf16 %v2441_v8, %v2441_v8  ;;  %v2486_v1 = vsel %vm292_vm9, %v2481_v9, 0 }
0x19d2   :  { %2495 = vmatpush.bf16.msrb.mxu3 %v2486_v1 }
0x19d3   :  { %4099 = vmatmul.msk.bf16.vlgmr.msra.gmra.mxu2 %vm185_vm8, %v2457_v11 }
0x19e3   :  { %4103 = vmatmul.msk.bf16.vlgmr.msrb.gmra.mxu2 %vm185_vm8, %v2548_v12 }
0x19eb   :  { %v2354_v54 = vpop.f32.mrf.mxu3 }
0x19f3   :  { %v2356_v4 = vpop.f32.mrf.mxu3 }
0x19fb   :  { %v2334_v17 = vpop.f32.mrf.mxu2 }
0x19fc   :  { %v5218_v58 = vadd.f32 %v2354_v54, %v2334_v17 }
0x19fe   :  { %v2414_v19 = vpop.xlane.xlu2 %2413 }
0x19ff   :  { %v2416_v20 = vsub.f32 %v2408_v49, %v2414_v19 }
0x1a01   :  { %v2419_v21 = vmul.f32 1.442695, %v2416_v20 }
0x1a03   :  { %4388 = vpow2.f32 %v2419_v21  ;;  %v5224_v30 = vpop.f32.mrf.mxu2 }
0x1a06   :  { %v2646_v22 = vpop.permute.xlu2 %2645 }
0x1a07   :  { %v2651_v23 = vsel %vm292_vm9, %v2646_v22, 0 }
0x1a08   :  { %2660 = vmatpush.bf16.msra.mxu0 %v2651_v23 }
0x1a09   :  { %v4389_v25 = vpop.eup %4388 }
0x1a0a   :  { %v2424_v2 = vsel %vm185_vm8, %v4389_v25, 0.0 }
0x1a0b   :  { %2425 = vadd.xlane.f32.xlu1 %v2424_v2 }
0x1a13   :  { %2575 = vmax.xlane.f32.xlu1 %v2574_v31 }
0x1a56   :  { %v2476_v59 = vpop.f32.mrf.mxu2 }
0x1a5e   :  { %v2478_v32 = vpop.f32.mrf.mxu2 }
0x1a66   :  { %v2566_v33 = vpop.f32.mrf.mxu2 }
0x1a67   :  { %v2571_v34 = vmul.f32 0.35355338, %v2566_v33 }
0x1a69   :  { %v2573_v35 = vadd.f32 %v2571_v34, %v4697_v40 }
0x1a6b   :  { %v2577_v36 = vsel %vm185_vm8, %v2573_v35, -inf }
0x1a6c   :  { %2578 = vmax.xlane.f32.xlu1 %v2577_v36 }
0x1a6e   :  { %v2568_v60 = vpop.f32.mrf.mxu2 }
0x1a7e   :  { %v2426_v37 = vpop.xlane.xlu1 %2425 }
0x1a7f   :  { %4390 = vrcp.f32 %v2426_v37  ;;  %v2453_v52 = vand.u32 2147483648, %v2426_v37  ;;  %v2451_v26 = vand.u32 2147483647, %v2426_v37  ;;  %vm2447_vm6 = vweird.f32 %v2426_v37 }
0x1a81   :  { %v2454_v24 = vor.u32 1.1754944e-38, %v2453_v52  ;;  %vm2452_vm11 = vcmp.eq.f32.partialorder %v2451_v26, 8.507059e+37 }
0x1a85   :  { %v4391_v38 = vpop.eup %4390 }
0x1a86   :  { %v2443_v39 = vmul.f32 %v4391_v38, %v2426_v37  ;;  %v2576_v42 = vpop.xlane.xlu1 %2575  ;;  %vm2448_vm5 = vweird.f32 %v4391_v38 }
0x1a87   :  { %v2580_v43 = vsub.f32 %v2572_v29, %v2576_v42  ;;  %vm2449_vm10 = vmor %vm2447_vm6, %vm2448_vm5 }
0x1a88   :  { %v2444_v3 = vsub.f32 1.0, %v2443_v39  ;;  %v4086_v39 = vld [vmem:[%s5550_s5 + $0x2c] sm:$0xf] }
0x1a89   :  { %v2582_v44 = vmul.f32 1.442695, %v2580_v43  ;;  %v2671_v42 = vsel %vm292_vm9, %v4086_v39, 0 }
0x1a8a   :  { %v2445_v46 = vmul.f32 %v4391_v38, %v2444_v3  ;;  %2680 = vmatpush.bf16.msra.mxu1 %v2671_v42 }
0x1a8b   :  { %4392 = vpow2.f32 %v2582_v44 }
0x1a8c   :  { %v2446_v48 = vadd.f32 %v4391_v38, %v2445_v46 }
0x1a8e   :  { %v2450_v49 = vsel %vm2449_vm10, %v4391_v38, %v2446_v48  ;;  %v2689_v48 = vperm.slane %v5093_v13, 1 }
0x1a8f   :  { %v2455_v50 = vsel %vm2452_vm11, %v2454_v24, %v2450_v49 }
0x1a90   :  { %v2456_v51 = vmul.f32 %v4389_v25, %v2455_v50  ;;  %v2357_v50 = vadd.f32 %v2356_v4, %v5224_v30 }
0x1a91   :  { %v4393_v57 = vpop.eup %4392 }
0x1a92   :  { %v2458_v61 = vpack.c.bf16 %v2456_v51, %v2456_v51  ;;  %v2586_v47 = vsel %vm185_vm8, %v4393_v57, 0.0 }
0x1a93   :  { %2587 = vadd.xlane.f32.xlu0 %v2586_v47 }
0x1a94   :  { %4100 = vmatmul.msk.bf16.vlgmr.msrb.gmra.mxu3 %vm185_vm8, %v2458_v61 }
0x1adf   :  { %v2579_v56 = vpop.xlane.xlu1 %2578 }
0x1ae0   :  { %v2581_v27 = vsub.f32 %v2573_v35, %v2579_v56 }
0x1ae2   :  { %v2584_v53 = vmul.f32 1.442695, %v2581_v27 }
0x1ae4   :  { %4394 = vpow2.f32 %v2584_v53 }
0x1aea   :  { %v4395_v63 = vpop.eup %4394 }
0x1aeb   :  { %v2589_v45 = vsel %vm185_vm8, %v4395_v63, 0.0 }
0x1aec   :  { %2590 = vadd.xlane.f32.xlu1 %v2589_v45 }
0x1b05   :  { %2624 = vrot.lane.b32.xlu1 %v5096_v0, %s4518_s24 }
0x1b06   :  { %v2588_v7 = vpop.xlane.xlu0 %2587 }
0x1b07   :  { %4396 = vrcp.f32 %v2588_v7  ;;  %v2603_v21 = vand.u32 2147483648, %v2588_v7  ;;  %vm2597_vm15 = vweird.f32 %v2588_v7  ;;  %v2601_v23 = vand.u32 2147483647, %v2588_v7 }
0x1b09   :  { %v2604_v31 = vor.u32 1.1754944e-38, %v2603_v21  ;;  %vm2602_vm4 = vcmp.eq.f32.partialorder %v2601_v23, 8.507059e+37 }
0x1b0d   :  { %v4397_v8 = vpop.eup %4396 }
0x1b0e   :  { %v2593_v11 = vmul.f32 %v4397_v8, %v2588_v7  ;;  %vm2598_vm13 = vweird.f32 %v4397_v8 }
0x1b0f   :  { %vm2599_vm2 = vmor %vm2597_vm15, %vm2598_vm13 }
0x1b10   :  { %v2594_v1 = vsub.f32 1.0, %v2593_v11 }
0x1b12   :  { %v2595_v16 = vmul.f32 %v4397_v8, %v2594_v1 }
0x1b14   :  { %v2596_v20 = vadd.f32 %v4397_v8, %v2595_v16 }
0x1b16   :  { %v2600_v2 = vsel %vm2599_vm2, %v4397_v8, %v2596_v20 }
0x1b17   :  { %v2497_v55 = vpop.f32.mrf.mxu3  ;;  %v2605_v32 = vsel %vm2602_vm4, %v2604_v31, %v2600_v2 }
0x1b18   :  { %v2501_v5 = vpack.c.bf16 %v2497_v55, %v2476_v59  ;;  %v2606_v34 = vmul.f32 %v4393_v57, %v2605_v32  ;;  %v2738_v32 = vperm.slane %v5093_v13, 2 }
0x1b1a   :  { %4101 = vmatmul.msk.bf16.vlgmr.msrb.gmra.mxu0 %vm185_vm8, %v2501_v5  ;;  %v2622_v60 = vpack.c.bf16 %v2606_v34, %v2606_v34 }
0x1b1f   :  { %v2499_v6 = vpop.f32.mrf.mxu3 }
0x1b5f   :  { %v2591_v9 = vpop.xlane.xlu1 %2590 }
0x1b60   :  { %4398 = vrcp.f32 %v2591_v9  ;;  %v2618_v17 = vand.u32 2147483648, %v2591_v9  ;;  %v2616_v0 = vand.u32 2147483647, %v2591_v9  ;;  %vm2612_vm14 = vweird.f32 %v2591_v9 }
0x1b62   :  { %v2619_v25 = vor.u32 1.1754944e-38, %v2618_v17  ;;  %vm2617_vm3 = vcmp.eq.f32.partialorder %v2616_v0, 8.507059e+37 }
0x1b66   :  { %v4399_v12 = vpop.eup %4398 }
0x1b67   :  { %v2608_v15 = vmul.f32 %v4399_v12, %v2591_v9  ;;  %vm2613_vm12 = vweird.f32 %v4399_v12 }
0x1b68   :  { %vm2614_vm1 = vmor %vm2612_vm14, %vm2613_vm12 }
0x1b69   :  { %v2609_v54 = vsub.f32 1.0, %v2608_v15  ;;  %v4241_v15 = vld [vmem:[%s5551_s6 + $0x20] sm:$0xff] }
0x1b6b   :  { %v2610_v19 = vmul.f32 %v4399_v12, %v2609_v54 }
0x1b6d   :  { %v2611_v22 = vadd.f32 %v4399_v12, %v2610_v19 }
0x1b6f   :  { %v2615_v28 = vsel %vm2614_vm1, %v4399_v12, %v2611_v22 }
0x1b70   :  { %v2620_v29 = vsel %vm2617_vm3, %v2619_v25, %v2615_v28 }
0x1b71   :  { %v2621_v59 = vmul.f32 %v4395_v63, %v2620_v29 }
0x1b73   :  { %v2623_v33 = vpack.c.bf16 %v2621_v59, %v2621_v59 }
0x1b75   :  { %4105 = vmatmul.msk.bf16.vlgmr.msra.gmra.mxu0 %vm185_vm8, %v2623_v33 }
0x1b77   :  { %v2625_v35 = vpop.permute.xlu1 %2624 }
0x1b78   :  { %v2630_v36 = vsel %vm292_vm9, %v2625_v35, 0 }
0x1b79   :  { %2639 = vmatpush.bf16.msra.mxu3 %v2630_v36  ;;  %v2741_v36 = vperm.slane %v5093_v13, 3 }
0x1b7c   :  { %4104 = vmatmul.msk.bf16.vlgmr.msra.gmra.mxu3 %vm185_vm8, %v2622_v60 }
0x1b97   :  { %v2517_v37 = vpop.f32.mrf.mxu0 }
0x1b98   :  { %v2522_v38 = vadd.f32 %v2517_v37, %v5218_v58 }
0x1b9f   :  { %v2519_v43 = vpop.f32.mrf.mxu0 }
0x1ba0   :  { %v2523_v57 = vadd.f32 %v2519_v43, %v2357_v50 }
0x1bf2   :  { %v2662_v3 = vpop.f32.mrf.mxu0 }
0x1bfa   :  { %v2664_v52 = vpop.f32.mrf.mxu0 }
0x1bfb   :  { %v4245_v52 = vld [vmem:[%s5552_s7 + $0x50] sm:$0xff] }
0x1bff   :  { %v2641_v44 = vpop.f32.mrf.mxu3 }
0x1c00   :  { %v2666_v46 = vpack.c.bf16 %v2662_v3, %v2641_v44  ;;  %v4246_v3 = vld [vmem:[%s5552_s7 + $0x58] sm:$0xff]  ;;  %v4244_v44 = vld [vmem:[%s5552_s7 + $0x48] sm:$0xff] }
0x1c01   :  { %2840 = vmatpush.bf16.msrb.mxu3 %v4246_v3 }
0x1c02   :  { %4106 = vmatmul.msk.bf16.vlgmr.msra.gmra.mxu1 %vm185_vm8, %v2666_v46  ;;  %v2750_v46 = vperm.slane %v5093_v13, 4 }
0x1c05   :  { %2841 = vmatpush.bf16.msrb.mxu3 %v4245_v52 }
0x1c07   :  { %v2643_v26 = vpop.f32.mrf.mxu3 }
0x1c08   :  { %v4243_v26 = vld [vmem:[%s5552_s7 + $0x40] sm:$0xff] }
0x1c09   :  { %2842 = vmatpush.bf16.msrb.mxu3 %v4244_v44 }
0x1c0d   :  { %2843 = vmatpush.bf16.msrb.mxu3 %v4243_v26 }
0x1c7f   :  { %v2682_v24 = vpop.f32.mrf.mxu1 }
0x1c80   :  { %v2687_v49 = vadd.f32 %v2682_v24, %v2522_v38 }
0x1c82   :  { %v2690_v58 = vadd.f32 %v2689_v48, %v2687_v49 }
0x1c84   :  { %v2692_v51 = vadd.f32 %v2690_v58, %v5083_v62 }
0x1c86   :  { %v2694_v61 = vsel %vm66_vm0, %v2692_v51, 0.0 }
0x1c87   :  { %2695 = vadd.xlane.f32.xlu1 %v2694_v61  ;;  %v2684_v47 = vpop.f32.mrf.mxu1 }
0x1c88   :  { %v2688_v56 = vadd.f32 %v2684_v47, %v2523_v57 }
0x1c8a   :  { %v2691_v27 = vadd.f32 %v2689_v48, %v2688_v56 }
0x1c8c   :  { %v2693_v53 = vadd.f32 %v2691_v27, %v5085_v14  ;;  %v4242_v14 = vld [vmem:[%s5551_s6 + $0x28] sm:$0xff] }
0x1c8d   :  { %2772 = vmatpush.bf16.msra.mxu2 %v4242_v14  ;;  %v2808_v14 = vperm.slane %v5093_v13, 5 }
0x1c8e   :  { %v2697_v63 = vsel %vm66_vm0, %v2693_v53, 0.0 }
0x1c8f   :  { %2698 = vadd.xlane.f32.xlu0 %v2697_v63 }
0x1c91   :  { %2773 = vmatpush.bf16.msra.mxu2 %v4241_v15 }
0x1cfa   :  { %v2696_v45 = vpop.xlane.xlu1 %2695 }
0x1cfb   :  { %v2700_v55 = vmul.f32 %v2696_v45, %v4606_v10 }
0x1cfd   :  { %v2702_v5 = vsub.f32 %v2692_v51, %v2700_v55 }
0x1cff   :  { %v2704_v6 = vmul.f32 %v2702_v5, %v2702_v5 }
0x1d01   :  { %v2706_v30 = vsel %vm66_vm0, %v2704_v6, 0.0 }
0x1d02   :  { %2707 = vadd.xlane.f32.xlu2 %v2706_v30  ;;  %v2699_v62 = vpop.xlane.xlu0 %2698 }
0x1d03   :  { %v2701_v4 = vmul.f32 %v2699_v62, %v4606_v10 }
0x1d05   :  { %v2703_v7 = vsub.f32 %v2693_v53, %v2701_v4 }
0x1d07   :  { %v2705_v8 = vmul.f32 %v2703_v7, %v2703_v7 }
0x1d09   :  { %v2709_v9 = vsel %vm66_vm0, %v2705_v8, 0.0 }
0x1d0a   :  { %2710 = vadd.xlane.f32.xlu0 %v2709_v9 }
0x1d75   :  { %v2708_v11 = vpop.xlane.xlu2 %2707 }
0x1d76   :  { %v2712_v1 = vmul.f32 %v2708_v11, %v4606_v10 }
0x1d78   :  { %v2714_v12 = vadd.f32 1e-12, %v2712_v1 }
0x1d7a   :  { %4400 = vrsqrt.f32 %v2714_v12  ;;  %vm2722_vm6 = vweird.f32 %v2714_v12 }
0x1d7d   :  { %v2711_v16 = vpop.xlane.xlu0 %2710 }
0x1d7e   :  { %v2713_v54 = vmul.f32 %v2711_v16, %v4606_v10 }
0x1d80   :  { %v4401_v17 = vpop.eup %4400  ;;  %v2715_v19 = vadd.f32 1e-12, %v2713_v54 }
0x1d81   :  { %v2717_v0 = vmul.f32 %v4401_v17, %v2714_v12  ;;  %vm2723_vm5 = vweird.f32 %v4401_v17 }
0x1d82   :  { %4402 = vrsqrt.f32 %v2715_v19  ;;  %vm2724_vm10 = vmor %vm2722_vm6, %vm2723_vm5  ;;  %vm2732_vm12 = vweird.f32 %v2715_v19 }
0x1d83   :  { %v2718_v20 = vmul.f32 %v4401_v17, %v2717_v0 }
0x1d85   :  { %v2719_v21 = vmul.f32 0.5, %v2718_v20 }
0x1d87   :  { %v2720_v22 = vsub.f32 1.5, %v2719_v21 }
0x1d88   :  { %v4403_v23 = vpop.eup %4402 }
0x1d89   :  { %v2721_v25 = vmul.f32 %v4401_v17, %v2720_v22  ;;  %v2727_v28 = vmul.f32 %v4403_v23, %v2715_v19  ;;  %vm2733_vm11 = vweird.f32 %v4403_v23 }
0x1d8a   :  { %vm2734_vm13 = vmor %vm2732_vm12, %vm2733_vm11 }
0x1d8b   :  { %v2728_v2 = vmul.f32 %v4403_v23, %v2727_v28  ;;  %v2725_v29 = vsel %vm2724_vm10, %v4401_v17, %v2721_v25 }
0x1d8c   :  { %v2736_v33 = vmul.f32 %v2725_v29, %v2702_v5 }
0x1d8d   :  { %v2729_v31 = vmul.f32 0.5, %v2728_v2 }
0x1d8e   :  { %v2739_v60 = vmul.f32 %v2738_v32, %v2736_v33  ;;  %v4248_v33 = vld [vmem:[%s5549_s4 + $0x38] sm:$0xff] }
0x1d8f   :  { %v2730_v59 = vsub.f32 1.5, %v2729_v31  ;;  %2939 = vmatpush.bf16.msrb.mxu0 %v4248_v33 }
0x1d90   :  { %v2742_v39 = vadd.f32 %v2741_v36, %v2739_v60 }
0x1d91   :  { %v2731_v34 = vmul.f32 %v4403_v23, %v2730_v59 }
0x1d93   :  { %v2735_v35 = vsel %vm2734_vm13, %v4403_v23, %v2731_v34  ;;  %v4247_v34 = vld [vmem:[%s5549_s4 + $0x30] sm:$0xff]  ;;  %s1059_s4 = sld [smem:[#allocation3]] }
0x1d94   :  { %v2737_v37 = vmul.f32 %v2735_v35, %v2703_v7  ;;  %2940 = vmatpush.bf16.msrb.mxu0 %v4247_v34 }
0x1d96   :  { %v2740_v38 = vmul.f32 %v2738_v32, %v2737_v37 }
0x1d98   :  { %v2743_v42 = vadd.f32 %v2741_v36, %v2740_v38 }
0x1d9a   :  { %v2744_v43 = vpack.c.bf16 %v2743_v42, %v2742_v39 }
0x1d9c   :  { %4119 = vmatmul.msk.bf16.vlgmr.msra.gmra.mxu2 %vm66_vm0, %v2744_v43 }
0x1e1f   :  { %v2775_v48 = vpop.f32.mrf.mxu2 }
0x1e20   :  { %v2776_v24 = vadd.f32 %v2775_v48, %v2750_v46 }
0x1e22   :  { %v2782_v49 = vmul.f32 0.044715, %v2776_v24  ;;  %v2780_v30 = vmul.f32 0.5, %v2776_v24 }
0x1e24   :  { %v2784_v58 = vmul.f32 %v2782_v49, %v2776_v24 }
0x1e26   :  { %v2786_v50 = vmul.f32 %v2784_v58, %v2776_v24 }
0x1e27   :  { %v2777_v51 = vpop.f32.mrf.mxu2 }
0x1e28   :  { %v2788_v57 = vadd.f32 %v2786_v50, %v2776_v24  ;;  %v2778_v61 = vadd.f32 %v2777_v51, %v2750_v46  ;;  %v4464_v46 = vld [vmem:[%s5553_s8 + $0x10] sm:$0xff] }
0x1e29   :  { %v2896_v26 = vperm.slane %v4464_v46, 6  ;;  %v2899_v49 = vperm.slane %v4464_v46, 7 }
0x1e2a   :  { %v2783_v47 = vmul.f32 0.044715, %v2778_v61  ;;  %v2790_v56 = vmul.f32 0.7978846, %v2788_v57  ;;  %v2781_v62 = vmul.f32 0.5, %v2778_v61 }
0x1e2c   :  { %v2785_v27 = vmul.f32 %v2783_v47, %v2778_v61  ;;  %4404 = vtanh.f32 %v2790_v56  ;;  %v5296_v47 = vld [vmem:[#allocation2] ss:$8 sm:$0x3] }
0x1e2e   :  { %v2787_v53 = vmul.f32 %v2785_v27, %v2778_v61 }
0x1e30   :  { %v2789_v63 = vadd.f32 %v2787_v53, %v2778_v61 }
0x1e32   :  { %v2791_v45 = vmul.f32 0.7978846, %v2789_v63  ;;  %v4405_v55 = vpop.eup %4404 }
0x1e33   :  { %v2794_v5 = vadd.f32 1.0, %v4405_v55 }
0x1e34   :  { %4406 = vtanh.f32 %v2791_v45 }
0x1e35   :  { %v2796_v7 = vmul.f32 %v2794_v5, %v2780_v30  ;;  %v5310_v30 = vld [vmem:[%s5553_s8 + $0x18] sm:$0xff] }
0x1e3a   :  { %v4407_v6 = vpop.eup %4406 }
0x1e3b   :  { %v2795_v4 = vadd.f32 1.0, %v4407_v6 }
0x1e3d   :  { %v2797_v8 = vmul.f32 %v2795_v4, %v2781_v62  ;;  %v2917_v62 = vperm.slane %v5310_v30, 0 }
0x1e3f   :  { %v2798_v9 = vpack.c.bf16 %v2797_v8, %v2796_v7 }
0x1e41   :  { %4144 = vmatmul.msk.bf16.vlgmr.msrb.gmra.mxu3 %vm986_vm7, %v2798_v9 }
0x1ec4   :  { %v2845_v11 = vpop.f32.mrf.mxu3 }
0x1ec5   :  { %v2846_v1 = vadd.f32 %v2845_v11, %v2808_v14 }
0x1ec7   :  { %v2850_v12 = vadd.f32 %v2846_v1, %v2742_v39 }
0x1ec9   :  { %v2852_v15 = vsel %vm66_vm0, %v2850_v12, 0.0 }
0x1eca   :  { %2853 = vadd.xlane.f32.xlu0 %v2852_v15 }
0x1ecc   :  { %v2847_v16 = vpop.f32.mrf.mxu3 }
0x1ecd   :  { %v2848_v54 = vadd.f32 %v2847_v16, %v2808_v14 }
0x1ecf   :  { %v2851_v17 = vadd.f32 %v2848_v54, %v2743_v42 }
0x1ed1   :  { %v2855_v19 = vsel %vm66_vm0, %v2851_v17, 0.0 }
0x1ed2   :  { %2856 = vadd.xlane.f32.xlu0 %v2855_v19 }
0x1f3d   :  { %v2854_v0 = vpop.xlane.xlu0 %2853 }
0x1f3e   :  { %v2858_v20 = vmul.f32 %v2854_v0, %v4606_v10 }
0x1f40   :  { %v2860_v21 = vsub.f32 %v2850_v12, %v2858_v20 }
0x1f42   :  { %v2862_v22 = vmul.f32 %v2860_v21, %v2860_v21 }
0x1f44   :  { %v2864_v23 = vsel %vm66_vm0, %v2862_v22, 0.0 }
0x1f45   :  { %2865 = vadd.xlane.f32.xlu0 %v2864_v23  ;;  %v2857_v13 = vpop.xlane.xlu0 %2856 }
0x1f46   :  { %v2859_v25 = vmul.f32 %v2857_v13, %v4606_v10 }
0x1f48   :  { %v2861_v28 = vsub.f32 %v2851_v17, %v2859_v25 }
0x1f4a   :  { %v2863_v2 = vmul.f32 %v2861_v28, %v2861_v28 }
0x1f4c   :  { %v2867_v29 = vsel %vm66_vm0, %v2863_v2, 0.0 }
0x1f4d   :  { %2868 = vadd.xlane.f32.xlu1 %v2867_v29 }
0x1fb8   :  { %v2866_v31 = vpop.xlane.xlu0 %2865 }
0x1fb9   :  { %v2870_v59 = vmul.f32 %v2866_v31, %v4606_v10 }
0x1fbb   :  { %v2872_v32 = vadd.f32 1e-12, %v2870_v59 }
0x1fbd   :  { %4408 = vrsqrt.f32 %v2872_v32  ;;  %vm2880_vm15 = vweird.f32 %v2872_v32 }
0x1fc0   :  { %v2869_v35 = vpop.xlane.xlu1 %2868 }
0x1fc1   :  { %v2871_v36 = vmul.f32 %v2869_v35, %v4606_v10 }
0x1fc3   :  { %v4409_v60 = vpop.eup %4408  ;;  %v2873_v37 = vadd.f32 1e-12, %v2871_v36 }
0x1fc4   :  { %v2875_v38 = vmul.f32 %v4409_v60, %v2872_v32  ;;  %vm2881_vm14 = vweird.f32 %v4409_v60 }
0x1fc5   :  { %4410 = vrsqrt.f32 %v2873_v37  ;;  %vm2882_vm1 = vmor %vm2880_vm15, %vm2881_vm14  ;;  %vm2890_vm3 = vweird.f32 %v2873_v37 }
0x1fc6   :  { %v2876_v39 = vmul.f32 %v4409_v60, %v2875_v38 }
0x1fc8   :  { %v2877_v42 = vmul.f32 0.5, %v2876_v39 }
0x1fca   :  { %v2878_v43 = vsub.f32 1.5, %v2877_v42 }
0x1fcb   :  { %v4411_v3 = vpop.eup %4410 }
0x1fcc   :  { %v2879_v52 = vmul.f32 %v4409_v60, %v2878_v43  ;;  %v2885_v44 = vmul.f32 %v4411_v3, %v2873_v37  ;;  %vm2891_vm2 = vweird.f32 %v4411_v3 }
0x1fcd   :  { %vm2892_vm4 = vmor %vm2890_vm3, %vm2891_vm2 }
0x1fce   :  { %v2883_v48 = vsel %vm2882_vm1, %v4409_v60, %v2879_v52  ;;  %v2886_v24 = vmul.f32 %v4411_v3, %v2885_v44 }
0x1fcf   :  { %v2894_v58 = vmul.f32 %v2883_v48, %v2860_v21 }
0x1fd0   :  { %v2887_v50 = vmul.f32 0.5, %v2886_v24 }
0x1fd1   :  { %v2897_v51 = vmul.f32 %v2896_v26, %v2894_v58 }
0x1fd2   :  { %v2888_v57 = vsub.f32 1.5, %v2887_v50 }
0x1fd3   :  { %v2900_v61 = vadd.f32 %v2899_v49, %v2897_v51 }
0x1fd4   :  { %v2889_v56 = vmul.f32 %v4411_v3, %v2888_v57 }
0x1fd5   :  { %2902 = vst.msk [vmem:[#allocation2] sm:$0xff] %vm66_vm0, %v2900_v61 }
0x1fd6   :  { %v2893_v27 = vsel %vm2892_vm4, %v4411_v3, %v2889_v56 }
0x1fd7   :  { %v2895_v53 = vmul.f32 %v2893_v27, %v2861_v28 }
0x1fd9   :  { %v2898_v63 = vmul.f32 %v2896_v26, %v2895_v53 }
0x1fdb   :  { %v2901_v45 = vadd.f32 %v2899_v49, %v2898_v63 }
0x1fdc   :  { %v5300_v55 = vld [vmem:[#allocation2] sm:$0xff] }
0x1fdd   :  { %2903 = vst.msk [vmem:[#allocation2 + $0x8] sm:$0xff] %vm66_vm0, %v2901_v45 }
0x1fe4   :  { %v5302_v5 = vld [vmem:[#allocation2 + $0x8] sm:$0xff] }
0x1fe5   :  { %v2911_v6 = vpack.c.bf16 %v5302_v5, %v5300_v55 }
0x1fe7   :  { %4158 = vmatmul.msk.bf16.vlgmr.msrb.gmra.mxu0 %vm66_vm0, %v2911_v6 }
0x2064   :  { %v2942_v4 = vpop.f32.mrf.mxu0 }
0x2065   :  { %v2943_v7 = vadd.f32 %v2942_v4, %v2917_v62 }
0x2067   :  { %v2952_v8 = vpack.c.bf16 %v2943_v7, %v2943_v7 }
0x2069   :  { %v2955_v9 = vunpack.c.l.b16 %v2952_v8 }
0x206b   :  { %v5313_v14 = vpack.c.b16 %v2955_v9, %v2955_v9 }
0x206c   :  { %v2944_v11 = vpop.f32.mrf.mxu0 }
0x206d   :  { %v2945_v1 = vadd.f32 %v2944_v11, %v2917_v62  ;;  %3099 = vrot.lane.b32.xlu1 %v5313_v14, %s4510_s29  ;;  %3101 = vrot.lane.b32.xlu2 %v5313_v14, %s4509_s28 }
0x206e   :  { %2957 = vrot.lane.b32.xlu0 %v5313_v14, %s4508_s27 }
0x206f   :  { %v2953_v12 = vpack.c.bf16 %v2945_v1, %v2945_v1 }
0x2071   :  { %v2979_v15 = vunpack.c.l.b16 %v2953_v12 }
0x2073   :  { %v5321_v16 = vpack.c.b16 %v2979_v15, %v2979_v15 }
0x2075   :  { %3124 = vrot.lane.b32.xlu2 %v5321_v16, %s4509_s28 }
0x2076   :  { %2981 = vrot.lane.b32.xlu0 %v5321_v16, %s4508_s27 }
0x207e   :  { %3122 = vrot.lane.b32.xlu0 %v5321_v16, %s4510_s29 }
0x20c7   :  { %v3102_v54 = vpop.permute.xlu2 %3101 }
0x20c8   :  { %v3107_v0 = vsel %vm185_vm8, %v3102_v54, 0 }
0x20cf   :  { %v3125_v20 = vpop.permute.xlu2 %3124 }
0x20d0   :  { %v3130_v23 = vsel %vm185_vm8, %v3125_v20, 0 }
0x20df   :  { %v3100_v13 = vpop.permute.xlu1 %3099 }
0x20e0   :  { %v2958_v17 = vpop.permute.xlu0 %2957 }
0x20e1   :  { %v2963_v19 = vsel %vm185_vm8, %v2958_v17, 0 }
0x20e2   :  { %2972 = vmatpush.bf16.xpose.msrb.mxu1 %v2963_v19 }
0x20e8   :  { %v2982_v21 = vpop.permute.xlu0 %2981 }
0x20e9   :  { %v2987_v22 = vsel %vm185_vm8, %v2982_v21, 0  ;;  %4163 = vmatmul.msk.bf16.vlgmr.msrb.gmra.mxu1 %vm185_vm8, %v2952_v8 }
0x20ea   :  { %3116 = vmatpush.bf16.xpose.msra.mxu1 %v3107_v0  ;;  %2996 = vmatpush.bf16.xpose.msrb.mxu2 %v2987_v22 }
0x20f0   :  { %v3123_v25 = vpop.permute.xlu0 %3122 }
0x20f1   :  { %4164 = vmatmul.msk.bf16.vlgmr.msrb.gmra.mxu2 %vm185_vm8, %v2953_v12 }
0x20f2   :  { %3139 = vmatpush.bf16.xpose.msra.mxu2 %v3130_v23 }
0x20f9   :  { %4167 = vmatmul.msk.bf16.vlgmr.msra.gmra.mxu1 %vm185_vm8, %v3100_v13 }
0x2101   :  { %4168 = vmatmul.msk.bf16.vlgmr.msra.gmra.mxu2 %vm185_vm8, %v3123_v25 }
0x2166   :  { %v2974_v28 = vpop.f32.mrf.mxu1 }
0x2167   :  { %v3002_v2 = vmul.f32 0.35355338, %v2974_v28 }
0x2169   :  { %v3004_v29 = vadd.f32 %v3002_v2, %v4674_v18 }
0x216b   :  { %v3006_v31 = vsel %vm185_vm8, %v3004_v29, -inf }
0x216c   :  { %3007 = vmax.xlane.f32.xlu1 %v3006_v31 }
0x216e   :  { %v2976_v59 = vpop.f32.mrf.mxu1 }
0x2174   :  { %v2998_v32 = vpop.f32.mrf.mxu2 }
0x2175   :  { %v3003_v42 = vmul.f32 0.35355338, %v2998_v32 }
0x2176   :  { %v3118_v33 = vpop.f32.mrf.mxu1 }
0x2177   :  { %v3145_v34 = vmul.f32 0.35355338, %v3118_v33  ;;  %v3005_v43 = vadd.f32 %v3003_v42, %v4697_v40 }
0x2179   :  { %v3147_v35 = vadd.f32 %v3145_v34, %v4674_v18  ;;  %v3009_v3 = vsel %vm185_vm8, %v3005_v43, -inf }
0x217b   :  { %v3149_v36 = vsel %vm185_vm8, %v3147_v35, -inf }
0x217c   :  { %3150 = vmax.xlane.f32.xlu2 %v3149_v36  ;;  %v3000_v60 = vpop.f32.mrf.mxu2 }
0x217e   :  { %v3120_v37 = vpop.f32.mrf.mxu1 }
0x2184   :  { %v3141_v38 = vpop.f32.mrf.mxu2 }
0x2185   :  { %v3146_v63 = vmul.f32 0.35355338, %v3141_v38 }
0x2187   :  { %v5358_v45 = vadd.f32 %v3146_v63, %v4697_v40 }
0x2189   :  { %v3152_v4 = vsel %vm185_vm8, %v5358_v45, -inf }
0x218c   :  { %v3143_v39 = vpop.f32.mrf.mxu2 }
0x2194   :  { %3056 = vrot.lane.b32.xlu2 %v5313_v14, %s4514_s3 }
0x21bd   :  { %3010 = vmax.xlane.f32.xlu2 %v3009_v3 }
0x21df   :  { %v3008_v52 = vpop.xlane.xlu1 %3007 }
0x21e0   :  { %v3012_v44 = vsub.f32 %v3004_v29, %v3008_v52  ;;  %v4160_v52 = vld [vmem:[%s5550_s5 + $0x34] sm:$0xf] }
0x21e2   :  { %v3014_v46 = vmul.f32 1.442695, %v3012_v44  ;;  %v3246_v44 = vsel %vm292_vm9, %v4160_v52, 0 }
0x21e3   :  { %3255 = vmatpush.bf16.msrb.mxu1 %v3246_v44 }
0x21e4   :  { %4412 = vpow2.f32 %v3014_v46 }
0x21ea   :  { %v4413_v26 = vpop.eup %4412 }
0x21eb   :  { %v3018_v48 = vsel %vm185_vm8, %v4413_v26, 0.0 }
0x21ec   :  { %3019 = vadd.xlane.f32.xlu0 %v3018_v48 }
0x21ef   :  { %v3151_v24 = vpop.xlane.xlu2 %3150 }
0x21f0   :  { %v3155_v49 = vsub.f32 %v3147_v35, %v3151_v24 }
0x21f2   :  { %v3157_v58 = vmul.f32 1.442695, %v3155_v49 }
0x21f4   :  { %4414 = vpow2.f32 %v3157_v58 }
0x21f7   :  { %v3057_v50 = vpop.permute.xlu2 %3056 }
0x21f8   :  { %v3062_v51 = vsel %vm292_vm9, %v3057_v50, 0 }
0x21f9   :  { %3071 = vmatpush.bf16.msra.mxu3 %v3062_v51 }
0x21fa   :  { %v5347_v57 = vpop.eup %4414 }
0x21fb   :  { %v3161_v61 = vsel %vm185_vm8, %v5347_v57, 0.0 }
0x21fc   :  { %3162 = vadd.xlane.f32.xlu1 %v3161_v61 }
0x2200   :  { %3199 = vrot.lane.b32.xlu0 %v5313_v14, %s4511_s30 }
0x2208   :  { %3282 = vrot.lane.b32.xlu0 %v5313_v14, %s4513_s18 }
0x2215   :  { %3284 = vrot.lane.b32.xlu1 %v5313_v14, %s4512_s15 }
0x2230   :  { %v3011_v56 = vpop.xlane.xlu2 %3010 }
0x2231   :  { %v3013_v27 = vsub.f32 %v3005_v43, %v3011_v56 }
0x2233   :  { %v3016_v53 = vmul.f32 1.442695, %v3013_v27 }
0x2235   :  { %4416 = vpow2.f32 %v3016_v53 }
0x223b   :  { %v5360_v6 = vpop.eup %4416 }
0x223c   :  { %v3021_v62 = vsel %vm185_vm8, %v5360_v6, 0.0 }
0x223d   :  { %3022 = vadd.xlane.f32.xlu0 %v3021_v62 }
0x223f   :  { %3153 = vmax.xlane.f32.xlu1 %v3152_v4 }
0x2251   :  { %3220 = vrot.lane.b32.xlu0 %v5321_v16, %s4511_s30 }
0x2258   :  { %3077 = vrot.lane.b32.xlu1 %v5321_v16, %s4514_s3 }
0x2259   :  { %3305 = vrot.lane.b32.xlu0 %v5321_v16, %s4513_s18 }
0x225f   :  { %v3020_v7 = vpop.xlane.xlu0 %3019 }
0x2260   :  { %4418 = vrcp.f32 %v3020_v7  ;;  %v3035_v1 = vand.u32 2147483648, %v3020_v7  ;;  %v3033_v15 = vand.u32 2147483647, %v3020_v7  ;;  %vm3029_vm6 = vweird.f32 %v3020_v7 }
0x2261   :  { %3382 = vrot.lane.b32.xlu0 %v5313_v14, %s4515_s19 }
0x2262   :  { %v3036_v17 = vor.u32 1.1754944e-38, %v3035_v1  ;;  %vm3034_vm11 = vcmp.eq.f32.partialorder %v3033_v15, 8.507059e+37 }
0x2266   :  { %v4419_v8 = vpop.eup %4418 }
0x2267   :  { %v3025_v9 = vmul.f32 %v4419_v8, %v3020_v7  ;;  %vm3030_vm5 = vweird.f32 %v4419_v8 }
0x2268   :  { %vm3031_vm10 = vmor %vm3029_vm6, %vm3030_vm5 }
0x2269   :  { %v3026_v11 = vsub.f32 1.0, %v3025_v9  ;;  %3449 = vrot.lane.b32.xlu0 %v5313_v14, %s4516_s20 }
0x226b   :  { %v3027_v12 = vmul.f32 %v4419_v8, %v3026_v11 }
0x226d   :  { %v3028_v54 = vadd.f32 %v4419_v8, %v3027_v12 }
0x226f   :  { %v3032_v19 = vsel %vm3031_vm10, %v4419_v8, %v3028_v54  ;;  %v3163_v0 = vpop.xlane.xlu1 %3162 }
0x2270   :  { %v3037_v20 = vsel %vm3034_vm11, %v3036_v17, %v3032_v19  ;;  %4420 = vrcp.f32 %v3163_v0  ;;  %v3178_v29 = vand.u32 2147483648, %v3163_v0  ;;  %v3176_v59 = vand.u32 2147483647, %v3163_v0 }
0x2271   :  { %v3038_v21 = vmul.f32 %v4413_v26, %v3037_v20  ;;  %3472 = vrot.lane.b32.xlu0 %v5321_v16, %s4516_s20  ;;  %vm3172_vm13 = vweird.f32 %v3163_v0 }
0x2272   :  { %v3200_v22 = vpop.permute.xlu0 %3199  ;;  %v3179_v33 = vor.u32 1.1754944e-38, %v3178_v29  ;;  %vm3177_vm15 = vcmp.eq.f32.partialorder %v3176_v59, 8.507059e+37 }
0x2273   :  { %v3054_v23 = vpack.c.bf16 %v3038_v21, %v3038_v21  ;;  %v3205_v13 = vsel %vm292_vm9, %v3200_v22, 0 }
0x2274   :  { %3214 = vmatpush.bf16.msrb.mxu3 %v3205_v13 }
0x2275   :  { %4165 = vmatmul.msk.bf16.vlgmr.msra.gmra.mxu3 %vm185_vm8, %v3054_v23 }
0x2276   :  { %v4421_v25 = vpop.eup %4420 }
0x2277   :  { %v3168_v28 = vmul.f32 %v4421_v25, %v3163_v0  ;;  %vm3173_vm12 = vweird.f32 %v4421_v25 }
0x2278   :  { %vm3174_vm14 = vmor %vm3172_vm13, %vm3173_vm12 }
0x2279   :  { %v3169_v2 = vsub.f32 1.0, %v3168_v28  ;;  %3447 = vrot.lane.b32.xlu0 %v5313_v14, %s4517_s0 }
0x227a   :  { %v3283_v39 = vpop.permute.xlu0 %3282 }
0x227b   :  { %v3170_v31 = vmul.f32 %v4421_v25, %v3169_v2 }
0x227d   :  { %v3171_v32 = vadd.f32 %v4421_v25, %v3170_v31 }
0x227f   :  { %v3175_v34 = vsel %vm3174_vm14, %v4421_v25, %v3171_v32 }
0x2280   :  { %v3180_v35 = vsel %vm3177_vm15, %v3179_v33, %v3175_v34 }
0x2281   :  { %v3181_v36 = vmul.f32 %v5347_v57, %v3180_v35  ;;  %3470 = vrot.lane.b32.xlu0 %v5321_v16, %s4517_s0 }
0x2283   :  { %v3197_v60 = vpack.c.bf16 %v3181_v36, %v3181_v36 }
0x2285   :  { %4169 = vmatmul.msk.bf16.vlgmr.msrb.gmra.mxu3 %vm185_vm8, %v3197_v60 }
0x2287   :  { %v3285_v37 = vpop.permute.xlu1 %3284 }
0x2288   :  { %v3290_v38 = vsel %vm185_vm8, %v3285_v37, 0 }
0x2289   :  { %3403 = vrot.lane.b32.xlu0 %v5321_v16, %s4515_s19  ;;  %3299 = vmatpush.bf16.xpose.msra.mxu3 %v3290_v38 }
0x2295   :  { %4173 = vmatmul.msk.bf16.vlgmr.msra.gmra.mxu3 %vm185_vm8, %v3283_v39 }
0x22b0   :  { %v3023_v42 = vpop.xlane.xlu0 %3022 }
0x22b1   :  { %4422 = vrcp.f32 %v3023_v42  ;;  %v3050_v57 = vand.u32 2147483648, %v3023_v42  ;;  %vm3044_vm2 = vweird.f32 %v3023_v42  ;;  %v3048_v61 = vand.u32 2147483647, %v3023_v42 }
0x22b2   :  { %v3154_v43 = vpop.xlane.xlu1 %3153 }
0x22b3   :  { %v3156_v3 = vsub.f32 %v5358_v45, %v3154_v43  ;;  %v3051_v53 = vor.u32 1.1754944e-38, %v3050_v57  ;;  %vm3049_vm4 = vcmp.eq.f32.partialorder %v3048_v61, 8.507059e+37 }
0x22b5   :  { %v3159_v46 = vmul.f32 1.442695, %v3156_v3 }
0x22b7   :  { %v4423_v26 = vpop.eup %4422  ;;  %4424 = vpow2.f32 %v3159_v46 }
0x22b8   :  { %v3040_v48 = vmul.f32 %v4423_v26, %v3023_v42  ;;  %vm3045_vm1 = vweird.f32 %v4423_v26 }
0x22b9   :  { %vm3046_vm3 = vmor %vm3044_vm2, %vm3045_vm1 }
0x22ba   :  { %v3041_v24 = vsub.f32 1.0, %v3040_v48 }
0x22bc   :  { %v3042_v49 = vmul.f32 %v4423_v26, %v3041_v24 }
0x22bd   :  { %v5395_v58 = vpop.eup %4424 }
0x22be   :  { %v3164_v50 = vsel %vm185_vm8, %v5395_v58, 0.0  ;;  %v3043_v51 = vadd.f32 %v4423_v26, %v3042_v49 }
0x22bf   :  { %3165 = vadd.xlane.f32.xlu2 %v3164_v50 }
0x22c0   :  { %v3047_v56 = vsel %vm3046_vm3, %v4423_v26, %v3043_v51 }
0x22c1   :  { %v3052_v63 = vsel %vm3049_vm4, %v3051_v53, %v3047_v56 }
0x22c2   :  { %v3053_v45 = vmul.f32 %v5360_v6, %v3052_v63  ;;  %v4159_v6 = vld [vmem:[%s5550_s5 + $0x30] sm:$0xf] }
0x22c3   :  { %v3221_v27 = vpop.permute.xlu0 %3220  ;;  %v3266_v15 = vsel %vm292_vm9, %v4159_v6, 0 }
0x22c4   :  { %v3226_v8 = vsel %vm292_vm9, %v3221_v27, 0  ;;  %v3055_v9 = vpack.c.bf16 %v3053_v45, %v3053_v45  ;;  %3275 = vmatpush.bf16.msrb.mxu2 %v3266_v15 }
0x22ca   :  { %v3078_v62 = vpop.permute.xlu1 %3077 }
0x22cb   :  { %v3083_v4 = vsel %vm292_vm9, %v3078_v62, 0  ;;  %v3306_v7 = vpop.permute.xlu0 %3305 }
0x22cc   :  { %3092 = vmatpush.bf16.msra.mxu0 %v3083_v4 }
0x22cf   :  { %4166 = vmatmul.msk.bf16.vlgmr.msra.gmra.mxu0 %vm185_vm8, %v3055_v9 }
0x22d0   :  { %3235 = vmatpush.bf16.msrb.mxu0 %v3226_v8 }
0x22d3   :  { %v3383_v11 = vpop.permute.xlu0 %3382 }
0x22d4   :  { %v3388_v1 = vsel %vm292_vm9, %v3383_v11, 0 }
0x22d5   :  { %3397 = vmatpush.bf16.msra.mxu1 %v3388_v1 }
0x22d7   :  { %3307 = vrot.lane.b32.xlu2 %v5321_v16, %s4512_s15 }
0x22db   :  { %v3450_v12 = vpop.permute.xlu0 %3449 }
0x22dc   :  { %v3455_v46 = vsel %vm185_vm8, %v3450_v12, 0 }
0x22e3   :  { %v3473_v54 = vpop.permute.xlu0 %3472 }
0x22e4   :  { %v3478_v27 = vsel %vm185_vm8, %v3473_v54, 0 }
0x22eb   :  { %v3448_v17 = vpop.permute.xlu0 %3447 }
0x22f3   :  { %v5410_v19 = vpop.permute.xlu0 %3470 }
0x22f8   :  { %v3073_v0 = vpop.f32.mrf.mxu3 }
0x22fb   :  { %v3404_v20 = vpop.permute.xlu0 %3403 }
0x22fc   :  { %v3409_v21 = vsel %vm292_vm9, %v3404_v20, 0 }
0x22fd   :  { %3418 = vmatpush.bf16.msra.mxu2 %v3409_v21 }
0x2300   :  { %v3075_v22 = vpop.f32.mrf.mxu3 }
0x2308   :  { %v3216_v23 = vpop.f32.mrf.mxu3 }
0x2310   :  { %v3218_v13 = vpop.f32.mrf.mxu3 }
0x2318   :  { %v3301_v25 = vpop.f32.mrf.mxu3 }
0x2319   :  { %v3328_v28 = vmul.f32 0.35355338, %v3301_v25 }
0x231b   :  { %v3330_v2 = vadd.f32 %v3328_v28, %v4674_v18 }
0x231d   :  { %v3332_v29 = vsel %vm185_vm8, %v3330_v2, -inf }
0x231e   :  { %3333 = vmax.xlane.f32.xlu1 %v3332_v29 }
0x2320   :  { %v3303_v31 = vpop.f32.mrf.mxu3 }
0x2332   :  { %v3166_v59 = vpop.xlane.xlu2 %3165 }
0x2333   :  { %4426 = vrcp.f32 %v3166_v59  ;;  %v3193_v60 = vand.u32 2147483648, %v3166_v59  ;;  %v3191_v38 = vand.u32 2147483647, %v3166_v59  ;;  %vm3187_vm6 = vweird.f32 %v3166_v59 }
0x2335   :  { %v3194_v42 = vor.u32 1.1754944e-38, %v3193_v60  ;;  %vm3192_vm11 = vcmp.eq.f32.partialorder %v3191_v38, 8.507059e+37 }
0x2339   :  { %v4427_v32 = vpop.eup %4426 }
0x233a   :  { %v3183_v33 = vmul.f32 %v4427_v32, %v3166_v59  ;;  %v3308_v34 = vpop.permute.xlu2 %3307  ;;  %vm3188_vm5 = vweird.f32 %v4427_v32 }
0x233b   :  { %v3313_v35 = vsel %vm185_vm8, %v3308_v34, 0  ;;  %vm3189_vm10 = vmor %vm3187_vm6, %vm3188_vm5 }
0x233c   :  { %v3184_v36 = vsub.f32 1.0, %v3183_v33  ;;  %3322 = vmatpush.bf16.xpose.msra.mxu0 %v3313_v35 }
0x233e   :  { %v3185_v37 = vmul.f32 %v4427_v32, %v3184_v36 }
0x2340   :  { %v3186_v39 = vadd.f32 %v4427_v32, %v3185_v37 }
0x2342   :  { %v3190_v43 = vsel %vm3189_vm10, %v4427_v32, %v3186_v39 }
0x2343   :  { %v3195_v3 = vsel %vm3192_vm11, %v3194_v42, %v3190_v43 }
0x2344   :  { %v3196_v52 = vmul.f32 %v5395_v58, %v3195_v3 }
0x2346   :  { %v3198_v44 = vpack.c.bf16 %v3196_v52, %v3196_v52 }
0x2348   :  { %4170 = vmatmul.msk.bf16.vlgmr.msrb.gmra.mxu0 %vm185_vm8, %v3198_v44 }
0x2349   :  { %3464 = vmatpush.bf16.xpose.msrb.mxu0 %v3455_v46 }
0x234c   :  { %v3094_v26 = vpop.f32.mrf.mxu0 }
0x234d   :  { %v3098_v48 = vpack.c.bf16 %v3094_v26, %v3073_v0 }
0x234f   :  { %4172 = vmatmul.msk.bf16.vlgmr.msrb.gmra.mxu2 %vm185_vm8, %v3098_v48 }
0x2354   :  { %v3096_v24 = vpop.f32.mrf.mxu0 }
0x2358   :  { %4174 = vmatmul.msk.bf16.vlgmr.msra.gmra.mxu0 %vm185_vm8, %v3306_v7 }
0x2368   :  { %4178 = vmatmul.msk.bf16.vlgmr.msrb.gmra.mxu0 %vm185_vm8, %v3448_v17 }
0x2391   :  { %v3334_v49 = vpop.xlane.xlu1 %3333 }
0x2392   :  { %v3338_v50 = vsub.f32 %v3330_v2, %v3334_v49 }
0x2394   :  { %v3340_v51 = vmul.f32 1.442695, %v3338_v50 }
0x2396   :  { %4428 = vpow2.f32 %v3340_v51 }
0x239c   :  { %v4429_v58 = vpop.eup %4428 }
0x239d   :  { %v3344_v57 = vsel %vm185_vm8, %v4429_v58, 0.0 }
0x239e   :  { %3345 = vadd.xlane.f32.xlu2 %v3344_v57 }
0x23c5   :  { %v3237_v61 = vpop.f32.mrf.mxu0 }
0x23c6   :  { %v3241_v56 = vpack.c.bf16 %v3237_v61, %v3216_v23 }
0x23c8   :  { %4171 = vmatmul.msk.bf16.vlgmr.msrb.gmra.mxu1 %vm185_vm8, %v3241_v56 }
0x23c9   :  { %3487 = vmatpush.bf16.xpose.msrb.mxu1 %v3478_v27 }
0x23cd   :  { %v3239_v53 = vpop.f32.mrf.mxu0 }
0x23d5   :  { %v3324_v63 = vpop.f32.mrf.mxu0 }
0x23d6   :  { %v3329_v45 = vmul.f32 0.35355338, %v3324_v63 }
0x23d8   :  { %v3331_v62 = vadd.f32 %v3329_v45, %v4697_v40 }
0x23da   :  { %v3335_v4 = vsel %vm185_vm8, %v3331_v62, -inf }
0x23db   :  { %3336 = vmax.xlane.f32.xlu1 %v3335_v4 }
0x23dd   :  { %v3326_v7 = vpop.f32.mrf.mxu0 }
0x23e5   :  { %v3466_v8 = vpop.f32.mrf.mxu0 }
0x23e6   :  { %v3493_v9 = vmul.f32 0.35355338, %v3466_v8 }
0x23e8   :  { %v3495_v11 = vadd.f32 %v3493_v9, %v4674_v18 }
0x23ea   :  { %v3497_v1 = vsel %vm185_vm8, %v3495_v11, -inf }
0x23eb   :  { %3498 = vmax.xlane.f32.xlu1 %v3497_v1 }
0x23ed   :  { %v3468_v12 = vpop.f32.mrf.mxu0 }
0x2411   :  { %v3346_v6 = vpop.xlane.xlu2 %3345 }
0x2412   :  { %4430 = vrcp.f32 %v3346_v6  ;;  %v3361_v0 = vand.u32 2147483648, %v3346_v6  ;;  %v3359_v21 = vand.u32 2147483647, %v3346_v6  ;;  %vm3355_vm13 = vweird.f32 %v3346_v6 }
0x2414   :  { %v3362_v23 = vor.u32 1.1754944e-38, %v3361_v0  ;;  %vm3360_vm15 = vcmp.eq.f32.partialorder %v3359_v21, 8.507059e+37 }
0x2418   :  { %v4431_v15 = vpop.eup %4430 }
0x2419   :  { %v3351_v54 = vmul.f32 %v4431_v15, %v3346_v6  ;;  %vm3356_vm12 = vweird.f32 %v4431_v15 }
0x241a   :  { %vm3357_vm14 = vmor %vm3355_vm13, %vm3356_vm12 }
0x241b   :  { %v3352_v17 = vsub.f32 1.0, %v3351_v54 }
0x241d   :  { %v3353_v20 = vmul.f32 %v4431_v15, %v3352_v17 }
0x241f   :  { %v3354_v22 = vadd.f32 %v4431_v15, %v3353_v20 }
0x2421   :  { %v3358_v13 = vsel %vm3357_vm14, %v4431_v15, %v3354_v22 }
0x2422   :  { %v3363_v18 = vsel %vm3360_vm15, %v3362_v23, %v3358_v13  ;;  %v4161_v23 = vld [vmem:[%s5550_s5 + $0x38] sm:$0xf] }
0x2423   :  { %v3364_v25 = vmul.f32 %v4429_v58, %v3363_v18  ;;  %v3429_v13 = vsel %vm292_vm9, %v4161_v23, 0  ;;  %v3277_v18 = vpop.f32.mrf.mxu2  ;;  %v4249_v23 = vld [vmem:[%s5551_s6 + $0x30] sm:$0xff] }
0x2424   :  { %3438 = vmatpush.bf16.msrb.mxu3 %v3429_v13 }
0x2425   :  { %v3380_v28 = vpack.c.bf16 %v3364_v25, %v3364_v25 }
0x2427   :  { %4175 = vmatmul.msk.bf16.vlgmr.msra.gmra.mxu1 %vm185_vm8, %v3380_v28 }
0x242b   :  { %v3279_v25 = vpop.f32.mrf.mxu2 }
0x2437   :  { %4179 = vmatmul.msk.bf16.vlgmr.msrb.gmra.mxu1 %vm185_vm8, %v5410_v19 }
0x2445   :  { %v5434_v37 = vpop.f32.mrf.mxu1 }
0x244d   :  { %v5436_v38 = vpop.f32.mrf.mxu1 }
0x244e   :  { %v3337_v2 = vpop.xlane.xlu1 %3336 }
0x244f   :  { %v3339_v29 = vsub.f32 %v3331_v62, %v3337_v2 }
0x2451   :  { %v3342_v31 = vmul.f32 1.442695, %v3339_v29 }
0x2453   :  { %4432 = vpow2.f32 %v3342_v31 }
0x2459   :  { %v4433_v59 = vpop.eup %4432 }
0x245a   :  { %v3347_v32 = vsel %vm185_vm8, %v4433_v59, 0.0 }
0x245b   :  { %3348 = vadd.xlane.f32.xlu2 %v3347_v32 }
0x245e   :  { %v3499_v33 = vpop.xlane.xlu1 %3498 }
0x245f   :  { %v3503_v34 = vsub.f32 %v3495_v11, %v3499_v33 }
0x2461   :  { %v3505_v35 = vmul.f32 1.442695, %v3503_v34 }
0x2463   :  { %4434 = vpow2.f32 %v3505_v35 }
0x2469   :  { %v4435_v36 = vpop.eup %4434 }
0x246a   :  { %v3509_v60 = vsel %vm185_vm8, %v4435_v36, 0.0 }
0x246b   :  { %3510 = vadd.xlane.f32.xlu0 %v3509_v60 }
0x24a4   :  { %v5438_v19 = vpop.f32.mrf.mxu1 }
0x24ac   :  { %v3401_v39 = vpop.f32.mrf.mxu1 }
0x24b4   :  { %v3489_v42 = vpop.f32.mrf.mxu1 }
0x24b5   :  { %v3494_v43 = vmul.f32 0.35355338, %v3489_v42 }
0x24b7   :  { %v3496_v3 = vadd.f32 %v3494_v43, %v4697_v40 }
0x24b9   :  { %v3500_v52 = vsel %vm185_vm8, %v3496_v3, -inf }
0x24ba   :  { %3501 = vmax.xlane.f32.xlu2 %v3500_v52 }
0x24bc   :  { %v3491_v44 = vpop.f32.mrf.mxu1 }
0x24ce   :  { %v3349_v46 = vpop.xlane.xlu2 %3348 }
0x24cf   :  { %4436 = vrcp.f32 %v3349_v46  ;;  %v3376_v49 = vand.u32 2147483648, %v3349_v46  ;;  %v3374_v51 = vand.u32 2147483647, %v3349_v46  ;;  %vm3370_vm2 = vweird.f32 %v3349_v46 }
0x24d1   :  { %v3377_v40 = vor.u32 1.1754944e-38, %v3376_v49  ;;  %vm3375_vm4 = vcmp.eq.f32.partialorder %v3374_v51, 8.507059e+37  ;;  %v4162_v49 = vld [vmem:[%s5550_s5 + $0x3c] sm:$0xf] }
0x24d2   :  { %3547 = vrot.lane.b32.xlu2 %v5313_v14, %s4518_s24 }
0x24d5   :  { %v4437_v26 = vpop.eup %4436 }
0x24d6   :  { %v3366_v48 = vmul.f32 %v4437_v26, %v3349_v46  ;;  %vm3371_vm1 = vweird.f32 %v4437_v26 }
0x24d7   :  { %vm3372_vm3 = vmor %vm3370_vm2, %vm3371_vm1 }
0x24d8   :  { %v3367_v24 = vsub.f32 1.0, %v3366_v48 }
0x24da   :  { %v3368_v50 = vmul.f32 %v4437_v26, %v3367_v24 }
0x24dc   :  { %v3369_v58 = vadd.f32 %v4437_v26, %v3368_v50  ;;  %v3594_v50 = vsel %vm292_vm9, %v4162_v49, 0  ;;  %v4254_v49 = vld [vmem:[%s5552_s7 + $0x78] sm:$0xff] }
0x24dd   :  { %3603 = vmatpush.bf16.msra.mxu0 %v3594_v50  ;;  %v4253_v50 = vld [vmem:[%s5552_s7 + $0x70] sm:$0xff] }
0x24de   :  { %v3373_v57 = vsel %vm3372_vm3, %v4437_v26, %v3369_v58  ;;  %v3511_v53 = vpop.xlane.xlu0 %3510  ;;  %v3278_v26 = vadd.f32 %v3277_v18, %v5434_v37 }
0x24df   :  { %v3378_v61 = vsel %vm3375_vm4, %v3377_v40, %v3373_v57  ;;  %4438 = vrcp.f32 %v3511_v53  ;;  %v3526_v7 = vand.u32 2147483648, %v3511_v53  ;;  %vm3520_vm6 = vweird.f32 %v3511_v53 }
0x24e0   :  { %v3379_v56 = vmul.f32 %v4433_v59, %v3378_v61  ;;  %v3524_v8 = vand.u32 2147483647, %v3511_v53  ;;  %v3612_v61 = vperm.slane %v5310_v30, 1 }
0x24e1   :  { %v3527_v12 = vor.u32 1.1754944e-38, %v3526_v7 }
0x24e2   :  { %v3381_v27 = vpack.c.bf16 %v3379_v56, %v3379_v56  ;;  %vm3525_vm11 = vcmp.eq.f32.partialorder %v3524_v8, 8.507059e+37 }
0x24e4   :  { %4176 = vmatmul.msk.bf16.vlgmr.msra.gmra.mxu2 %vm185_vm8, %v3381_v27 }
0x24e5   :  { %v4439_v14 = vpop.eup %4438 }
0x24e6   :  { %v3516_v63 = vmul.f32 %v4439_v14, %v3511_v53  ;;  %vm3521_vm5 = vweird.f32 %v4439_v14  ;;  %v3280_v53 = vadd.f32 %v3279_v25, %v5436_v38 }
0x24e7   :  { %vm3522_vm10 = vmor %vm3520_vm6, %vm3521_vm5 }
0x24e8   :  { %v3517_v45 = vsub.f32 1.0, %v3516_v63 }
0x24ea   :  { %v3518_v62 = vmul.f32 %v4439_v14, %v3517_v45 }
0x24ec   :  { %v3519_v4 = vadd.f32 %v4439_v14, %v3518_v62 }
0x24ee   :  { %v3523_v11 = vsel %vm3522_vm10, %v4439_v14, %v3519_v4 }
0x24ef   :  { %v3528_v15 = vsel %vm3525_vm11, %v3527_v12, %v3523_v11 }
0x24f0   :  { %v3529_v54 = vmul.f32 %v4435_v36, %v3528_v15 }
0x24f2   :  { %v3545_v21 = vpack.c.bf16 %v3529_v54, %v3529_v54 }
0x252d   :  { %v3502_v9 = vpop.xlane.xlu2 %3501 }
0x252e   :  { %v3504_v1 = vsub.f32 %v3496_v3, %v3502_v9 }
0x2530   :  { %v3507_v6 = vmul.f32 1.442695, %v3504_v1 }
0x2532   :  { %4440 = vpow2.f32 %v3507_v6 }
0x2535   :  { %v3548_v17 = vpop.permute.xlu2 %3547 }
0x2536   :  { %v3553_v0 = vsel %vm292_vm9, %v3548_v17, 0 }
0x2537   :  { %3562 = vmatpush.bf16.msrb.mxu2 %v3553_v0 }
0x2538   :  { %v4441_v20 = vpop.eup %4440 }
0x2539   :  { %v3512_v22 = vsel %vm185_vm8, %v4441_v20, 0.0 }
0x253a   :  { %3513 = vadd.xlane.f32.xlu1 %v3512_v22  ;;  %4180 = vmatmul.msk.bf16.vlgmr.msrb.gmra.mxu2 %vm185_vm8, %v3545_v21 }
0x253b   :  { %3763 = vmatpush.bf16.msra.mxu2 %v4254_v49  ;;  %v4465_v49 = vld [vmem:[%s5553_s8 + $0x18] sm:$0xff]  ;;  %s4145_s8 = sld [smem:[#allocation3 + $0x2]] }
0x253f   :  { %3764 = vmatpush.bf16.msra.mxu2 %v4253_v50  ;;  %v3819_v50 = vperm.slane %v4465_v49, 6 }
0x2553   :  { %3568 = vrot.lane.b32.xlu1 %v5321_v16, %s4518_s24 }
0x2567   :  { %v3420_v28 = vpop.f32.mrf.mxu2 }
0x2568   :  { %v3424_v2 = vpack.c.bf16 %v3420_v28, %v5438_v19 }
0x256a   :  { %4177 = vmatmul.msk.bf16.vlgmr.msrb.gmra.mxu3 %vm185_vm8, %v3424_v2 }
0x256f   :  { %v3422_v29 = vpop.f32.mrf.mxu2 }
0x25ad   :  { %v3514_v31 = vpop.xlane.xlu1 %3513 }
0x25ae   :  { %4442 = vrcp.f32 %v3514_v31  ;;  %v3541_v36 = vand.u32 2147483648, %v3514_v31  ;;  %vm3535_vm13 = vweird.f32 %v3514_v31  ;;  %v3539_v60 = vand.u32 2147483647, %v3514_v31 }
0x25b0   :  { %v3542_v42 = vor.u32 1.1754944e-38, %v3541_v36  ;;  %vm3540_vm15 = vcmp.eq.f32.partialorder %v3539_v60, 8.507059e+37 }
0x25b4   :  { %v4443_v59 = vpop.eup %4442 }
0x25b5   :  { %v3531_v32 = vmul.f32 %v4443_v59, %v3514_v31  ;;  %vm3536_vm12 = vweird.f32 %v4443_v59 }
0x25b6   :  { %vm3537_vm14 = vmor %vm3535_vm13, %vm3536_vm12  ;;  %vm3834_vm13 = vcmask 254976  }
0x25b7   :  { %v3532_v33 = vsub.f32 1.0, %v3531_v32 }
0x25b9   :  { %v3533_v34 = vmul.f32 %v4443_v59, %v3532_v33 }
0x25bb   :  { %v3534_v35 = vadd.f32 %v4443_v59, %v3533_v34 }
0x25bd   :  { %v3564_v16 = vpop.f32.mrf.mxu2  ;;  %v3538_v39 = vsel %vm3537_vm14, %v4443_v59, %v3534_v35 }
0x25be   :  { %v3543_v19 = vsel %vm3540_vm15, %v3542_v42, %v3538_v39  ;;  %v3661_v39 = vperm.slane %v5310_v30, 2 }
0x25bf   :  { %v3544_v43 = vmul.f32 %v4441_v20, %v3543_v19 }
0x25c1   :  { %v3546_v46 = vpack.c.bf16 %v3544_v43, %v3544_v43 }
0x25c5   :  { %v3569_v3 = vpop.permute.xlu1 %3568  ;;  %v3566_v52 = vpop.f32.mrf.mxu2 }
0x25c6   :  { %v3574_v44 = vsel %vm292_vm9, %v3569_v3, 0  ;;  %v3664_v3 = vperm.slane %v5310_v30, 3 }
0x25c7   :  { %3583 = vmatpush.bf16.msra.mxu3 %v3574_v44 }
0x25ca   :  { %4181 = vmatmul.msk.bf16.vlgmr.msra.gmra.mxu3 %vm185_vm8, %v3546_v46 }
0x25ed   :  { %v3440_v48 = vpop.f32.mrf.mxu3 }
0x25ee   :  { %v3445_v24 = vadd.f32 %v3440_v48, %v3278_v26 }
0x25f5   :  { %v3442_v51 = vpop.f32.mrf.mxu3 }
0x25f6   :  { %v3446_v63 = vadd.f32 %v3442_v51, %v3280_v53  ;;  %v4252_v51 = vld [vmem:[%s5552_s7 + $0x68] sm:$0xff] }
0x25f7   :  { %3765 = vmatpush.bf16.msra.mxu2 %v4252_v51 }
0x264d   :  { %v3585_v58 = vpop.f32.mrf.mxu3 }
0x264e   :  { %v3589_v40 = vpack.c.bf16 %v3585_v58, %v3564_v16  ;;  %v3673_v58 = vperm.slane %v5310_v30, 4 }
0x2650   :  { %4182 = vmatmul.msk.bf16.vlgmr.msra.gmra.mxu0 %vm185_vm8, %v3589_v40  ;;  %v4251_v40 = vld [vmem:[%s5552_s7 + $0x60] sm:$0xff] }
0x2651   :  { %3766 = vmatpush.bf16.msra.mxu2 %v4251_v40  ;;  %v3822_v40 = vperm.slane %v4465_v49, 7 }
0x2655   :  { %v3587_v57 = vpop.f32.mrf.mxu3 }
0x26cd   :  { %v3605_v56 = vpop.f32.mrf.mxu0 }
0x26ce   :  { %v3610_v27 = vadd.f32 %v3605_v56, %v3445_v24 }
0x26d0   :  { %v3613_v37 = vadd.f32 %v3612_v61, %v3610_v27 }
0x26d2   :  { %v3615_v14 = vadd.f32 %v3613_v37, %v5300_v55 }
0x26d4   :  { %v3617_v45 = vsel %vm66_vm0, %v3615_v14, 0.0 }
0x26d5   :  { %3618 = vadd.xlane.f32.xlu2 %v3617_v45  ;;  %v3607_v62 = vpop.f32.mrf.mxu0 }
0x26d6   :  { %v3611_v4 = vadd.f32 %v3607_v62, %v3446_v63 }
0x26d8   :  { %v3614_v7 = vadd.f32 %v3612_v61, %v3611_v4 }
0x26da   :  { %v3616_v8 = vadd.f32 %v3614_v7, %v5302_v5  ;;  %v4250_v5 = vld [vmem:[%s5551_s6 + $0x38] sm:$0xff] }
0x26db   :  { %3695 = vmatpush.bf16.msra.mxu1 %v4250_v5 }
0x26dc   :  { %v3620_v9 = vsel %vm66_vm0, %v3616_v8, 0.0 }
0x26dd   :  { %3621 = vadd.xlane.f32.xlu1 %v3620_v9 }
0x26df   :  { %3696 = vmatpush.bf16.msra.mxu1 %v4249_v23 }
0x2748   :  { %v3619_v11 = vpop.xlane.xlu2 %3618 }
0x2749   :  { %v3623_v1 = vmul.f32 %v3619_v11, %v4606_v10 }
0x274b   :  { %v3625_v12 = vsub.f32 %v3615_v14, %v3623_v1 }
0x274d   :  { %v3627_v6 = vmul.f32 %v3625_v12, %v3625_v12 }
0x274f   :  { %v3629_v38 = vsel %vm66_vm0, %v3627_v6, 0.0 }
0x2750   :  { %3630 = vadd.xlane.f32.xlu0 %v3629_v38  ;;  %v3622_v55 = vpop.xlane.xlu1 %3621 }
0x2751   :  { %v3624_v15 = vmul.f32 %v3622_v55, %v4606_v10 }
0x2753   :  { %v3626_v54 = vsub.f32 %v3616_v8, %v3624_v15 }
0x2755   :  { %v3628_v17 = vmul.f32 %v3626_v54, %v3626_v54 }
0x2757   :  { %v3632_v0 = vsel %vm66_vm0, %v3628_v17, 0.0 }
0x2758   :  { %3633 = vadd.xlane.f32.xlu0 %v3632_v0  ;;  %v3731_v0 = vperm.slane %v5310_v30, 5 }
0x27c3   :  { %v3631_v20 = vpop.xlane.xlu0 %3630 }
0x27c4   :  { %v3635_v21 = vmul.f32 %v3631_v20, %v4606_v10 }
0x27c6   :  { %v3637_v22 = vadd.f32 1e-12, %v3635_v21 }
0x27c8   :  { %4444 = vrsqrt.f32 %v3637_v22  ;;  %vm3645_vm9 = vweird.f32 %v3637_v22 }
0x27cb   :  { %v3634_v13 = vpop.xlane.xlu0 %3633 }
0x27cc   :  { %v3636_v18 = vmul.f32 %v3634_v13, %v4606_v10 }
0x27ce   :  { %v4445_v25 = vpop.eup %4444  ;;  %v3638_v28 = vadd.f32 1e-12, %v3636_v18 }
0x27cf   :  { %v3640_v2 = vmul.f32 %v4445_v25, %v3637_v22  ;;  %vm3646_vm8 = vweird.f32 %v4445_v25 }
0x27d0   :  { %4446 = vrsqrt.f32 %v3638_v28  ;;  %vm3647_vm1 = vmor %vm3645_vm9, %vm3646_vm8  ;;  %vm3655_vm3 = vweird.f32 %v3638_v28  ;;  %vm3896_vm9 = vcmask 17408  }
0x27d1   :  { %v3641_v29 = vmul.f32 %v4445_v25, %v3640_v2 }
0x27d3   :  { %v3642_v31 = vmul.f32 0.5, %v3641_v29 }
0x27d5   :  { %v3643_v59 = vsub.f32 1.5, %v3642_v31 }
0x27d6   :  { %v4447_v32 = vpop.eup %4446 }
0x27d7   :  { %v3644_v33 = vmul.f32 %v4445_v25, %v3643_v59  ;;  %v3650_v34 = vmul.f32 %v4447_v32, %v3638_v28  ;;  %vm3656_vm2 = vweird.f32 %v4447_v32 }
0x27d8   :  { %vm3657_vm4 = vmor %vm3655_vm3, %vm3656_vm2 }
0x27d9   :  { %v3651_v35 = vmul.f32 %v4447_v32, %v3650_v34  ;;  %v3648_v36 = vsel %vm3647_vm1, %v4445_v25, %v3644_v33 }
0x27da   :  { %v3659_v42 = vmul.f32 %v3648_v36, %v3625_v12 }
0x27db   :  { %v3652_v60 = vmul.f32 0.5, %v3651_v35 }
0x27dc   :  { %v3662_v52 = vmul.f32 %v3661_v39, %v3659_v42 }
0x27dd   :  { %v3653_v16 = vsub.f32 1.5, %v3652_v60 }
0x27de   :  { %v3665_v26 = vadd.f32 %v3664_v3, %v3662_v52 }
0x27df   :  { %v3654_v19 = vmul.f32 %v4447_v32, %v3653_v16 }
0x27e1   :  { %v3658_v43 = vsel %vm3657_vm4, %v4447_v32, %v3654_v19 }
0x27e2   :  { %v3660_v44 = vmul.f32 %v3658_v43, %v3626_v54 }
0x27e4   :  { %v3663_v46 = vmul.f32 %v3661_v39, %v3660_v44 }
0x27e6   :  { %v3666_v48 = vadd.f32 %v3664_v3, %v3663_v46 }
0x27e8   :  { %v3667_v24 = vpack.c.bf16 %v3666_v48, %v3665_v26 }
0x27ea   :  { %4195 = vmatmul.msk.bf16.vlgmr.msra.gmra.mxu1 %vm66_vm0, %v3667_v24 }
0x2867   :  { %v3698_v57 = vpop.f32.mrf.mxu1 }
0x2868   :  { %v3699_v61 = vadd.f32 %v3698_v57, %v3673_v58 }
0x286a   :  { %v3705_v56 = vmul.f32 0.044715, %v3699_v61  ;;  %v3703_v6 = vmul.f32 0.5, %v3699_v61 }
0x286c   :  { %v3707_v27 = vmul.f32 %v3705_v56, %v3699_v61 }
0x286e   :  { %v3709_v37 = vmul.f32 %v3707_v27, %v3699_v61 }
0x286f   :  { %v3700_v53 = vpop.f32.mrf.mxu1 }
0x2870   :  { %v3711_v14 = vadd.f32 %v3709_v37, %v3699_v61  ;;  %v3701_v63 = vadd.f32 %v3700_v53, %v3673_v58 }
0x2872   :  { %v3706_v45 = vmul.f32 0.044715, %v3701_v63  ;;  %v3713_v62 = vmul.f32 0.7978846, %v3711_v14  ;;  %v3704_v38 = vmul.f32 0.5, %v3701_v63 }
0x2873   :  { %v2904_v14 = vld [vmem:[#allocation2] ss:$8 sm:$0x3] }
0x2874   :  { %v3708_v4 = vmul.f32 %v3706_v45, %v3701_v63  ;;  %4448 = vtanh.f32 %v3713_v62 }
0x2876   :  { %v3710_v7 = vmul.f32 %v3708_v4, %v3701_v63 }
0x2878   :  { %v3712_v8 = vadd.f32 %v3710_v7, %v3701_v63  ;;  %v1983_v7 = vstv %s4069_s21 }
0x287a   :  { %v3714_v9 = vmul.f32 0.7978846, %v3712_v8  ;;  %v4449_v11 = vpop.eup %4448  ;;  %v1060_v8 = vstv %s1059_s4 }
0x287b   :  { %v3717_v1 = vadd.f32 1.0, %v4449_v11  ;;  %v1984_v11 = vmul.f32 %v1983_v7, %v5296_v47  ;;  %v3867_v47 = vld [vmem:[%s5557_s12 + $0x10] sm:$0xff] }
0x287c   :  { %4450 = vtanh.f32 %v3714_v9  ;;  %v2906_v9 = vstv %s4145_s8 }
0x287d   :  { %v3719_v15 = vmul.f32 %v3717_v1, %v3703_v6  ;;  %v1061_v1 = vmul.f32 %v1060_v8, %v5079_v41  ;;  %v3829_v6 = vstv %s4221_s22  ;;  %v3868_v41 = vld [vmem:[%s5557_s12 + $0x18] sm:$0xff] }
0x287e   :  { %3888 = vmatpush.msrb.mxu3 %v3868_v41 }
0x2880   :  { %3889 = vmatpush.msrb.mxu3 %v3867_v47 }
0x2882   :  { %v4451_v12 = vpop.eup %4450 }
0x2883   :  { %v3718_v55 = vadd.f32 1.0, %v4451_v12  ;;  %v2907_v12 = vmul.f32 %v2906_v9, %v2904_v14 }
0x2885   :  { %v3720_v54 = vmul.f32 %v3718_v55, %v3704_v38  ;;  %v1985_v38 = vadd.f32 %v1984_v11, %v1061_v1 }
0x2887   :  { %v3721_v17 = vpack.c.bf16 %v3720_v54, %v3719_v15  ;;  %v2908_v15 = vadd.f32 %v2907_v12, %v1985_v38 }
0x2889   :  { %4220 = vmatmul.msk.bf16.vlgmr.msra.gmra.mxu2 %vm986_vm7, %v3721_v17 }
0x290c   :  { %v3768_v5 = vpop.f32.mrf.mxu2 }
0x290d   :  { %v3769_v20 = vadd.f32 %v3768_v5, %v3731_v0 }
0x290f   :  { %v3773_v21 = vadd.f32 %v3769_v20, %v3665_v26 }
0x2911   :  { %v3775_v22 = vsel %vm66_vm0, %v3773_v21, 0.0 }
0x2912   :  { %3776 = vadd.xlane.f32.xlu0 %v3775_v22 }
0x2914   :  { %v3770_v23 = vpop.f32.mrf.mxu2 }
0x2915   :  { %v3771_v13 = vadd.f32 %v3770_v23, %v3731_v0 }
0x2917   :  { %v3774_v18 = vadd.f32 %v3771_v13, %v3666_v48  ;;  %v3866_v13 = vld [vmem:[%s5557_s12 + $0x8] sm:$0xff] }
0x2918   :  { %3890 = vmatpush.msrb.mxu3 %v3866_v13 }
0x2919   :  { %v3778_v25 = vsel %vm66_vm0, %v3774_v18, 0.0 }
0x291a   :  { %3779 = vadd.xlane.f32.xlu0 %v3778_v25 }
0x2985   :  { %v3777_v28 = vpop.xlane.xlu0 %3776 }
0x2986   :  { %v3781_v2 = vmul.f32 %v3777_v28, %v4606_v10 }
0x2988   :  { %v3783_v29 = vsub.f32 %v3773_v21, %v3781_v2 }
0x298a   :  { %v3785_v31 = vmul.f32 %v3783_v29, %v3783_v29 }
0x298c   :  { %v3787_v59 = vsel %vm66_vm0, %v3785_v31, 0.0 }
0x298d   :  { %3788 = vadd.xlane.f32.xlu2 %v3787_v59  ;;  %v3780_v30 = vpop.xlane.xlu0 %3779 }
0x298e   :  { %v3782_v32 = vmul.f32 %v3780_v30, %v4606_v10 }
0x2990   :  { %v3784_v33 = vsub.f32 %v3774_v18, %v3782_v32  ;;  %v3865_v18 = vld [vmem:[%s5557_s12] sm:$0xff] }
0x2991   :  { %3891 = vmatpush.msrb.mxu3 %v3865_v18 }
0x2992   :  { %v3786_v34 = vmul.f32 %v3784_v33, %v3784_v33 }
0x2994   :  { %v3790_v35 = vsel %vm66_vm0, %v3786_v34, 0.0  ;;  %v4271_v34 = vld [vmem:[%s5555_s10] ss:$0 sm:$0xff]  ;;  %s4519_s10 = smov [#allocation6]  }
0x2995   :  { %3791 = vadd.xlane.f32.xlu0 %v3790_v35 }
0x2a00   :  { %v3789_v36 = vpop.xlane.xlu2 %3788 }
0x2a01   :  { %v3793_v60 = vmul.f32 %v3789_v36, %v4606_v10 }
0x2a03   :  { %v3795_v16 = vadd.f32 1e-12, %v3793_v60 }
0x2a05   :  { %4452 = vrsqrt.f32 %v3795_v16  ;;  %vm3803_vm5 = vweird.f32 %v3795_v16 }
0x2a08   :  { %v3792_v39 = vpop.xlane.xlu0 %3791 }
0x2a09   :  { %v3794_v42 = vmul.f32 %v3792_v39, %v4606_v10  ;;  %v4273_v39 = vld [vmem:[%s5558_s13] ss:$0 sm:$0xff] }
0x2a0b   :  { %v4453_v19 = vpop.eup %4452  ;;  %v3796_v43 = vadd.f32 1e-12, %v3794_v42 }
0x2a0c   :  { %v3798_v3 = vmul.f32 %v4453_v19, %v3795_v16  ;;  %vm3804_vm7 = vweird.f32 %v4453_v19 }
0x2a0d   :  { %4454 = vrsqrt.f32 %v3796_v43  ;;  %vm3805_vm6 = vmor %vm3803_vm5, %vm3804_vm7  ;;  %vm3813_vm11 = vweird.f32 %v3796_v43 }
0x2a0e   :  { %v3799_v52 = vmul.f32 %v4453_v19, %v3798_v3 }
0x2a10   :  { %v3800_v44 = vmul.f32 0.5, %v3799_v52 }
0x2a12   :  { %v3801_v46 = vsub.f32 1.5, %v3800_v44 }
0x2a13   :  { %v4455_v26 = vpop.eup %4454 }
0x2a14   :  { %v3802_v48 = vmul.f32 %v4453_v19, %v3801_v46  ;;  %v3808_v24 = vmul.f32 %v4455_v26, %v3796_v43  ;;  %vm3814_vm10 = vweird.f32 %v4455_v26 }
0x2a15   :  { %vm3815_vm12 = vmor %vm3813_vm11, %vm3814_vm10 }
0x2a16   :  { %v3806_v51 = vsel %vm3805_vm6, %v4453_v19, %v3802_v48  ;;  %v3809_v58 = vmul.f32 %v4455_v26, %v3808_v24 }
0x2a17   :  { %v3817_v57 = vmul.f32 %v3806_v51, %v3783_v29 }
0x2a18   :  { %v3810_v61 = vmul.f32 0.5, %v3809_v58 }
0x2a19   :  { %v3820_v56 = vmul.f32 %v3819_v50, %v3817_v57 }
0x2a1a   :  { %v3811_v27 = vsub.f32 1.5, %v3810_v61 }
0x2a1b   :  { %v3823_v37 = vadd.f32 %v3822_v40, %v3820_v56 }
0x2a1c   :  { %v3812_v53 = vmul.f32 %v4455_v26, %v3811_v27 }
0x2a1d   :  { %3825 = vst.msk [vmem:[#allocation2] sm:$0xff] %vm66_vm0, %v3823_v37 }
0x2a1e   :  { %v3816_v63 = vsel %vm3815_vm12, %v4455_v26, %v3812_v53 }
0x2a1f   :  { %v3818_v45 = vmul.f32 %v3816_v63, %v3784_v33 }
0x2a21   :  { %v3821_v62 = vmul.f32 %v3819_v50, %v3818_v45 }
0x2a23   :  { %v3824_v4 = vadd.f32 %v3822_v40, %v3821_v62 }
0x2a25   :  { %3826 = vst.msk [vmem:[#allocation2 + $0x8] sm:$0xff] %vm66_vm0, %v3824_v4 }
0x2a2c   :  { %v3827_v55 = vld [vmem:[#allocation2] ss:$8 sm:$0x3] }
0x2a2d   :  { %v3830_v54 = vmul.f32 %v3829_v6, %v3827_v55 }
0x2a2f   :  { %v3831_v17 = vadd.f32 %v3830_v54, %v2908_v15 }
0x2a31   :  { %v3835_v0 = vsel %vm3834_vm13, %v3831_v17, 0.0 }
0x2a32   :  { %3836 = vadd.xlane.f32.xlu2 %v3835_v0 }
0x2aa5   :  { %v3837_v5 = vpop.xlane.xlu2 %3836 }
0x2aa6   :  { %v3838_v20 = vmul.f32 %v3837_v5, %v4606_v10 }
0x2aa8   :  { %v3839_v21 = vsub.f32 %v3831_v17, %v3838_v20 }
0x2aaa   :  { %v3840_v22 = vmul.f32 %v3839_v21, %v3839_v21 }
0x2aac   :  { %v3841_v23 = vsel %vm3834_vm13, %v3840_v22, 0.0 }
0x2aad   :  { %3842 = vadd.xlane.f32.xlu1 %v3841_v23 }
0x2b20   :  { %v3843_v25 = vpop.xlane.xlu1 %3842 }
0x2b21   :  { %v3844_v28 = vmul.f32 %v3843_v25, %v4606_v10  ;;  %v4272_v10 = vld [vmem:[%s5556_s11] ss:$0 sm:$0xff]  ;;  %s3927_s11 = sshll.u32 %s4519_s10, 4  ;;  %s3928_s11 = int_to_ptr.vmem [resolvable:$true] %s3927_s11 }
0x2b23   :  { %v3845_v2 = vadd.f32 1e-05, %v3844_v28 }
0x2b25   :  { %4456 = vrsqrt.f32 %v3845_v2  ;;  %vm3852_vm15 = vweird.f32 %v3845_v2 }
0x2b2b   :  { %v4457_v29 = vpop.eup %4456 }
0x2b2c   :  { %v3847_v31 = vmul.f32 %v4457_v29, %v3845_v2  ;;  %vm3853_vm14 = vweird.f32 %v4457_v29 }
0x2b2d   :  { %vm3854_vm8 = vmor %vm3852_vm15, %vm3853_vm14 }
0x2b2e   :  { %v3848_v59 = vmul.f32 %v4457_v29, %v3847_v31 }
0x2b30   :  { %v3849_v30 = vmul.f32 0.5, %v3848_v59 }
0x2b32   :  { %v3850_v32 = vsub.f32 1.5, %v3849_v30 }
0x2b34   :  { %v3851_v33 = vmul.f32 %v4457_v29, %v3850_v32 }
0x2b36   :  { %v3855_v35 = vsel %vm3854_vm8, %v4457_v29, %v3851_v33 }
0x2b37   :  { %v3856_v36 = vmul.f32 %v3855_v35, %v3839_v21 }
0x2b39   :  { %v3860_v60 = vmul.f32 %v4271_v34, %v3856_v36 }
0x2b3b   :  { %v3864_v16 = vadd.f32 %v4272_v10, %v3860_v60 }
0x2b3d   :  { %4222 = vmatmul.msk.f32.vlgmr.msrb.gmra.mxu3 %vm66_vm0, %v3864_v16 }
0x2bc0   :  { %v3893_v42 = vpop.f32.mrf.mxu3 }
0x2bc1   :  { %v3894_v19 = vadd.f32 %v4273_v39, %v3893_v42 }
0x2bc3   :  { %v3897_v43 = vsel %vm3896_vm9, %v3894_v19, -inf }
0x2bc4   :  { %3898 = vmax.xlane.f32.xlu0 %v3897_v43 }
0x2c37   :  { %v3899_v3 = vpop.xlane.xlu0 %3898 }
0x2c38   :  { %v3900_v52 = vsub.f32 %v3894_v19, %v3899_v3 }
0x2c3a   :  { %v3901_v44 = vmul.f32 1.442695, %v3900_v52 }
0x2c3c   :  { %4458 = vpow2.f32 %v3901_v44 }
0x2c42   :  { %v4459_v46 = vpop.eup %4458 }
0x2c43   :  { %v3903_v26 = vsel %vm3896_vm9, %v4459_v46, 0.0 }
0x2c44   :  { %3904 = vadd.xlane.f32.xlu2 %v3903_v26 }
0x2cb7   :  { %v3905_v48 = vpop.xlane.xlu2 %3904 }
0x2cb8   :  { %4460 = vrcp.f32 %v3905_v48  ;;  %v3917_v51 = vand.u32 2147483648, %v3905_v48  ;;  %v3915_v40 = vand.u32 2147483647, %v3905_v48  ;;  %vm3911_vm1 = vweird.f32 %v3905_v48 }
0x2cba   :  { %v3918_v61 = vor.u32 1.1754944e-38, %v3917_v51  ;;  %vm3916_vm3 = vcmp.eq.f32.partialorder %v3915_v40, 8.507059e+37 }
0x2cbe   :  { %v4461_v24 = vpop.eup %4460 }
0x2cbf   :  { %v3907_v49 = vmul.f32 %v4461_v24, %v3905_v48  ;;  %vm3912_vm0 = vweird.f32 %v4461_v24 }
0x2cc0   :  { %vm3913_vm2 = vmor %vm3911_vm1, %vm3912_vm0 }
0x2cc1   :  { %v3908_v50 = vsub.f32 1.0, %v3907_v49 }
0x2cc3   :  { %v3909_v58 = vmul.f32 %v4461_v24, %v3908_v50 }
0x2cc5   :  { %v3910_v57 = vadd.f32 %v4461_v24, %v3909_v58 }
0x2cc7   :  { %v3914_v56 = vsel %vm3913_vm2, %v4461_v24, %v3910_v57 }
0x2cc8   :  { %v3919_v27 = vsel %vm3916_vm3, %v3918_v61, %v3914_v56 }
0x2cc9   :  { %v3920_v37 = vmul.f32 %v4459_v46, %v3919_v27 }
0x2ccb   :  { %3921 = vst.msk [vmem:[#allocation6] sm:$0x3] %vm3896_vm9, %v3920_v37 }
0x2ccc   :  { %3932 = dma.vmem_to_hbm [thread:$0]  %s3928_s11, 32, %s3930_s25, [#allocation4]  }
0x2ccd   :  { %4504 = dma.done.wait [#allocation4], 32  }
0x2cce   :  { %4505 = vsyncadd [#allocation4], 4294967264 }
0x2ccf   :  { %3937 = vsyncpa [#allocation4], 1 }
0x2cd0   :  { %3938 = vsyncpa [#allocation5], 1 }

</bundles_post_ra>
